<compile_context>
chip_gen: v7x
topology: tpu7x:2x2x1
jax: 0.10.0
libtpu: 0.0.40
codegen_flags: <defaults>
</compile_context>

<pallas_src>
import jax
import jax.numpy as jnp
from jax.experimental import pallas as pl
from jax.experimental.pallas import tpu as pltpu


# ----------------------------- in-kernel helpers ---------------------------

def _conv3x3_in_relu(xpad_ref, col_ref, w_ref, b_ref, B, H, W, Cin, Cout):
    """Conv2d(3x3, stride 1, pad 1, bias) + InstanceNorm2d + ReLU.

    xpad_ref: (B, H+2, W+2, Cin)  zero-padded activation (VMEM scratch)
    col_ref : (B*H*W, 9*Cin)      im2col buffer (VMEM scratch)
    w_ref   : (9*Cin, Cout)       conv weight, HWIO flattened at init
    b_ref   : (1, Cout)
    returns : (B, H, W, Cout)     activated output (value, stays on-chip)
    """
    N = B * H * W
    # im2col: copy the 9 shifted taps into one column buffer -> one matmul.
    for dy in range(3):
        for dx in range(3):
            t = dy * 3 + dx
            tap = xpad_ref[:, pl.ds(dy, H), pl.ds(dx, W), :].reshape(N, Cin)
            col_ref[:, pl.ds(t * Cin, Cin)] = tap
    y = jnp.dot(col_ref[...], w_ref[...], preferred_element_type=jnp.float32)
    y = y + b_ref[...]                                    # (N, Cout)

    # InstanceNorm2d defaults: affine=False, eps=1e-5, biased variance,
    # normalized per sample & channel over the H*W spatial extent.
    y = y.reshape(B, H * W, Cout)
    mean = jnp.mean(y, axis=1, keepdims=True)
    var = jnp.mean((y - mean) * (y - mean), axis=1, keepdims=True)
    y = (y - mean) * jax.lax.rsqrt(var + 1e-5)
    y = jnp.maximum(y, 0.0)                               # ReLU
    return y.reshape(B, H, W, Cout)


def make_fused_kernel(B, H, W, cl_plan, n_embed):
    n_blocks = len(cl_plan) - 1
    spatial = [(H // (2 ** i), W // (2 ** i)) for i in range(n_blocks)]

    def kernel(*refs):
        it = iter(refs)
        ids_ref, tbl_ref = next(it), next(it)
        blk_w = [(next(it), next(it), next(it), next(it))
                 for _ in range(n_blocks)]                 # (w1, b1, w2, b2)
        fc1w_ref, fc1b_ref = next(it), next(it)
        fc2w_ref, fc2b_ref = next(it), next(it)
        o_ref = next(it)
        blk_s = [(next(it), next(it), next(it), next(it))
                 for _ in range(n_blocks)]                 # (xpad_a, col_a, xpad_b, col_b)
        flat_ref = next(it)

        # Zero every padded scratch once; borders stay 0 == conv padding=1.
        for xpa, _, xpb, _ in blk_s:
            xpa[...] = jnp.zeros(xpa.shape, jnp.float32)
            xpb[...] = jnp.zeros(xpb.shape, jnp.float32)

        # ---- Embedding: one-hot @ table, computed and consumed in VMEM. ----
        # (ids are assumed in [0, n_embed), as torch.nn.Embedding requires.)
        N0 = B * H * W
        ids = ids_ref[...]                                       # (N0, 1) int32
        iota = jax.lax.broadcasted_iota(jnp.int32, (N0, n_embed), 1)
        onehot = (ids == iota).astype(jnp.float32)               # (N0, n_embed)
        emb = jnp.dot(onehot, tbl_ref[...],
                      preferred_element_type=jnp.float32)        # (N0, C0)
        C0 = cl_plan[0]
        blk_s[0][0][:, pl.ds(1, H), pl.ds(1, W), :] = emb.reshape(B, H, W, C0)

        # ---- Conv blocks: (conv + IN + ReLU) x 2, then MaxPool2d(2, 2). ----
        for bi in range(n_blocks):
            Hi, Wi = spatial[bi]
            Cin, Cout = cl_plan[bi], cl_plan[bi + 1]
            w1, b1, w2, b2 = blk_w[bi]
            xpa, cola, xpb, colb = blk_s[bi]

            y = _conv3x3_in_relu(xpa, cola, w1, b1, B, Hi, Wi, Cin, Cout)
            xpb[:, pl.ds(1, Hi), pl.ds(1, Wi), :] = y
            z = _conv3x3_in_relu(xpb, colb, w2, b2, B, Hi, Wi, Cout, Cout)

            # MaxPool 2x2 fused with the hand-off: window maxima are stored
            # either into the next block's padded-scratch interior or, for the
            # last block, straight into the NHWC-flattened MLP input slab
            # (its ordering was folded into fc1_w at init).
            Ho, Wo = Hi // 2, Wi // 2
            last = bi == n_blocks - 1
            for ho in range(Ho):
                rmax = jnp.maximum(z[:, 2 * ho, :, :], z[:, 2 * ho + 1, :, :])
                for wo in range(Wo):
                    v = jnp.maximum(rmax[:, 2 * wo, :], rmax[:, 2 * wo + 1, :])
                    if last:
                        flat_ref[:, pl.ds((ho * Wo + wo) * Cout, Cout)] = v
                    else:
                        blk_s[bi + 1][0][:, 1 + ho, 1 + wo, :] = v

        # ---- MLP head: Linear(F, F) + ReLU + Linear(F, num_classes). ----
        h = jnp.dot(flat_ref[...], fc1w_ref[...],
                    preferred_element_type=jnp.float32) + fc1b_ref[...]
        h = jnp.maximum(h, 0.0)
        o_ref[...] = jnp.dot(h, fc2w_ref[...],
                             preferred_element_type=jnp.float32) + fc2b_ref[...]

    return kernel


# ----------------------------- wrapper --------------------------------------

def embd_classifier_forward(x_tokens, params, cl_plan, num_classes, n_embed):
    B, H, W = x_tokens.shape
    n_blocks = len(cl_plan) - 1
    # PyTorch head is Linear(cl_plan[-1]*4*4, ...): final spatial must be 4x4.
    assert H // (2 ** n_blocks) == 4 and W // (2 ** n_blocks) == 4
    F = cl_plan[-1] * 4 * 4

    ids = x_tokens.reshape(B * H * W, 1).astype(jnp.int32)
    inputs = [ids, params["embed"]]
    for blk in params["blocks"]:
        inputs += [blk["w1"], blk["b1"], blk["w2"], blk["b2"]]
    inputs += [params["fc1_w"], params["fc1_b"], params["fc2_w"], params["fc2_b"]]

    scratch = []
    for bi in range(n_blocks):
        Hi, Wi = H // (2 ** bi), W // (2 ** bi)
        cin, cout = cl_plan[bi], cl_plan[bi + 1]
        scratch += [
            pltpu.VMEM((B, Hi + 2, Wi + 2, cin), jnp.float32),    # padded input
            pltpu.VMEM((B * Hi * Wi, 9 * cin), jnp.float32),      # im2col #1
            pltpu.VMEM((B, Hi + 2, Wi + 2, cout), jnp.float32),   # padded mid
            pltpu.VMEM((B * Hi * Wi, 9 * cout), jnp.float32),     # im2col #2
        ]
    scratch.append(pltpu.VMEM((B, F), jnp.float32))               # flattened feats

    kernel = make_fused_kernel(B, H, W, cl_plan, n_embed)
    return pl.pallas_call(
        kernel,
        out_shape=jax.ShapeDtypeStruct((B, num_classes), jnp.float32),
        in_specs=[pl.BlockSpec(memory_space=pltpu.MemorySpace.VMEM)
                  for _ in inputs],
        out_specs=pl.BlockSpec(memory_space=pltpu.MemorySpace.VMEM),
        scratch_shapes=scratch,
    )(*inputs)


# ----------------------------- parameters -----------------------------------

def init_params(key, cl_plan, num_classes, n_embed):
    n_blocks = len(cl_plan) - 1
    keys = iter(jax.random.split(key, 1 + 4 * n_blocks + 4))
    params = {"embed": jax.random.normal(next(keys), (n_embed, cl_plan[0]),
                                         jnp.float32) * 0.1}
    blocks = []
    for i in range(1, len(cl_plan)):
        cin, cout = cl_plan[i - 1], cl_plan[i]
        # Conv weights kept in HWIO and pre-flattened to (9*Cin, Cout) so the
        # kernel's im2col matmul consumes them directly (a torch OIHW weight
        # maps here via w.permute(2, 3, 1, 0).reshape(9*Cin, Cout)).
        w1 = jax.random.normal(next(keys), (3, 3, cin, cout), jnp.float32) * 0.1
        b1 = jax.random.normal(next(keys), (cout,), jnp.float32) * 0.1
        w2 = jax.random.normal(next(keys), (3, 3, cout, cout), jnp.float32) * 0.1
        b2 = jax.random.normal(next(keys), (cout,), jnp.float32) * 0.1
        blocks.append({"w1": w1.reshape(9 * cin, cout), "b1": b1.reshape(1, cout),
                       "w2": w2.reshape(9 * cout, cout), "b2": b2.reshape(1, cout)})
    params["blocks"] = blocks

    C, Ho, Wo = cl_plan[-1], 4, 4
    F = C * Ho * Wo
    # fc1 weight with input rows in torch's nn.Flatten (NCHW) order ...
    fc1_w_nchw = jax.random.normal(next(keys), (F, F), jnp.float32) * 0.05
    # ... permuted once at init so the kernel can feed its NHWC-flattened
    # activations directly (folds the flatten transpose into the weight).
    hh = jnp.arange(Ho).reshape(Ho, 1, 1)
    ww = jnp.arange(Wo).reshape(1, Wo, 1)
    cc = jnp.arange(C).reshape(1, 1, C)
    perm = (cc * (Ho * Wo) + hh * Wo + ww).reshape(-1)   # nhwc pos -> nchw row
    params["fc1_w"] = fc1_w_nchw[perm, :]
    params["fc1_b"] = jax.random.normal(next(keys), (1, F), jnp.float32) * 0.05
    params["fc2_w"] = jax.random.normal(next(keys), (F, num_classes),
                                        jnp.float32) * 0.05
    params["fc2_b"] = jax.random.normal(next(keys), (1, num_classes),
                                        jnp.float32) * 0.05
    return params


# ----------------------------- main ------------------------------------------

if __name__ == "__main__":
    # cl_plan=[8,16] -> one conv block; 8x8 -> 4x4 after one MaxPool, matching
    # the Linear(cl_plan[-1]*4*4, ...) head in the PyTorch module.
    cl_plan = [8, 16]
    num_classes = 2
    n_embed = 32
    B, H, W = 2, 8, 8

    key = jax.random.PRNGKey(0)
    kx, kp = jax.random.split(key)
    x_tokens = jax.random.randint(kx, (B, H, W), 0, n_embed, dtype=jnp.int32)
    params = init_params(kp, cl_plan, num_classes, n_embed)

    # TODO(synk): the pre_embed branch (frozen pretrained embedding + 1x1 conv)
    # and scale_grad_by_freq only affect the unused ctor path / training
    # backward; the forward for pre_embed=None is fully implemented here.
    out = embd_classifier_forward(x_tokens, params, cl_plan, num_classes, n_embed)
    out = jax.block_until_ready(out)
    assert out.shape == (B, num_classes) and out.dtype == jnp.float32
    print("KERNEL_OK")
</pallas_src>

<mosaic_0001>
module attributes {stable_mosaic.version = 11 : i64} {
  func.func @kernel(%arg0: memref<128x1xi32, #tpu.memory_space<vmem>>, %arg1: memref<32x8xf32, #tpu.memory_space<vmem>>, %arg2: memref<72x16xf32, #tpu.memory_space<vmem>>, %arg3: memref<1x16xf32, #tpu.memory_space<vmem>>, %arg4: memref<144x16xf32, #tpu.memory_space<vmem>>, %arg5: memref<1x16xf32, #tpu.memory_space<vmem>>, %arg6: memref<256x256xf32, #tpu.memory_space<vmem>>, %arg7: memref<1x256xf32, #tpu.memory_space<vmem>>, %arg8: memref<256x2xf32, #tpu.memory_space<vmem>>, %arg9: memref<1x2xf32, #tpu.memory_space<vmem>>, %arg10: memref<2x2xf32, #tpu.memory_space<vmem>>, %arg11: memref<2x10x10x8xf32, #tpu.memory_space<vmem>>, %arg12: memref<128x72xf32, #tpu.memory_space<vmem>>, %arg13: memref<2x10x10x16xf32, #tpu.memory_space<vmem>>, %arg14: memref<128x144xf32, #tpu.memory_space<vmem>>, %arg15: memref<2x256xf32, #tpu.memory_space<vmem>>) attributes {dimension_semantics = [], scalar_prefetch = 0 : i64, scratch_operands = 5 : i64, tpu.core_type = #tpu.core_type<tc>} {
    %cst = arith.constant 0.000000e+00 : f32
    %0 = vector.broadcast %cst : f32 to vector<2x10x10x8xf32>
    %c0 = arith.constant 0 : index
    %c0_0 = arith.constant 0 : index
    %c0_1 = arith.constant 0 : index
    %c0_2 = arith.constant 0 : index
    %1 = vector.load %arg11[%c0, %c0_0, %c0_1, %c0_2] : memref<2x10x10x8xf32, #tpu.memory_space<vmem>>, vector<2x10x10x8xf32>
    tpu.vector_store %arg11[%c0, %c0_0, %c0_1, %c0_2], %0 {strides = array<i32>} : memref<2x10x10x8xf32, #tpu.memory_space<vmem>>, vector<2x10x10x8xf32>,
    %cst_3 = arith.constant 0.000000e+00 : f32
    %2 = vector.broadcast %cst_3 : f32 to vector<2x10x10x16xf32>
    %c0_4 = arith.constant 0 : index
    %c0_5 = arith.constant 0 : index
    %c0_6 = arith.constant 0 : index
    %c0_7 = arith.constant 0 : index
    %3 = vector.load %arg13[%c0_4, %c0_5, %c0_6, %c0_7] : memref<2x10x10x16xf32, #tpu.memory_space<vmem>>, vector<2x10x10x16xf32>
    tpu.vector_store %arg13[%c0_4, %c0_5, %c0_6, %c0_7], %2 {strides = array<i32>} : memref<2x10x10x16xf32, #tpu.memory_space<vmem>>, vector<2x10x10x16xf32>,
    %c0_8 = arith.constant 0 : index
    %c0_9 = arith.constant 0 : index
    %4 = vector.load %arg0[%c0_8, %c0_9] : memref<128x1xi32, #tpu.memory_space<vmem>>, vector<128x1xi32>
    %5 = tpu.iota {dimensions = array<i32: 1>} : vector<128x32xi32>
    %6 = vector.broadcast %4 : vector<128x1xi32> to vector<128x32xi32>
    %7 = arith.cmpi eq, %6, %5 : vector<128x32xi32>
    %8 = arith.extui %7 : vector<128x32xi1> to vector<128x32xi32>
    %9 = arith.sitofp %8 : vector<128x32xi32> to vector<128x32xf32>
    %c0_10 = arith.constant 0 : index
    %c0_11 = arith.constant 0 : index
    %10 = vector.load %arg1[%c0_10, %c0_11] : memref<32x8xf32, #tpu.memory_space<vmem>>, vector<32x8xf32>
    %cst_12 = arith.constant dense<0.000000e+00> : vector<128x8xf32>
    %11 = tpu.matmul %9, %10, %cst_12 {dimension_numbers = #tpu.dot_dimension_numbers<[1], [0], [0], [1], [0, 0, 1, 1], [], []>} : vector<128x32xf32>, vector<32x8xf32>, vector<128x8xf32> -> vector<128x8xf32>
    %12 = vector.shape_cast %11 : vector<128x8xf32> to vector<2x8x8x8xf32>
    %c0_13 = arith.constant 0 : index
    %c1 = arith.constant 1 : index
    %c1_14 = arith.constant 1 : index
    %c0_15 = arith.constant 0 : index
    %13 = vector.load %arg11[%c0_13, %c1, %c1_14, %c0_15] : memref<2x10x10x8xf32, #tpu.memory_space<vmem>>, vector<2x8x8x8xf32>
    tpu.vector_store %arg11[%c0_13, %c1, %c1_14, %c0_15], %12 {strides = array<i32>} : memref<2x10x10x8xf32, #tpu.memory_space<vmem>>, vector<2x8x8x8xf32>,
    %c0_16 = arith.constant 0 : index
    %c0_17 = arith.constant 0 : index
    %c0_18 = arith.constant 0 : index
    %c0_19 = arith.constant 0 : index
    %14 = vector.load %arg11[%c0_16, %c0_17, %c0_18, %c0_19] : memref<2x10x10x8xf32, #tpu.memory_space<vmem>>, vector<2x8x8x8xf32>
    %15 = vector.shape_cast %14 : vector<2x8x8x8xf32> to vector<128x8xf32>
    %c0_20 = arith.constant 0 : index
    %c0_21 = arith.constant 0 : index
    %16 = vector.load %arg12[%c0_20, %c0_21] : memref<128x72xf32, #tpu.memory_space<vmem>>, vector<128x8xf32>
    tpu.vector_store %arg12[%c0_20, %c0_21], %15 {strides = array<i32>} : memref<128x72xf32, #tpu.memory_space<vmem>>, vector<128x8xf32>,
    %c0_22 = arith.constant 0 : index
    %c0_23 = arith.constant 0 : index
    %c1_24 = arith.constant 1 : index
    %c0_25 = arith.constant 0 : index
    %17 = vector.load %arg11[%c0_22, %c0_23, %c1_24, %c0_25] : memref<2x10x10x8xf32, #tpu.memory_space<vmem>>, vector<2x8x8x8xf32>
    %18 = vector.shape_cast %17 : vector<2x8x8x8xf32> to vector<128x8xf32>
    %c0_26 = arith.constant 0 : index
    %c8 = arith.constant 8 : index
    %19 = vector.load %arg12[%c0_26, %c8] : memref<128x72xf32, #tpu.memory_space<vmem>>, vector<128x8xf32>
    tpu.vector_store %arg12[%c0_26, %c8], %18 {strides = array<i32>} : memref<128x72xf32, #tpu.memory_space<vmem>>, vector<128x8xf32>,
    %c0_27 = arith.constant 0 : index
    %c0_28 = arith.constant 0 : index
    %c2 = arith.constant 2 : index
    %c0_29 = arith.constant 0 : index
    %20 = vector.load %arg11[%c0_27, %c0_28, %c2, %c0_29] : memref<2x10x10x8xf32, #tpu.memory_space<vmem>>, vector<2x8x8x8xf32>
    %21 = vector.shape_cast %20 : vector<2x8x8x8xf32> to vector<128x8xf32>
    %c0_30 = arith.constant 0 : index
    %c16 = arith.constant 16 : index
    %22 = vector.load %arg12[%c0_30, %c16] : memref<128x72xf32, #tpu.memory_space<vmem>>, vector<128x8xf32>
    tpu.vector_store %arg12[%c0_30, %c16], %21 {strides = array<i32>} : memref<128x72xf32, #tpu.memory_space<vmem>>, vector<128x8xf32>,
    %c0_31 = arith.constant 0 : index
    %c1_32 = arith.constant 1 : index
    %c0_33 = arith.constant 0 : index
    %c0_34 = arith.constant 0 : index
    %23 = vector.load %arg11[%c0_31, %c1_32, %c0_33, %c0_34] : memref<2x10x10x8xf32, #tpu.memory_space<vmem>>, vector<2x8x8x8xf32>
    %24 = vector.shape_cast %23 : vector<2x8x8x8xf32> to vector<128x8xf32>
    %c0_35 = arith.constant 0 : index
    %c24 = arith.constant 24 : index
    %25 = vector.load %arg12[%c0_35, %c24] : memref<128x72xf32, #tpu.memory_space<vmem>>, vector<128x8xf32>
    tpu.vector_store %arg12[%c0_35, %c24], %24 {strides = array<i32>} : memref<128x72xf32, #tpu.memory_space<vmem>>, vector<128x8xf32>,
    %c0_36 = arith.constant 0 : index
    %c1_37 = arith.constant 1 : index
    %c1_38 = arith.constant 1 : index
    %c0_39 = arith.constant 0 : index
    %26 = vector.load %arg11[%c0_36, %c1_37, %c1_38, %c0_39] : memref<2x10x10x8xf32, #tpu.memory_space<vmem>>, vector<2x8x8x8xf32>
    %27 = vector.shape_cast %26 : vector<2x8x8x8xf32> to vector<128x8xf32>
    %c0_40 = arith.constant 0 : index
    %c32 = arith.constant 32 : index
    %28 = vector.load %arg12[%c0_40, %c32] : memref<128x72xf32, #tpu.memory_space<vmem>>, vector<128x8xf32>
    tpu.vector_store %arg12[%c0_40, %c32], %27 {strides = array<i32>} : memref<128x72xf32, #tpu.memory_space<vmem>>, vector<128x8xf32>,
    %c0_41 = arith.constant 0 : index
    %c1_42 = arith.constant 1 : index
    %c2_43 = arith.constant 2 : index
    %c0_44 = arith.constant 0 : index
    %29 = vector.load %arg11[%c0_41, %c1_42, %c2_43, %c0_44] : memref<2x10x10x8xf32, #tpu.memory_space<vmem>>, vector<2x8x8x8xf32>
    %30 = vector.shape_cast %29 : vector<2x8x8x8xf32> to vector<128x8xf32>
    %c0_45 = arith.constant 0 : index
    %c40 = arith.constant 40 : index
    %31 = vector.load %arg12[%c0_45, %c40] : memref<128x72xf32, #tpu.memory_space<vmem>>, vector<128x8xf32>
    tpu.vector_store %arg12[%c0_45, %c40], %30 {strides = array<i32>} : memref<128x72xf32, #tpu.memory_space<vmem>>, vector<128x8xf32>,
    %c0_46 = arith.constant 0 : index
    %c2_47 = arith.constant 2 : index
    %c0_48 = arith.constant 0 : index
    %c0_49 = arith.constant 0 : index
    %32 = vector.load %arg11[%c0_46, %c2_47, %c0_48, %c0_49] : memref<2x10x10x8xf32, #tpu.memory_space<vmem>>, vector<2x8x8x8xf32>
    %33 = vector.shape_cast %32 : vector<2x8x8x8xf32> to vector<128x8xf32>
    %c0_50 = arith.constant 0 : index
    %c48 = arith.constant 48 : index
    %34 = vector.load %arg12[%c0_50, %c48] : memref<128x72xf32, #tpu.memory_space<vmem>>, vector<128x8xf32>
    tpu.vector_store %arg12[%c0_50, %c48], %33 {strides = array<i32>} : memref<128x72xf32, #tpu.memory_space<vmem>>, vector<128x8xf32>,
    %c0_51 = arith.constant 0 : index
    %c2_52 = arith.constant 2 : index
    %c1_53 = arith.constant 1 : index
    %c0_54 = arith.constant 0 : index
    %35 = vector.load %arg11[%c0_51, %c2_52, %c1_53, %c0_54] : memref<2x10x10x8xf32, #tpu.memory_space<vmem>>, vector<2x8x8x8xf32>
    %36 = vector.shape_cast %35 : vector<2x8x8x8xf32> to vector<128x8xf32>
    %c0_55 = arith.constant 0 : index
    %c56 = arith.constant 56 : index
    %37 = vector.load %arg12[%c0_55, %c56] : memref<128x72xf32, #tpu.memory_space<vmem>>, vector<128x8xf32>
    tpu.vector_store %arg12[%c0_55, %c56], %36 {strides = array<i32>} : memref<128x72xf32, #tpu.memory_space<vmem>>, vector<128x8xf32>,
    %c0_56 = arith.constant 0 : index
    %c2_57 = arith.constant 2 : index
    %c2_58 = arith.constant 2 : index
    %c0_59 = arith.constant 0 : index
    %38 = vector.load %arg11[%c0_56, %c2_57, %c2_58, %c0_59] : memref<2x10x10x8xf32, #tpu.memory_space<vmem>>, vector<2x8x8x8xf32>
    %39 = vector.shape_cast %38 : vector<2x8x8x8xf32> to vector<128x8xf32>
    %c0_60 = arith.constant 0 : index
    %c64 = arith.constant 64 : index
    %40 = vector.load %arg12[%c0_60, %c64] : memref<128x72xf32, #tpu.memory_space<vmem>>, vector<128x8xf32>
    tpu.vector_store %arg12[%c0_60, %c64], %39 {strides = array<i32>} : memref<128x72xf32, #tpu.memory_space<vmem>>, vector<128x8xf32>,
    %c0_61 = arith.constant 0 : index
    %c0_62 = arith.constant 0 : index
    %41 = vector.load %arg12[%c0_61, %c0_62] : memref<128x72xf32, #tpu.memory_space<vmem>>, vector<128x72xf32>
    %c0_63 = arith.constant 0 : index
    %c0_64 = arith.constant 0 : index
    %42 = vector.load %arg2[%c0_63, %c0_64] : memref<72x16xf32, #tpu.memory_space<vmem>>, vector<72x16xf32>
    %cst_65 = arith.constant dense<0.000000e+00> : vector<128x16xf32>
    %43 = tpu.matmul %41, %42, %cst_65 {dimension_numbers = #tpu.dot_dimension_numbers<[1], [0], [0], [1], [0, 0, 1, 1], [], []>} : vector<128x72xf32>, vector<72x16xf32>, vector<128x16xf32> -> vector<128x16xf32>
    %c0_66 = arith.constant 0 : index
    %c0_67 = arith.constant 0 : index
    %44 = vector.load %arg3[%c0_66, %c0_67] : memref<1x16xf32, #tpu.memory_space<vmem>>, vector<1x16xf32>
    %45 = vector.broadcast %44 : vector<1x16xf32> to vector<128x16xf32>
    %46 = arith.addf %43, %45 : vector<128x16xf32>
    %47 = vector.shape_cast %46 : vector<128x16xf32> to vector<2x64x16xf32>
    %cst_68 = arith.constant dense<0.000000e+00> : vector<2x16xf32>
    %48 = vector.multi_reduction <add>, %47, %cst_68 [1] : vector<2x64x16xf32> to vector<2x16xf32>
    %49 = vector.shape_cast %48 : vector<2x16xf32> to vector<2x1x16xf32>
    %cst_69 = arith.constant 6.400000e+01 : f32
    %50 = vector.broadcast %cst_69 : f32 to vector<2x1x16xf32>
    %51 = arith.divf %49, %50 : vector<2x1x16xf32>
    %52 = vector.broadcast %51 : vector<2x1x16xf32> to vector<2x64x16xf32>
    %53 = arith.subf %47, %52 : vector<2x64x16xf32>
    %54 = vector.broadcast %51 : vector<2x1x16xf32> to vector<2x64x16xf32>
    %55 = arith.subf %47, %54 : vector<2x64x16xf32>
    %56 = arith.mulf %53, %55 : vector<2x64x16xf32>
    %cst_70 = arith.constant dense<0.000000e+00> : vector<2x16xf32>
    %57 = vector.multi_reduction <add>, %56, %cst_70 [1] : vector<2x64x16xf32> to vector<2x16xf32>
    %58 = vector.shape_cast %57 : vector<2x16xf32> to vector<2x1x16xf32>
    %cst_71 = arith.constant 6.400000e+01 : f32
    %59 = vector.broadcast %cst_71 : f32 to vector<2x1x16xf32>
    %60 = arith.divf %58, %59 : vector<2x1x16xf32>
    %61 = vector.broadcast %51 : vector<2x1x16xf32> to vector<2x64x16xf32>
    %62 = arith.subf %47, %61 : vector<2x64x16xf32>
    %cst_72 = arith.constant 9.99999974E-6 : f32
    %63 = vector.broadcast %cst_72 : f32 to vector<2x1x16xf32>
    %64 = arith.addf %60, %63 : vector<2x1x16xf32>
    %65 = math.rsqrt %64 : vector<2x1x16xf32>
    %66 = vector.broadcast %65 : vector<2x1x16xf32> to vector<2x64x16xf32>
    %67 = arith.mulf %62, %66 : vector<2x64x16xf32>
    %cst_73 = arith.constant 0.000000e+00 : f32
    %68 = vector.broadcast %cst_73 : f32 to vector<2x64x16xf32>
    %69 = arith.maximumf %67, %68 : vector<2x64x16xf32>
    %70 = vector.shape_cast %69 : vector<2x64x16xf32> to vector<2x8x8x16xf32>
    %c0_74 = arith.constant 0 : index
    %c1_75 = arith.constant 1 : index
    %c1_76 = arith.constant 1 : index
    %c0_77 = arith.constant 0 : index
    %71 = vector.load %arg13[%c0_74, %c1_75, %c1_76, %c0_77] : memref<2x10x10x16xf32, #tpu.memory_space<vmem>>, vector<2x8x8x16xf32>
    tpu.vector_store %arg13[%c0_74, %c1_75, %c1_76, %c0_77], %70 {strides = array<i32>} : memref<2x10x10x16xf32, #tpu.memory_space<vmem>>, vector<2x8x8x16xf32>,
    %c0_78 = arith.constant 0 : index
    %c0_79 = arith.constant 0 : index
    %c0_80 = arith.constant 0 : index
    %c0_81 = arith.constant 0 : index
    %72 = vector.load %arg13[%c0_78, %c0_79, %c0_80, %c0_81] : memref<2x10x10x16xf32, #tpu.memory_space<vmem>>, vector<2x8x8x16xf32>
    %73 = vector.shape_cast %72 : vector<2x8x8x16xf32> to vector<128x16xf32>
    %c0_82 = arith.constant 0 : index
    %c0_83 = arith.constant 0 : index
    %74 = vector.load %arg14[%c0_82, %c0_83] : memref<128x144xf32, #tpu.memory_space<vmem>>, vector<128x16xf32>
    tpu.vector_store %arg14[%c0_82, %c0_83], %73 {strides = array<i32>} : memref<128x144xf32, #tpu.memory_space<vmem>>, vector<128x16xf32>,
    %c0_84 = arith.constant 0 : index
    %c0_85 = arith.constant 0 : index
    %c1_86 = arith.constant 1 : index
    %c0_87 = arith.constant 0 : index
    %75 = vector.load %arg13[%c0_84, %c0_85, %c1_86, %c0_87] : memref<2x10x10x16xf32, #tpu.memory_space<vmem>>, vector<2x8x8x16xf32>
    %76 = vector.shape_cast %75 : vector<2x8x8x16xf32> to vector<128x16xf32>
    %c0_88 = arith.constant 0 : index
    %c16_89 = arith.constant 16 : index
    %77 = vector.load %arg14[%c0_88, %c16_89] : memref<128x144xf32, #tpu.memory_space<vmem>>, vector<128x16xf32>
    tpu.vector_store %arg14[%c0_88, %c16_89], %76 {strides = array<i32>} : memref<128x144xf32, #tpu.memory_space<vmem>>, vector<128x16xf32>,
    %c0_90 = arith.constant 0 : index
    %c0_91 = arith.constant 0 : index
    %c2_92 = arith.constant 2 : index
    %c0_93 = arith.constant 0 : index
    %78 = vector.load %arg13[%c0_90, %c0_91, %c2_92, %c0_93] : memref<2x10x10x16xf32, #tpu.memory_space<vmem>>, vector<2x8x8x16xf32>
    %79 = vector.shape_cast %78 : vector<2x8x8x16xf32> to vector<128x16xf32>
    %c0_94 = arith.constant 0 : index
    %c32_95 = arith.constant 32 : index
    %80 = vector.load %arg14[%c0_94, %c32_95] : memref<128x144xf32, #tpu.memory_space<vmem>>, vector<128x16xf32>
    tpu.vector_store %arg14[%c0_94, %c32_95], %79 {strides = array<i32>} : memref<128x144xf32, #tpu.memory_space<vmem>>, vector<128x16xf32>,
    %c0_96 = arith.constant 0 : index
    %c1_97 = arith.constant 1 : index
    %c0_98 = arith.constant 0 : index
    %c0_99 = arith.constant 0 : index
    %81 = vector.load %arg13[%c0_96, %c1_97, %c0_98, %c0_99] : memref<2x10x10x16xf32, #tpu.memory_space<vmem>>, vector<2x8x8x16xf32>
    %82 = vector.shape_cast %81 : vector<2x8x8x16xf32> to vector<128x16xf32>
    %c0_100 = arith.constant 0 : index
    %c48_101 = arith.constant 48 : index
    %83 = vector.load %arg14[%c0_100, %c48_101] : memref<128x144xf32, #tpu.memory_space<vmem>>, vector<128x16xf32>
    tpu.vector_store %arg14[%c0_100, %c48_101], %82 {strides = array<i32>} : memref<128x144xf32, #tpu.memory_space<vmem>>, vector<128x16xf32>,
    %c0_102 = arith.constant 0 : index
    %c1_103 = arith.constant 1 : index
    %c1_104 = arith.constant 1 : index
    %c0_105 = arith.constant 0 : index
    %84 = vector.load %arg13[%c0_102, %c1_103, %c1_104, %c0_105] : memref<2x10x10x16xf32, #tpu.memory_space<vmem>>, vector<2x8x8x16xf32>
    %85 = vector.shape_cast %84 : vector<2x8x8x16xf32> to vector<128x16xf32>
    %c0_106 = arith.constant 0 : index
    %c64_107 = arith.constant 64 : index
    %86 = vector.load %arg14[%c0_106, %c64_107] : memref<128x144xf32, #tpu.memory_space<vmem>>, vector<128x16xf32>
    tpu.vector_store %arg14[%c0_106, %c64_107], %85 {strides = array<i32>} : memref<128x144xf32, #tpu.memory_space<vmem>>, vector<128x16xf32>,
    %c0_108 = arith.constant 0 : index
    %c1_109 = arith.constant 1 : index
    %c2_110 = arith.constant 2 : index
    %c0_111 = arith.constant 0 : index
    %87 = vector.load %arg13[%c0_108, %c1_109, %c2_110, %c0_111] : memref<2x10x10x16xf32, #tpu.memory_space<vmem>>, vector<2x8x8x16xf32>
    %88 = vector.shape_cast %87 : vector<2x8x8x16xf32> to vector<128x16xf32>
    %c0_112 = arith.constant 0 : index
    %c80 = arith.constant 80 : index
    %89 = vector.load %arg14[%c0_112, %c80] : memref<128x144xf32, #tpu.memory_space<vmem>>, vector<128x16xf32>
    tpu.vector_store %arg14[%c0_112, %c80], %88 {strides = array<i32>} : memref<128x144xf32, #tpu.memory_space<vmem>>, vector<128x16xf32>,
    %c0_113 = arith.constant 0 : index
    %c2_114 = arith.constant 2 : index
    %c0_115 = arith.constant 0 : index
    %c0_116 = arith.constant 0 : index
    %90 = vector.load %arg13[%c0_113, %c2_114, %c0_115, %c0_116] : memref<2x10x10x16xf32, #tpu.memory_space<vmem>>, vector<2x8x8x16xf32>
    %91 = vector.shape_cast %90 : vector<2x8x8x16xf32> to vector<128x16xf32>
    %c0_117 = arith.constant 0 : index
    %c96 = arith.constant 96 : index
    %92 = vector.load %arg14[%c0_117, %c96] : memref<128x144xf32, #tpu.memory_space<vmem>>, vector<128x16xf32>
    tpu.vector_store %arg14[%c0_117, %c96], %91 {strides = array<i32>} : memref<128x144xf32, #tpu.memory_space<vmem>>, vector<128x16xf32>,
    %c0_118 = arith.constant 0 : index
    %c2_119 = arith.constant 2 : index
    %c1_120 = arith.constant 1 : index
    %c0_121 = arith.constant 0 : index
    %93 = vector.load %arg13[%c0_118, %c2_119, %c1_120, %c0_121] : memref<2x10x10x16xf32, #tpu.memory_space<vmem>>, vector<2x8x8x16xf32>
    %94 = vector.shape_cast %93 : vector<2x8x8x16xf32> to vector<128x16xf32>
    %c0_122 = arith.constant 0 : index
    %c112 = arith.constant 112 : index
    %95 = vector.load %arg14[%c0_122, %c112] : memref<128x144xf32, #tpu.memory_space<vmem>>, vector<128x16xf32>
    tpu.vector_store %arg14[%c0_122, %c112], %94 {strides = array<i32>} : memref<128x144xf32, #tpu.memory_space<vmem>>, vector<128x16xf32>,
    %c0_123 = arith.constant 0 : index
    %c2_124 = arith.constant 2 : index
    %c2_125 = arith.constant 2 : index
    %c0_126 = arith.constant 0 : index
    %96 = vector.load %arg13[%c0_123, %c2_124, %c2_125, %c0_126] : memref<2x10x10x16xf32, #tpu.memory_space<vmem>>, vector<2x8x8x16xf32>
    %97 = vector.shape_cast %96 : vector<2x8x8x16xf32> to vector<128x16xf32>
    %c0_127 = arith.constant 0 : index
    %c128 = arith.constant 128 : index
    %98 = vector.load %arg14[%c0_127, %c128] : memref<128x144xf32, #tpu.memory_space<vmem>>, vector<128x16xf32>
    tpu.vector_store %arg14[%c0_127, %c128], %97 {strides = array<i32>} : memref<128x144xf32, #tpu.memory_space<vmem>>, vector<128x16xf32>,
    %c0_128 = arith.constant 0 : index
    %c0_129 = arith.constant 0 : index
    %99 = vector.load %arg14[%c0_128, %c0_129] : memref<128x144xf32, #tpu.memory_space<vmem>>, vector<128x144xf32>
    %c0_130 = arith.constant 0 : index
    %c0_131 = arith.constant 0 : index
    %100 = vector.load %arg4[%c0_130, %c0_131] : memref<144x16xf32, #tpu.memory_space<vmem>>, vector<144x16xf32>
    %cst_132 = arith.constant dense<0.000000e+00> : vector<128x16xf32>
    %101 = tpu.matmul %99, %100, %cst_132 {dimension_numbers = #tpu.dot_dimension_numbers<[1], [0], [0], [1], [0, 0, 1, 1], [], []>} : vector<128x144xf32>, vector<144x16xf32>, vector<128x16xf32> -> vector<128x16xf32>
    %c0_133 = arith.constant 0 : index
    %c0_134 = arith.constant 0 : index
    %102 = vector.load %arg5[%c0_133, %c0_134] : memref<1x16xf32, #tpu.memory_space<vmem>>, vector<1x16xf32>
    %103 = vector.broadcast %102 : vector<1x16xf32> to vector<128x16xf32>
    %104 = arith.addf %101, %103 : vector<128x16xf32>
    %105 = vector.shape_cast %104 : vector<128x16xf32> to vector<2x64x16xf32>
    %cst_135 = arith.constant dense<0.000000e+00> : vector<2x16xf32>
    %106 = vector.multi_reduction <add>, %105, %cst_135 [1] : vector<2x64x16xf32> to vector<2x16xf32>
    %107 = vector.shape_cast %106 : vector<2x16xf32> to vector<2x1x16xf32>
    %cst_136 = arith.constant 6.400000e+01 : f32
    %108 = vector.broadcast %cst_136 : f32 to vector<2x1x16xf32>
    %109 = arith.divf %107, %108 : vector<2x1x16xf32>
    %110 = vector.broadcast %109 : vector<2x1x16xf32> to vector<2x64x16xf32>
    %111 = arith.subf %105, %110 : vector<2x64x16xf32>
    %112 = vector.broadcast %109 : vector<2x1x16xf32> to vector<2x64x16xf32>
    %113 = arith.subf %105, %112 : vector<2x64x16xf32>
    %114 = arith.mulf %111, %113 : vector<2x64x16xf32>
    %cst_137 = arith.constant dense<0.000000e+00> : vector<2x16xf32>
    %115 = vector.multi_reduction <add>, %114, %cst_137 [1] : vector<2x64x16xf32> to vector<2x16xf32>
    %116 = vector.shape_cast %115 : vector<2x16xf32> to vector<2x1x16xf32>
    %cst_138 = arith.constant 6.400000e+01 : f32
    %117 = vector.broadcast %cst_138 : f32 to vector<2x1x16xf32>
    %118 = arith.divf %116, %117 : vector<2x1x16xf32>
    %119 = vector.broadcast %109 : vector<2x1x16xf32> to vector<2x64x16xf32>
    %120 = arith.subf %105, %119 : vector<2x64x16xf32>
    %cst_139 = arith.constant 9.99999974E-6 : f32
    %121 = vector.broadcast %cst_139 : f32 to vector<2x1x16xf32>
    %122 = arith.addf %118, %121 : vector<2x1x16xf32>
    %123 = math.rsqrt %122 : vector<2x1x16xf32>
    %124 = vector.broadcast %123 : vector<2x1x16xf32> to vector<2x64x16xf32>
    %125 = arith.mulf %120, %124 : vector<2x64x16xf32>
    %cst_140 = arith.constant 0.000000e+00 : f32
    %126 = vector.broadcast %cst_140 : f32 to vector<2x64x16xf32>
    %127 = arith.maximumf %125, %126 : vector<2x64x16xf32>
    %128 = vector.shape_cast %127 : vector<2x64x16xf32> to vector<2x8x8x16xf32>
    %129 = vector.extract_strided_slice %128 {offsets = [0, 0, 0, 0], sizes = [2, 1, 8, 16], strides = [1, 1, 1, 1]} : vector<2x8x8x16xf32> to vector<2x1x8x16xf32>
    %130 = vector.shape_cast %129 : vector<2x1x8x16xf32> to vector<2x8x16xf32>
    %131 = vector.extract_strided_slice %128 {offsets = [0, 1, 0, 0], sizes = [2, 1, 8, 16], strides = [1, 1, 1, 1]} : vector<2x8x8x16xf32> to vector<2x1x8x16xf32>
    %132 = vector.shape_cast %131 : vector<2x1x8x16xf32> to vector<2x8x16xf32>
    %133 = arith.maximumf %130, %132 : vector<2x8x16xf32>
    %134 = vector.extract_strided_slice %133 {offsets = [0, 0, 0], sizes = [2, 1, 16], strides = [1, 1, 1]} : vector<2x8x16xf32> to vector<2x1x16xf32>
    %135 = vector.shape_cast %134 : vector<2x1x16xf32> to vector<2x16xf32>
    %136 = vector.extract_strided_slice %133 {offsets = [0, 1, 0], sizes = [2, 1, 16], strides = [1, 1, 1]} : vector<2x8x16xf32> to vector<2x1x16xf32>
    %137 = vector.shape_cast %136 : vector<2x1x16xf32> to vector<2x16xf32>
    %138 = arith.maximumf %135, %137 : vector<2x16xf32>
    %c0_141 = arith.constant 0 : index
    %c0_142 = arith.constant 0 : index
    %139 = vector.load %arg15[%c0_141, %c0_142] : memref<2x256xf32, #tpu.memory_space<vmem>>, vector<2x16xf32>
    tpu.vector_store %arg15[%c0_141, %c0_142], %138 {strides = array<i32>} : memref<2x256xf32, #tpu.memory_space<vmem>>, vector<2x16xf32>,
    %140 = vector.extract_strided_slice %133 {offsets = [0, 2, 0], sizes = [2, 1, 16], strides = [1, 1, 1]} : vector<2x8x16xf32> to vector<2x1x16xf32>
    %141 = vector.shape_cast %140 : vector<2x1x16xf32> to vector<2x16xf32>
    %142 = vector.extract_strided_slice %133 {offsets = [0, 3, 0], sizes = [2, 1, 16], strides = [1, 1, 1]} : vector<2x8x16xf32> to vector<2x1x16xf32>
    %143 = vector.shape_cast %142 : vector<2x1x16xf32> to vector<2x16xf32>
    %144 = arith.maximumf %141, %143 : vector<2x16xf32>
    %c0_143 = arith.constant 0 : index
    %c16_144 = arith.constant 16 : index
    %145 = vector.load %arg15[%c0_143, %c16_144] : memref<2x256xf32, #tpu.memory_space<vmem>>, vector<2x16xf32>
    tpu.vector_store %arg15[%c0_143, %c16_144], %144 {strides = array<i32>} : memref<2x256xf32, #tpu.memory_space<vmem>>, vector<2x16xf32>,
    %146 = vector.extract_strided_slice %133 {offsets = [0, 4, 0], sizes = [2, 1, 16], strides = [1, 1, 1]} : vector<2x8x16xf32> to vector<2x1x16xf32>
    %147 = vector.shape_cast %146 : vector<2x1x16xf32> to vector<2x16xf32>
    %148 = vector.extract_strided_slice %133 {offsets = [0, 5, 0], sizes = [2, 1, 16], strides = [1, 1, 1]} : vector<2x8x16xf32> to vector<2x1x16xf32>
    %149 = vector.shape_cast %148 : vector<2x1x16xf32> to vector<2x16xf32>
    %150 = arith.maximumf %147, %149 : vector<2x16xf32>
    %c0_145 = arith.constant 0 : index
    %c32_146 = arith.constant 32 : index
    %151 = vector.load %arg15[%c0_145, %c32_146] : memref<2x256xf32, #tpu.memory_space<vmem>>, vector<2x16xf32>
    tpu.vector_store %arg15[%c0_145, %c32_146], %150 {strides = array<i32>} : memref<2x256xf32, #tpu.memory_space<vmem>>, vector<2x16xf32>,
    %152 = vector.extract_strided_slice %133 {offsets = [0, 6, 0], sizes = [2, 1, 16], strides = [1, 1, 1]} : vector<2x8x16xf32> to vector<2x1x16xf32>
    %153 = vector.shape_cast %152 : vector<2x1x16xf32> to vector<2x16xf32>
    %154 = vector.extract_strided_slice %133 {offsets = [0, 7, 0], sizes = [2, 1, 16], strides = [1, 1, 1]} : vector<2x8x16xf32> to vector<2x1x16xf32>
    %155 = vector.shape_cast %154 : vector<2x1x16xf32> to vector<2x16xf32>
    %156 = arith.maximumf %153, %155 : vector<2x16xf32>
    %c0_147 = arith.constant 0 : index
    %c48_148 = arith.constant 48 : index
    %157 = vector.load %arg15[%c0_147, %c48_148] : memref<2x256xf32, #tpu.memory_space<vmem>>, vector<2x16xf32>
    tpu.vector_store %arg15[%c0_147, %c48_148], %156 {strides = array<i32>} : memref<2x256xf32, #tpu.memory_space<vmem>>, vector<2x16xf32>,
    %158 = vector.extract_strided_slice %128 {offsets = [0, 2, 0, 0], sizes = [2, 1, 8, 16], strides = [1, 1, 1, 1]} : vector<2x8x8x16xf32> to vector<2x1x8x16xf32>
    %159 = vector.shape_cast %158 : vector<2x1x8x16xf32> to vector<2x8x16xf32>
    %160 = vector.extract_strided_slice %128 {offsets = [0, 3, 0, 0], sizes = [2, 1, 8, 16], strides = [1, 1, 1, 1]} : vector<2x8x8x16xf32> to vector<2x1x8x16xf32>
    %161 = vector.shape_cast %160 : vector<2x1x8x16xf32> to vector<2x8x16xf32>
    %162 = arith.maximumf %159, %161 : vector<2x8x16xf32>
    %163 = vector.extract_strided_slice %162 {offsets = [0, 0, 0], sizes = [2, 1, 16], strides = [1, 1, 1]} : vector<2x8x16xf32> to vector<2x1x16xf32>
    %164 = vector.shape_cast %163 : vector<2x1x16xf32> to vector<2x16xf32>
    %165 = vector.extract_strided_slice %162 {offsets = [0, 1, 0], sizes = [2, 1, 16], strides = [1, 1, 1]} : vector<2x8x16xf32> to vector<2x1x16xf32>
    %166 = vector.shape_cast %165 : vector<2x1x16xf32> to vector<2x16xf32>
    %167 = arith.maximumf %164, %166 : vector<2x16xf32>
    %c0_149 = arith.constant 0 : index
    %c64_150 = arith.constant 64 : index
    %168 = vector.load %arg15[%c0_149, %c64_150] : memref<2x256xf32, #tpu.memory_space<vmem>>, vector<2x16xf32>
    tpu.vector_store %arg15[%c0_149, %c64_150], %167 {strides = array<i32>} : memref<2x256xf32, #tpu.memory_space<vmem>>, vector<2x16xf32>,
    %169 = vector.extract_strided_slice %162 {offsets = [0, 2, 0], sizes = [2, 1, 16], strides = [1, 1, 1]} : vector<2x8x16xf32> to vector<2x1x16xf32>
    %170 = vector.shape_cast %169 : vector<2x1x16xf32> to vector<2x16xf32>
    %171 = vector.extract_strided_slice %162 {offsets = [0, 3, 0], sizes = [2, 1, 16], strides = [1, 1, 1]} : vector<2x8x16xf32> to vector<2x1x16xf32>
    %172 = vector.shape_cast %171 : vector<2x1x16xf32> to vector<2x16xf32>
    %173 = arith.maximumf %170, %172 : vector<2x16xf32>
    %c0_151 = arith.constant 0 : index
    %c80_152 = arith.constant 80 : index
    %174 = vector.load %arg15[%c0_151, %c80_152] : memref<2x256xf32, #tpu.memory_space<vmem>>, vector<2x16xf32>
    tpu.vector_store %arg15[%c0_151, %c80_152], %173 {strides = array<i32>} : memref<2x256xf32, #tpu.memory_space<vmem>>, vector<2x16xf32>,
    %175 = vector.extract_strided_slice %162 {offsets = [0, 4, 0], sizes = [2, 1, 16], strides = [1, 1, 1]} : vector<2x8x16xf32> to vector<2x1x16xf32>
    %176 = vector.shape_cast %175 : vector<2x1x16xf32> to vector<2x16xf32>
    %177 = vector.extract_strided_slice %162 {offsets = [0, 5, 0], sizes = [2, 1, 16], strides = [1, 1, 1]} : vector<2x8x16xf32> to vector<2x1x16xf32>
    %178 = vector.shape_cast %177 : vector<2x1x16xf32> to vector<2x16xf32>
    %179 = arith.maximumf %176, %178 : vector<2x16xf32>
    %c0_153 = arith.constant 0 : index
    %c96_154 = arith.constant 96 : index
    %180 = vector.load %arg15[%c0_153, %c96_154] : memref<2x256xf32, #tpu.memory_space<vmem>>, vector<2x16xf32>
    tpu.vector_store %arg15[%c0_153, %c96_154], %179 {strides = array<i32>} : memref<2x256xf32, #tpu.memory_space<vmem>>, vector<2x16xf32>,
    %181 = vector.extract_strided_slice %162 {offsets = [0, 6, 0], sizes = [2, 1, 16], strides = [1, 1, 1]} : vector<2x8x16xf32> to vector<2x1x16xf32>
    %182 = vector.shape_cast %181 : vector<2x1x16xf32> to vector<2x16xf32>
    %183 = vector.extract_strided_slice %162 {offsets = [0, 7, 0], sizes = [2, 1, 16], strides = [1, 1, 1]} : vector<2x8x16xf32> to vector<2x1x16xf32>
    %184 = vector.shape_cast %183 : vector<2x1x16xf32> to vector<2x16xf32>
    %185 = arith.maximumf %182, %184 : vector<2x16xf32>
    %c0_155 = arith.constant 0 : index
    %c112_156 = arith.constant 112 : index
    %186 = vector.load %arg15[%c0_155, %c112_156] : memref<2x256xf32, #tpu.memory_space<vmem>>, vector<2x16xf32>
    tpu.vector_store %arg15[%c0_155, %c112_156], %185 {strides = array<i32>} : memref<2x256xf32, #tpu.memory_space<vmem>>, vector<2x16xf32>,
    %187 = vector.extract_strided_slice %128 {offsets = [0, 4, 0, 0], sizes = [2, 1, 8, 16], strides = [1, 1, 1, 1]} : vector<2x8x8x16xf32> to vector<2x1x8x16xf32>
    %188 = vector.shape_cast %187 : vector<2x1x8x16xf32> to vector<2x8x16xf32>
    %189 = vector.extract_strided_slice %128 {offsets = [0, 5, 0, 0], sizes = [2, 1, 8, 16], strides = [1, 1, 1, 1]} : vector<2x8x8x16xf32> to vector<2x1x8x16xf32>
    %190 = vector.shape_cast %189 : vector<2x1x8x16xf32> to vector<2x8x16xf32>
    %191 = arith.maximumf %188, %190 : vector<2x8x16xf32>
    %192 = vector.extract_strided_slice %191 {offsets = [0, 0, 0], sizes = [2, 1, 16], strides = [1, 1, 1]} : vector<2x8x16xf32> to vector<2x1x16xf32>
    %193 = vector.shape_cast %192 : vector<2x1x16xf32> to vector<2x16xf32>
    %194 = vector.extract_strided_slice %191 {offsets = [0, 1, 0], sizes = [2, 1, 16], strides = [1, 1, 1]} : vector<2x8x16xf32> to vector<2x1x16xf32>
    %195 = vector.shape_cast %194 : vector<2x1x16xf32> to vector<2x16xf32>
    %196 = arith.maximumf %193, %195 : vector<2x16xf32>
    %c0_157 = arith.constant 0 : index
    %c128_158 = arith.constant 128 : index
    %197 = vector.load %arg15[%c0_157, %c128_158] : memref<2x256xf32, #tpu.memory_space<vmem>>, vector<2x16xf32>
    tpu.vector_store %arg15[%c0_157, %c128_158], %196 {strides = array<i32>} : memref<2x256xf32, #tpu.memory_space<vmem>>, vector<2x16xf32>,
    %198 = vector.extract_strided_slice %191 {offsets = [0, 2, 0], sizes = [2, 1, 16], strides = [1, 1, 1]} : vector<2x8x16xf32> to vector<2x1x16xf32>
    %199 = vector.shape_cast %198 : vector<2x1x16xf32> to vector<2x16xf32>
    %200 = vector.extract_strided_slice %191 {offsets = [0, 3, 0], sizes = [2, 1, 16], strides = [1, 1, 1]} : vector<2x8x16xf32> to vector<2x1x16xf32>
    %201 = vector.shape_cast %200 : vector<2x1x16xf32> to vector<2x16xf32>
    %202 = arith.maximumf %199, %201 : vector<2x16xf32>
    %c0_159 = arith.constant 0 : index
    %c144 = arith.constant 144 : index
    %203 = vector.load %arg15[%c0_159, %c144] : memref<2x256xf32, #tpu.memory_space<vmem>>, vector<2x16xf32>
    tpu.vector_store %arg15[%c0_159, %c144], %202 {strides = array<i32>} : memref<2x256xf32, #tpu.memory_space<vmem>>, vector<2x16xf32>,
    %204 = vector.extract_strided_slice %191 {offsets = [0, 4, 0], sizes = [2, 1, 16], strides = [1, 1, 1]} : vector<2x8x16xf32> to vector<2x1x16xf32>
    %205 = vector.shape_cast %204 : vector<2x1x16xf32> to vector<2x16xf32>
    %206 = vector.extract_strided_slice %191 {offsets = [0, 5, 0], sizes = [2, 1, 16], strides = [1, 1, 1]} : vector<2x8x16xf32> to vector<2x1x16xf32>
    %207 = vector.shape_cast %206 : vector<2x1x16xf32> to vector<2x16xf32>
    %208 = arith.maximumf %205, %207 : vector<2x16xf32>
    %c0_160 = arith.constant 0 : index
    %c160 = arith.constant 160 : index
    %209 = vector.load %arg15[%c0_160, %c160] : memref<2x256xf32, #tpu.memory_space<vmem>>, vector<2x16xf32>
    tpu.vector_store %arg15[%c0_160, %c160], %208 {strides = array<i32>} : memref<2x256xf32, #tpu.memory_space<vmem>>, vector<2x16xf32>,
    %210 = vector.extract_strided_slice %191 {offsets = [0, 6, 0], sizes = [2, 1, 16], strides = [1, 1, 1]} : vector<2x8x16xf32> to vector<2x1x16xf32>
    %211 = vector.shape_cast %210 : vector<2x1x16xf32> to vector<2x16xf32>
    %212 = vector.extract_strided_slice %191 {offsets = [0, 7, 0], sizes = [2, 1, 16], strides = [1, 1, 1]} : vector<2x8x16xf32> to vector<2x1x16xf32>
    %213 = vector.shape_cast %212 : vector<2x1x16xf32> to vector<2x16xf32>
    %214 = arith.maximumf %211, %213 : vector<2x16xf32>
    %c0_161 = arith.constant 0 : index
    %c176 = arith.constant 176 : index
    %215 = vector.load %arg15[%c0_161, %c176] : memref<2x256xf32, #tpu.memory_space<vmem>>, vector<2x16xf32>
    tpu.vector_store %arg15[%c0_161, %c176], %214 {strides = array<i32>} : memref<2x256xf32, #tpu.memory_space<vmem>>, vector<2x16xf32>,
    %216 = vector.extract_strided_slice %128 {offsets = [0, 6, 0, 0], sizes = [2, 1, 8, 16], strides = [1, 1, 1, 1]} : vector<2x8x8x16xf32> to vector<2x1x8x16xf32>
    %217 = vector.shape_cast %216 : vector<2x1x8x16xf32> to vector<2x8x16xf32>
    %218 = vector.extract_strided_slice %128 {offsets = [0, 7, 0, 0], sizes = [2, 1, 8, 16], strides = [1, 1, 1, 1]} : vector<2x8x8x16xf32> to vector<2x1x8x16xf32>
    %219 = vector.shape_cast %218 : vector<2x1x8x16xf32> to vector<2x8x16xf32>
    %220 = arith.maximumf %217, %219 : vector<2x8x16xf32>
    %221 = vector.extract_strided_slice %220 {offsets = [0, 0, 0], sizes = [2, 1, 16], strides = [1, 1, 1]} : vector<2x8x16xf32> to vector<2x1x16xf32>
    %222 = vector.shape_cast %221 : vector<2x1x16xf32> to vector<2x16xf32>
    %223 = vector.extract_strided_slice %220 {offsets = [0, 1, 0], sizes = [2, 1, 16], strides = [1, 1, 1]} : vector<2x8x16xf32> to vector<2x1x16xf32>
    %224 = vector.shape_cast %223 : vector<2x1x16xf32> to vector<2x16xf32>
    %225 = arith.maximumf %222, %224 : vector<2x16xf32>
    %c0_162 = arith.constant 0 : index
    %c192 = arith.constant 192 : index
    %226 = vector.load %arg15[%c0_162, %c192] : memref<2x256xf32, #tpu.memory_space<vmem>>, vector<2x16xf32>
    tpu.vector_store %arg15[%c0_162, %c192], %225 {strides = array<i32>} : memref<2x256xf32, #tpu.memory_space<vmem>>, vector<2x16xf32>,
    %227 = vector.extract_strided_slice %220 {offsets = [0, 2, 0], sizes = [2, 1, 16], strides = [1, 1, 1]} : vector<2x8x16xf32> to vector<2x1x16xf32>
    %228 = vector.shape_cast %227 : vector<2x1x16xf32> to vector<2x16xf32>
    %229 = vector.extract_strided_slice %220 {offsets = [0, 3, 0], sizes = [2, 1, 16], strides = [1, 1, 1]} : vector<2x8x16xf32> to vector<2x1x16xf32>
    %230 = vector.shape_cast %229 : vector<2x1x16xf32> to vector<2x16xf32>
    %231 = arith.maximumf %228, %230 : vector<2x16xf32>
    %c0_163 = arith.constant 0 : index
    %c208 = arith.constant 208 : index
    %232 = vector.load %arg15[%c0_163, %c208] : memref<2x256xf32, #tpu.memory_space<vmem>>, vector<2x16xf32>
    tpu.vector_store %arg15[%c0_163, %c208], %231 {strides = array<i32>} : memref<2x256xf32, #tpu.memory_space<vmem>>, vector<2x16xf32>,
    %233 = vector.extract_strided_slice %220 {offsets = [0, 4, 0], sizes = [2, 1, 16], strides = [1, 1, 1]} : vector<2x8x16xf32> to vector<2x1x16xf32>
    %234 = vector.shape_cast %233 : vector<2x1x16xf32> to vector<2x16xf32>
    %235 = vector.extract_strided_slice %220 {offsets = [0, 5, 0], sizes = [2, 1, 16], strides = [1, 1, 1]} : vector<2x8x16xf32> to vector<2x1x16xf32>
    %236 = vector.shape_cast %235 : vector<2x1x16xf32> to vector<2x16xf32>
    %237 = arith.maximumf %234, %236 : vector<2x16xf32>
    %c0_164 = arith.constant 0 : index
    %c224 = arith.constant 224 : index
    %238 = vector.load %arg15[%c0_164, %c224] : memref<2x256xf32, #tpu.memory_space<vmem>>, vector<2x16xf32>
    tpu.vector_store %arg15[%c0_164, %c224], %237 {strides = array<i32>} : memref<2x256xf32, #tpu.memory_space<vmem>>, vector<2x16xf32>,
    %239 = vector.extract_strided_slice %220 {offsets = [0, 6, 0], sizes = [2, 1, 16], strides = [1, 1, 1]} : vector<2x8x16xf32> to vector<2x1x16xf32>
    %240 = vector.shape_cast %239 : vector<2x1x16xf32> to vector<2x16xf32>
    %241 = vector.extract_strided_slice %220 {offsets = [0, 7, 0], sizes = [2, 1, 16], strides = [1, 1, 1]} : vector<2x8x16xf32> to vector<2x1x16xf32>
    %242 = vector.shape_cast %241 : vector<2x1x16xf32> to vector<2x16xf32>
    %243 = arith.maximumf %240, %242 : vector<2x16xf32>
    %c0_165 = arith.constant 0 : index
    %c240 = arith.constant 240 : index
    %244 = vector.load %arg15[%c0_165, %c240] : memref<2x256xf32, #tpu.memory_space<vmem>>, vector<2x16xf32>
    tpu.vector_store %arg15[%c0_165, %c240], %243 {strides = array<i32>} : memref<2x256xf32, #tpu.memory_space<vmem>>, vector<2x16xf32>,
    %c0_166 = arith.constant 0 : index
    %c0_167 = arith.constant 0 : index
    %245 = vector.load %arg15[%c0_166, %c0_167] : memref<2x256xf32, #tpu.memory_space<vmem>>, vector<2x256xf32>
    %c0_168 = arith.constant 0 : index
    %c0_169 = arith.constant 0 : index
    %246 = vector.load %arg6[%c0_168, %c0_169] : memref<256x256xf32, #tpu.memory_space<vmem>>, vector<256x256xf32>
    %cst_170 = arith.constant dense<0.000000e+00> : vector<2x256xf32>
    %247 = tpu.matmul %245, %246, %cst_170 {dimension_numbers = #tpu.dot_dimension_numbers<[1], [0], [0], [1], [0, 0, 1, 1], [], []>} : vector<2x256xf32>, vector<256x256xf32>, vector<2x256xf32> -> vector<2x256xf32>
    %c0_171 = arith.constant 0 : index
    %c0_172 = arith.constant 0 : index
    %248 = vector.load %arg7[%c0_171, %c0_172] : memref<1x256xf32, #tpu.memory_space<vmem>>, vector<1x256xf32>
    %249 = vector.broadcast %248 : vector<1x256xf32> to vector<2x256xf32>
    %250 = arith.addf %247, %249 : vector<2x256xf32>
    %cst_173 = arith.constant 0.000000e+00 : f32
    %251 = vector.broadcast %cst_173 : f32 to vector<2x256xf32>
    %252 = arith.maximumf %250, %251 : vector<2x256xf32>
    %c0_174 = arith.constant 0 : index
    %c0_175 = arith.constant 0 : index
    %253 = vector.load %arg8[%c0_174, %c0_175] : memref<256x2xf32, #tpu.memory_space<vmem>>, vector<256x2xf32>
    %cst_176 = arith.constant dense<0.000000e+00> : vector<2x2xf32>
    %254 = tpu.matmul %252, %253, %cst_176 {dimension_numbers = #tpu.dot_dimension_numbers<[1], [0], [0], [1], [0, 0, 1, 1], [], []>} : vector<2x256xf32>, vector<256x2xf32>, vector<2x2xf32> -> vector<2x2xf32>
    %c0_177 = arith.constant 0 : index
    %c0_178 = arith.constant 0 : index
    %255 = vector.load %arg9[%c0_177, %c0_178] : memref<1x2xf32, #tpu.memory_space<vmem>>, vector<1x2xf32>
    %256 = vector.broadcast %255 : vector<1x2xf32> to vector<2x2xf32>
    %257 = arith.addf %254, %256 : vector<2x2xf32>
    %c0_179 = arith.constant 0 : index
    %c0_180 = arith.constant 0 : index
    %258 = vector.load %arg10[%c0_179, %c0_180] : memref<2x2xf32, #tpu.memory_space<vmem>>, vector<2x2xf32>
    tpu.vector_store %arg10[%c0_179, %c0_180], %257 {strides = array<i32>} : memref<2x2xf32, #tpu.memory_space<vmem>>, vector<2x2xf32>,
    return
  }
}

</mosaic_0001>

<bundles_post_ra>
// kernel: tpu_custom_call.1
= control target key start
LH: loop header
LB: loop body
LE: loop exit
PB: predicated region body
PF: predicated region fallthrough
CT: control target
= control target key end

     0   :  { %v3882_v2 = vmov 0   ;;  %s5858_s0 = inlined_call_operand.vmem [shape: s32[128,1], index: 0, kind: input, shape index: {}]   ;;  %s5859_s1 = inlined_call_operand.vmem [shape: f32[32,8], index: 1, kind: input, shape index: {}]   ;;  %s5860_s2 = inlined_call_operand.vmem [shape: f32[72,16], index: 2, kind: input, shape index: {}]   ;;  %s5861_s3 = inlined_call_operand.vmem [shape: f32[1,16], index: 3, kind: input, shape index: {}]   ;;  %s5862_s4 = inlined_call_operand.vmem [shape: f32[144,16], index: 4, kind: input, shape index: {}]   ;;  %s5863_s5 = inlined_call_operand.vmem [shape: f32[1,16], index: 5, kind: input, shape index: {}]   ;;  %s5864_s6 = inlined_call_operand.vmem [shape: f32[256,256], index: 6, kind: input, shape index: {}]   ;;  %s5865_s7 = inlined_call_operand.vmem [shape: f32[1,256], index: 7, kind: input, shape index: {}]   ;;  %s5866_s8 = inlined_call_operand.vmem [shape: f32[256,2], index: 8, kind: input, shape index: {}]   ;;  %s5867_s9 = inlined_call_operand.vmem [shape: f32[1,2], index: 9, kind: input, shape index: {}]   ;;  %s5868_s10 = inlined_call_operand.hbm [shape: f32[2,2], index: 10, kind: output, shape index: {}]  }
   0x1   :  { %v122_v0 = vld [vmem:[%s5858_s0 + $0x10] sm:$0xff]  ;;  %v120_v1 = vld [vmem:[%s5858_s0] sm:$0xff]  ;;  %3849 = vset.pattern.permute.xlu1 %v3882_v2  ;;  %3848 = vset.pattern.permute.xlu0 %v3882_v2  ;;  %v123_v3 = vld [vmem:[%s5858_s0 + $0x18] sm:$0xff] }
   0x2   :  { %145 = vperm.xlu1 %3849, %v122_v0   ;;  %139 = vperm.xlu0 %3848, %v120_v1   ;;  %v121_v4 = vld [vmem:[%s5858_s0 + $0x8] sm:$0xff]  ;;  %v234_v5 = vld [vmem:[%s5859_s1] sm:$0xff]  ;;  %v236_v8 = vld [vmem:[%s5859_s1 + $0x10] sm:$0xff] }
   0x3   :  { %v235_v6 = vld [vmem:[%s5859_s1 + $0x8] sm:$0xff]  ;;  %v237_v9 = vld [vmem:[%s5859_s1 + $0x18] sm:$0xff] }
   0x4   :  { %v3685_v7 = vpack.c.bf16 %v235_v6, %v234_v5 }
   0x6   :  { %148 = vperm.xlu1 %3849, %v123_v3   ;;  %142 = vperm.xlu0 %3848, %v121_v4  }
   0x7   :  { %15 = vsyncpa [#allocation8], 0  ;;  %v125_v10 = vld [vmem:[%s5858_s0 + $0x28] sm:$0xff]  ;;  %v124_v11 = vld [vmem:[%s5858_s0 + $0x20] sm:$0xff]  ;;  %v3689_v12 = vpack.c.bf16 %v237_v9, %v236_v8  ;;  %3686 = vmatprep.subr.bf16.mxu1 %v3685_v7  ;;  %vm36_vm0 = vcmask 64512   ;;  %vm38_vm1 = vcmask 58368   ;;  %v136_v29 = vlaneseq }
   0x8   :  { %3688 = vmatpush3.bf16.msra.mxu1 %v3685_v7  ;;  %v127_v13 = vld [vmem:[%s5858_s0 + $0x38] sm:$0xff]  ;;  %v126_v14 = vld [vmem:[%s5858_s0 + $0x30] sm:$0xff]  ;;  %v129_v15 = vld [vmem:[%s5858_s0 + $0x48] sm:$0xff]  ;;  %v3883_v23 = vmov 0.0   ;;  %s3885_s12 = smov 8   ;;  %s3886_s13 = smov 56  }
   0x9   :  { %3690 = vmatprep.subr.bf16.mxu1 %v3689_v12  ;;  %v128_v16 = vld [vmem:[%s5858_s0 + $0x40] sm:$0xff]  ;;  %v131_v17 = vld [vmem:[%s5858_s0 + $0x58] sm:$0xff]  ;;  %v130_v18 = vld [vmem:[%s5858_s0 + $0x50] sm:$0xff]  ;;  %56 = vst.msk [vmem:[#allocation2 + $0x90] sm:$0xff] %vm36_vm0, %v3883_v23  ;;  %s3887_s14 = smov 16   ;;  %s3888_s15 = smov 64  }
   0xa   :  { %154 = vperm.xlu1 %3849, %v125_v10   ;;  %151 = vperm.xlu0 %3848, %v124_v11   ;;  %v133_v19 = vld [vmem:[%s5858_s0 + $0x68] sm:$0xff]  ;;  %v132_v20 = vld [vmem:[%s5858_s0 + $0x60] sm:$0xff]  ;;  %v135_v21 = vld [vmem:[%s5858_s0 + $0x78] sm:$0xff]  ;;  %37 = vst.msk [vmem:[#allocation2] sm:$0xff] %vm36_vm0, %v3883_v23  ;;  %v4099_v30 = vand.u32 127, %v136_v29  ;;  %vm238_vm2 = vcmask 261120  }
   0xb   :  { %v134_v22 = vld [vmem:[%s5858_s0 + $0x70] sm:$0xff]  ;;  %40 = vst.msk [vmem:[#allocation2 + $0x10] sm:$0xff] %vm36_vm0, %v3883_v23  ;;  %42 = vst.msk [vmem:[#allocation2 + $0x20] sm:$0xff] %vm36_vm0, %v3883_v23  ;;  %s3884_s0 = smov 48   ;;  %s3889_s1 = smov 24  }
   0xc   :  { %3692 = vmatpush3.bf16.msra.mxu1 %v3689_v12  ;;  %44 = vst.msk [vmem:[#allocation2 + $0x30] sm:$0xff] %vm36_vm0, %v3883_v23  ;;  %46 = vst.msk [vmem:[#allocation2 + $0x40] sm:$0xff] %vm36_vm0, %v3883_v23  ;;  %s3890_s16 = smov 32   ;;  %s3891_s17 = smov 40  }
   0xd   :  { %48 = vst.msk [vmem:[#allocation2 + $0x50] sm:$0xff] %vm36_vm0, %v3883_v23  ;;  %50 = vst.msk [vmem:[#allocation2 + $0x60] sm:$0xff] %vm36_vm0, %v3883_v23  ;;  %s3895_s30 = smov 80   ;;  %s3897_s18 = smov [#allocation7]  }
   0xe   :  { %160 = vperm.xlu1 %3849, %v127_v13   ;;  %157 = vperm.xlu0 %3848, %v126_v14   ;;  %52 = vst.msk [vmem:[#allocation2 + $0x70] sm:$0xff] %vm36_vm0, %v3883_v23  ;;  %54 = vst.msk [vmem:[#allocation2 + $0x80] sm:$0xff] %vm36_vm0, %v3883_v23 }
   0xf   :  { %58 = vst.msk [vmem:[#allocation2 + $0xa0] sm:$0xff] %vm36_vm0, %v3883_v23  ;;  %60 = vst.msk [vmem:[#allocation2 + $0xb0] sm:$0xff] %vm36_vm0, %v3883_v23 }
  0x10   :  { %62 = vst.msk [vmem:[#allocation2 + $0xc0] sm:$0xff] %vm36_vm0, %v3883_v23  ;;  %64 = vst.msk [vmem:[#allocation2 + $0xd0] sm:$0xff] %vm36_vm0, %v3883_v23  ;;  %v974_v24 = vld [vmem:[#allocation2 + $0x90] sm:$0xff] }
  0x11   :  { %66 = vst.msk [vmem:[#allocation2 + $0xe0] sm:$0xff] %vm36_vm0, %v3883_v23  ;;  %68 = vst.msk [vmem:[#allocation2 + $0xf0] sm:$0xff] %vm36_vm0, %v3883_v23  ;;  %v449_v4 = vld [vmem:[#allocation2] sm:$0xff] }
  0x12   :  { %166 = vperm.xlu1 %3849, %v129_v15   ;;  %163 = vperm.xlu0 %3848, %v128_v16   ;;  %70 = vst.msk [vmem:[#allocation2 + $0x100] sm:$0xff] %vm36_vm0, %v3883_v23  ;;  %72 = vst.msk [vmem:[#allocation2 + $0x110] sm:$0xff] %vm36_vm0, %v3883_v23 }
  0x13   :  { %74 = vst.msk [vmem:[#allocation2 + $0x120] sm:$0xff] %vm36_vm0, %v3883_v23  ;;  %76 = vst.msk [vmem:[#allocation2 + $0x130] sm:$0xff] %vm36_vm0, %v3883_v23 }
  0x14   :  { %57 = vst.msk [vmem:[#allocation2 + $0x98] sm:$0x3] %vm38_vm1, %v3883_v23  ;;  %39 = vst.msk [vmem:[#allocation2 + $0x8] sm:$0x3] %vm38_vm1, %v3883_v23 }
  0x15   :  { %41 = vst.msk [vmem:[#allocation2 + $0x18] sm:$0x3] %vm38_vm1, %v3883_v23  ;;  %43 = vst.msk [vmem:[#allocation2 + $0x28] sm:$0x3] %vm38_vm1, %v3883_v23 }
  0x16   :  { %172 = vperm.xlu1 %3849, %v131_v17   ;;  %169 = vperm.xlu0 %3848, %v130_v18   ;;  %45 = vst.msk [vmem:[#allocation2 + $0x38] sm:$0x3] %vm38_vm1, %v3883_v23  ;;  %47 = vst.msk [vmem:[#allocation2 + $0x48] sm:$0x3] %vm38_vm1, %v3883_v23  ;;  %v457_v6 = vld [vmem:[#allocation2 + $0xa0] sm:$0xff] }
  0x17   :  { %49 = vst.msk [vmem:[#allocation2 + $0x58] sm:$0x3] %vm38_vm1, %v3883_v23  ;;  %51 = vst.msk [vmem:[#allocation2 + $0x68] sm:$0x3] %vm38_vm1, %v3883_v23 }
  0x18   :  { %53 = vst.msk [vmem:[#allocation2 + $0x78] sm:$0x3] %vm38_vm1, %v3883_v23  ;;  %55 = vst.msk [vmem:[#allocation2 + $0x88] sm:$0x3] %vm38_vm1, %v3883_v23 }
  0x19   :  { %59 = vst.msk [vmem:[#allocation2 + $0xa8] sm:$0x3] %vm38_vm1, %v3883_v23  ;;  %61 = vst.msk [vmem:[#allocation2 + $0xb8] sm:$0x3] %vm38_vm1, %v3883_v23 }
  0x1a   :  { %178 = vperm.xlu1 %3849, %v133_v19   ;;  %175 = vperm.xlu0 %3848, %v132_v20   ;;  %63 = vst.msk [vmem:[#allocation2 + $0xc8] sm:$0x3] %vm38_vm1, %v3883_v23  ;;  %65 = vst.msk [vmem:[#allocation2 + $0xd8] sm:$0x3] %vm38_vm1, %v3883_v23  ;;  %v982_v63 = vld [vmem:[#allocation2 + $0x130] sm:$0xff] }
  0x1b   :  { %67 = vst.msk [vmem:[#allocation2 + $0xe8] sm:$0x3] %vm38_vm1, %v3883_v23  ;;  %69 = vst.msk [vmem:[#allocation2 + $0xf8] sm:$0x3] %vm38_vm1, %v3883_v23  ;;  %v481_v25 = vld [vmem:[#allocation2 + $0x1] sm:$0xff]  ;;  %v1071_v26 = vld [vmem:[#allocation2 + $0x91] sm:$0xff] }
  0x1c   :  { %71 = vst.msk [vmem:[#allocation2 + $0x108] sm:$0x3] %vm38_vm1, %v3883_v23  ;;  %73 = vst.msk [vmem:[#allocation2 + $0x118] sm:$0x3] %vm38_vm1, %v3883_v23  ;;  %v578_v27 = vld [vmem:[#allocation2 + $0x2] sm:$0xff]  ;;  %v1168_v28 = vld [vmem:[#allocation2 + $0x92] sm:$0xff] }
  0x1d   :  { %75 = vst.msk [vmem:[#allocation2 + $0x128] sm:$0x3] %vm38_vm1, %v3883_v23  ;;  %77 = vst.msk [vmem:[#allocation2 + $0x138] sm:$0x3] %vm38_vm1, %v3883_v23 }
  0x1e   :  { %184 = vperm.xlu1 %3849, %v135_v21   ;;  %181 = vperm.xlu0 %3848, %v134_v22   ;;  %465 = vst.msk [vmem:[#allocation3] sm:$0xff] %vm36_vm0, %v449_v4  ;;  %473 = vst.msk [vmem:[#allocation3 + $0x40] sm:$0xff] %vm36_vm0, %v457_v6 }
  0x20   :  { %v489_v0 = vld [vmem:[#allocation2 + $0xa1] sm:$0xff] }
  0x21   :  { %v586_v2 = vld [vmem:[#allocation2 + $0xa2] sm:$0xff] }
  0x22   :  { %1013 = vrot.lane.b32.xlu1 %v974_v24, %s3884_s0  ;;  %513 = vrot.lane.b32.xlu0 %v481_v25, %s3885_s12 }
  0x24   :  { %v1079_v1 = vld [vmem:[#allocation2 + $0x131] sm:$0xff] }
  0x26   :  { %1110 = vrot.lane.b32.xlu1 %v1071_v26, %s3886_s13  ;;  %610 = vrot.lane.b32.xlu0 %v578_v27, %s3887_s14 }
  0x2a   :  { %1207 = vrot.lane.b32.xlu1 %v1168_v28, %s3888_s15  ;;  %529 = vrot.lane.b32.xlu0 %v489_v0, %s3885_s12 }
  0x2e   :  { %1029 = vrot.lane.b32.xlu1 %v982_v63, %s3884_s0  ;;  %626 = vrot.lane.b32.xlu0 %v586_v2, %s3887_s14  ;;  %v1282_v63 = vld [vmem:[%s5860_s2 + $0x40] sm:$0xff] }
  0x32   :  { %1126 = vrot.lane.b32.xlu1 %v1079_v1, %s3886_s13 }
  0x81   :  { %v146_v31 = vpop.permute.xlu1 %145  ;;  %v140_v32 = vpop.permute.xlu0 %139 }
  0x82   :  { %vm186_vm3 = vcmp.eq.s32.totalorder %v140_v32, %v4099_v30  ;;  %vm188_vm4 = vcmp.eq.s32.totalorder %v146_v31, %v4099_v30 }
  0x83   :  { %v3463_v33 = vsel %vm186_vm3, 1.0, %v3883_v23  ;;  %v3465_v36 = vsel %vm188_vm4, 1.0, %v3883_v23 }
  0x84   :  { %3619 = vmatprep.mubr.msk.f32.mxu1 %vm238_vm2, %v3463_v33 }
  0x85   :  { %v149_v34 = vpop.permute.xlu1 %148  ;;  %v143_v35 = vpop.permute.xlu0 %142 }
  0x86   :  { %vm189_vm5 = vcmp.eq.s32.totalorder %v149_v34, %v4099_v30  ;;  %vm187_vm6 = vcmp.eq.s32.totalorder %v143_v35, %v4099_v30 }
  0x87   :  { %v3464_v37 = vsel %vm187_vm6, 1.0, %v3883_v23  ;;  %v3466_v38 = vsel %vm189_vm5, 1.0, %v3883_v23  ;;  %vm561_vm5 = vcmask 130112   ;;  %vm852_vm6 = vcmask 326912  }
  0x88   :  { %3620 = vmatmul.mubr.msk.f32.vlgmr.msra.gmra.mrb[0].mxu1 %vm238_vm2, %v3464_v37 }
  0x89   :  { %v155_v39 = vpop.permute.xlu1 %154  ;;  %v152_v40 = vpop.permute.xlu0 %151  ;;  %3622 = vmatprep.mubr.msk.f32.mxu1 %vm238_vm2, %v3465_v36 }
  0x8a   :  { %vm191_vm7 = vcmp.eq.s32.totalorder %v155_v39, %v4099_v30  ;;  %vm190_vm8 = vcmp.eq.s32.totalorder %v152_v40, %v4099_v30 }
  0x8b   :  { %v3467_v41 = vsel %vm190_vm8, 1.0, %v3883_v23  ;;  %v3468_v42 = vsel %vm191_vm7, 1.0, %v3883_v23  ;;  %vm949_vm7 = vcmask 392512   ;;  %vm1047_vm8 = vcmask 458112  }
  0x8c   :  { %3623 = vmatmul.mubr.msk.f32.gmra.mrb[2].mxu1 %vm238_vm2, %v3466_v38 }
  0x8d   :  { %v161_v43 = vpop.permute.xlu1 %160  ;;  %v158_v44 = vpop.permute.xlu0 %157  ;;  %3625 = vmatprep.mubr.msk.f32.mxu1 %vm238_vm2, %v3467_v41 }
  0x8e   :  { %vm193_vm9 = vcmp.eq.s32.totalorder %v161_v43, %v4099_v30  ;;  %vm192_vm10 = vcmp.eq.s32.totalorder %v158_v44, %v4099_v30 }
  0x8f   :  { %v3469_v45 = vsel %vm192_vm10, 1.0, %v3883_v23  ;;  %v3470_v46 = vsel %vm193_vm9, 1.0, %v3883_v23  ;;  %vm1144_vm9 = vcmask 523712   ;;  %vm1241_vm10 = vcmask 589312  }
  0x90   :  { %3626 = vmatmul.mubr.msk.f32.gmra.mrb[4].mxu1 %vm238_vm2, %v3468_v42 }
  0x91   :  { %v167_v47 = vpop.permute.xlu1 %166  ;;  %v164_v48 = vpop.permute.xlu0 %163  ;;  %3628 = vmatprep.mubr.msk.f32.mxu1 %vm238_vm2, %v3469_v45 }
  0x92   :  { %vm194_vm11 = vcmp.eq.s32.totalorder %v164_v48, %v4099_v30  ;;  %vm195_vm12 = vcmp.eq.s32.totalorder %v167_v47, %v4099_v30 }
  0x93   :  { %v3471_v49 = vsel %vm194_vm11, 1.0, %v3883_v23  ;;  %v3472_v52 = vsel %vm195_vm12, 1.0, %v3883_v23  ;;  %vm1290_vm11 = vcmask 588800   ;;  %vm78_vm12 = vcmask 130048  }
  0x94   :  { %3629 = vmatmul.mubr.msk.f32.gmra.mrb[6].mxu1 %vm238_vm2, %v3470_v46  ;;  %79 = vst.msk [vmem:[#allocation4] sm:$0xff] %vm78_vm12, %v3883_v23  ;;  %82 = vst.msk [vmem:[#allocation4 + $0x10] sm:$0xff] %vm78_vm12, %v3883_v23 }
  0x95   :  { %v173_v50 = vpop.permute.xlu1 %172  ;;  %v170_v51 = vpop.permute.xlu0 %169  ;;  %3631 = vmatprep.mubr.msk.f32.mxu1 %vm238_vm2, %v3471_v49  ;;  %v1274_v49 = vld [vmem:[%s5860_s2] sm:$0xff]  ;;  %84 = vst.msk [vmem:[#allocation4 + $0x20] sm:$0xff] %vm78_vm12, %v3883_v23  ;;  %86 = vst.msk [vmem:[#allocation4 + $0x30] sm:$0xff] %vm78_vm12, %v3883_v23 }
  0x96   :  { %vm196_vm13 = vcmp.eq.s32.totalorder %v170_v51, %v4099_v30  ;;  %vm197_vm14 = vcmp.eq.s32.totalorder %v173_v50, %v4099_v30  ;;  %v1275_v50 = vld [vmem:[%s5860_s2 + $0x8] sm:$0xff]  ;;  %88 = vst.msk [vmem:[#allocation4 + $0x40] sm:$0xff] %vm78_vm12, %v3883_v23  ;;  %90 = vst.msk [vmem:[#allocation4 + $0x50] sm:$0xff] %vm78_vm12, %v3883_v23 }
  0x97   :  { %v3473_v53 = vsel %vm196_vm13, 1.0, %v3883_v23  ;;  %v3474_v56 = vsel %vm197_vm14, 1.0, %v3883_v23  ;;  %v3693_v51 = vpack.c.bf16 %v1275_v50, %v1274_v49  ;;  %92 = vst.msk [vmem:[#allocation4 + $0x60] sm:$0xff] %vm78_vm12, %v3883_v23  ;;  %94 = vst.msk [vmem:[#allocation4 + $0x70] sm:$0xff] %vm78_vm12, %v3883_v23  ;;  %vm80_vm13 = vcmask 123904  }
  0x98   :  { %3632 = vmatmul.mubr.msk.f32.gmra.mrb[8].mxu1 %vm238_vm2, %v3472_v52  ;;  %v1276_v52 = vld [vmem:[%s5860_s2 + $0x10] sm:$0xff]  ;;  %96 = vst.msk [vmem:[#allocation4 + $0x80] sm:$0xff] %vm78_vm12, %v3883_v23  ;;  %98 = vst.msk [vmem:[#allocation4 + $0x90] sm:$0xff] %vm78_vm12, %v3883_v23  ;;  %vm1770_vm14 = vcmask 261248  }
  0x99   :  { %v179_v54 = vpop.permute.xlu1 %178  ;;  %v176_v55 = vpop.permute.xlu0 %175  ;;  %3634 = vmatprep.mubr.msk.f32.mxu1 %vm238_vm2, %v3473_v53  ;;  %3694 = vmatprep.subr.bf16.mxu1 %v3693_v51  ;;  %v1277_v53 = vld [vmem:[%s5860_s2 + $0x18] sm:$0xff]  ;;  %100 = vst.msk [vmem:[#allocation4 + $0xa0] sm:$0xff] %vm78_vm12, %v3883_v23  ;;  %102 = vst.msk [vmem:[#allocation4 + $0xb0] sm:$0xff] %vm78_vm12, %v3883_v23 }
  0x9a   :  { %vm198_vm15 = vcmp.eq.s32.totalorder %v176_v55, %v4099_v30  ;;  %vm199_vm1 = vcmp.eq.s32.totalorder %v179_v54, %v4099_v30  ;;  %3696 = vmatpush3.bf16.msra.mxu1 %v3693_v51  ;;  %v3697_v54 = vpack.c.bf16 %v1277_v53, %v1276_v52  ;;  %v1278_v55 = vld [vmem:[%s5860_s2 + $0x20] sm:$0xff]  ;;  %104 = vst.msk [vmem:[#allocation4 + $0xc0] sm:$0xff] %vm78_vm12, %v3883_v23  ;;  %106 = vst.msk [vmem:[#allocation4 + $0xd0] sm:$0xff] %vm78_vm12, %v3883_v23 }
  0x9b   :  { %v3475_v57 = vsel %vm198_vm15, 1.0, %v3883_v23  ;;  %v3476_v60 = vsel %vm199_vm1, 1.0, %v3883_v23  ;;  %108 = vst.msk [vmem:[#allocation4 + $0xe0] sm:$0xff] %vm78_vm12, %v3883_v23  ;;  %110 = vst.msk [vmem:[#allocation4 + $0xf0] sm:$0xff] %vm78_vm12, %v3883_v23  ;;  %vm1867_vm15 = vcmask 392448   ;;  %vm1964_vm1 = vcmask 523648  }
  0x9c   :  { %3635 = vmatmul.mubr.msk.f32.gmra.mrb[10].mxu1 %vm238_vm2, %v3474_v56  ;;  %3698 = vmatprep.subr.bf16.mxu1 %v3697_v54  ;;  %v1279_v56 = vld [vmem:[%s5860_s2 + $0x28] sm:$0xff]  ;;  %112 = vst.msk [vmem:[#allocation4 + $0x100] sm:$0xff] %vm78_vm12, %v3883_v23  ;;  %114 = vst.msk [vmem:[#allocation4 + $0x110] sm:$0xff] %vm78_vm12, %v3883_v23 }
  0x9d   :  { %v185_v58 = vpop.permute.xlu1 %184  ;;  %v182_v59 = vpop.permute.xlu0 %181  ;;  %3637 = vmatprep.mubr.msk.f32.mxu1 %vm238_vm2, %v3475_v57  ;;  %v3701_v57 = vpack.c.bf16 %v1279_v56, %v1278_v55  ;;  %116 = vst.msk [vmem:[#allocation4 + $0x120] sm:$0xff] %vm78_vm12, %v3883_v23  ;;  %118 = vst.msk [vmem:[#allocation4 + $0x130] sm:$0xff] %vm78_vm12, %v3883_v23 }
  0x9e   :  { %vm200_vm3 = vcmp.eq.s32.totalorder %v182_v59, %v4099_v30  ;;  %vm201_vm4 = vcmp.eq.s32.totalorder %v185_v58, %v4099_v30  ;;  %3700 = vmatpush3.bf16.msra.mxu1 %v3697_v54  ;;  %v1280_v58 = vld [vmem:[%s5860_s2 + $0x30] sm:$0xff]  ;;  %v1281_v59 = vld [vmem:[%s5860_s2 + $0x38] sm:$0xff]  ;;  %83 = vst.msk [vmem:[#allocation4 + $0x18] sm:$0x3] %vm80_vm13, %v3883_v23  ;;  %85 = vst.msk [vmem:[#allocation4 + $0x28] sm:$0x3] %vm80_vm13, %v3883_v23 }
  0x9f   :  { %v3477_v61 = vsel %vm200_vm3, 1.0, %v3883_v23  ;;  %v3478_v62 = vsel %vm201_vm4, 1.0, %v3883_v23  ;;  %3702 = vmatprep.subr.bf16.mxu1 %v3701_v57  ;;  %87 = vst.msk [vmem:[#allocation4 + $0x38] sm:$0x3] %vm80_vm13, %v3883_v23  ;;  %89 = vst.msk [vmem:[#allocation4 + $0x48] sm:$0x3] %vm80_vm13, %v3883_v23 }
  0xa0   :  { %3638 = vmatmul.mubr.msk.f32.gmra.mrb[12].mxu1 %vm238_vm2, %v3476_v60  ;;  %91 = vst.msk [vmem:[#allocation4 + $0x58] sm:$0x3] %vm80_vm13, %v3883_v23  ;;  %93 = vst.msk [vmem:[#allocation4 + $0x68] sm:$0x3] %vm80_vm13, %v3883_v23  ;;  %vm2061_vm3 = vcmask 654848   ;;  %vm2158_vm4 = vcmask 786048  }
  0xa1   :  { %3640 = vmatprep.mubr.msk.f32.mxu1 %vm238_vm2, %v3477_v61  ;;  %v514_v3 = vpop.permute.xlu0 %513  ;;  %v3705_v61 = vpack.c.bf16 %v1281_v59, %v1280_v58  ;;  %v4303_v4 = vpop.permute.xlu1 %1013  ;;  %95 = vst.msk [vmem:[#allocation4 + $0x78] sm:$0x3] %vm80_vm13, %v3883_v23  ;;  %97 = vst.msk [vmem:[#allocation4 + $0x88] sm:$0x3] %vm80_vm13, %v3883_v23 }
  0xa2   :  { %562 = vst.msk [vmem:[#allocation3] sm:$0xff] %vm561_vm5, %v514_v3  ;;  %3704 = vmatpush3.bf16.msra.mxu1 %v3701_v57 }
  0xa3   :  { %3706 = vmatprep.subr.bf16.mxu1 %v3705_v61  ;;  %81 = vst.msk [vmem:[#allocation4 + $0x8] sm:$0x3] %vm80_vm13, %v3883_v23  ;;  %99 = vst.msk [vmem:[#allocation4 + $0x98] sm:$0x3] %vm80_vm13, %v3883_v23 }
  0xa4   :  { %3641 = vmatmul.mubr.msk.f32.gmra.mrb[14].mxu1 %vm238_vm2, %v3478_v62  ;;  %vm658_vm2 = vcmask 195712   ;;  %101 = vst.msk [vmem:[#allocation4 + $0xa8] sm:$0x3] %vm80_vm13, %v3883_v23  ;;  %103 = vst.msk [vmem:[#allocation4 + $0xb8] sm:$0x3] %vm80_vm13, %v3883_v23 }
  0xa5   :  { %v611_v5 = vpop.permute.xlu0 %610  ;;  %105 = vst.msk [vmem:[#allocation4 + $0xc8] sm:$0x3] %vm80_vm13, %v3883_v23  ;;  %107 = vst.msk [vmem:[#allocation4 + $0xd8] sm:$0x3] %vm80_vm13, %v3883_v23 }
  0xa6   :  { %659 = vst.msk [vmem:[#allocation3] sm:$0xff] %vm658_vm2, %v611_v5  ;;  %3708 = vmatpush3.bf16.msra.mxu1 %v3705_v61  ;;  %v4308_v5 = vpop.permute.xlu1 %1110 }
  0xa7   :  { %3659 = vmatprep.subr.mxu1 %v1282_v63  ;;  %109 = vst.msk [vmem:[#allocation4 + $0xe8] sm:$0x3] %vm80_vm13, %v3883_v23  ;;  %111 = vst.msk [vmem:[#allocation4 + $0xf8] sm:$0x3] %vm80_vm13, %v3883_v23 }
  0xa8   :  { %113 = vst.msk [vmem:[#allocation4 + $0x108] sm:$0x3] %vm80_vm13, %v3883_v23  ;;  %115 = vst.msk [vmem:[#allocation4 + $0x118] sm:$0x3] %vm80_vm13, %v3883_v23 }
  0xa9   :  { %v530_v7 = vpop.permute.xlu0 %529  ;;  %117 = vst.msk [vmem:[#allocation4 + $0x128] sm:$0x3] %vm80_vm13, %v3883_v23  ;;  %119 = vst.msk [vmem:[#allocation4 + $0x138] sm:$0x3] %vm80_vm13, %v3883_v23 }
  0xaa   :  { %570 = vst.msk [vmem:[#allocation3 + $0x40] sm:$0xff] %vm561_vm5, %v530_v7  ;;  %3660 = vmatpush3.msra.mxu1 %v1282_v63  ;;  %v4314_v7 = vpop.permute.xlu1 %1207 }
  0xad   :  { %v627_v8 = vpop.permute.xlu0 %626 }
  0xae   :  { %667 = vst.msk [vmem:[#allocation3 + $0x40] sm:$0xff] %vm658_vm2, %v627_v8 }
 0x15b   :  { %v3621_v9 = vpop.f32.mrb[0].mxu1 }
 0x15c   :  { %434 = vst.msk [vmem:[#allocation2 + $0x21] sm:$0xff] %vm36_vm0, %v3621_v9  ;;  %v353_v10 = vpop.f32.mrb[1].mxu1  ;;  %v4318_v9 = vpop.permute.xlu1 %1029 }
 0x15d   :  { %433 = vst.msk [vmem:[#allocation2 + $0x11] sm:$0xff] %vm36_vm0, %v353_v10 }
 0x15f   :  { %v3624_v11 = vpop.f32.mrb[2].mxu1 }
 0x160   :  { %436 = vst.msk [vmem:[#allocation2 + $0x41] sm:$0xff] %vm36_vm0, %v3624_v11  ;;  %v363_v12 = vpop.f32.mrb[3].mxu1  ;;  %v4326_v11 = vpop.permute.xlu1 %1126 }
 0x161   :  { %435 = vst.msk [vmem:[#allocation2 + $0x31] sm:$0xff] %vm36_vm0, %v363_v12 }
 0x163   :  { %v676_v13 = vld [vmem:[#allocation2 + $0x20] sm:$0xff]  ;;  %v3627_v15 = vpop.f32.mrb[4].mxu1 }
 0x164   :  { %v773_v14 = vld [vmem:[#allocation2 + $0x21] sm:$0xff]  ;;  %709 = vrot.lane.b32.xlu1 %v676_v13, %s3889_s1  ;;  %438 = vst.msk [vmem:[#allocation2 + $0x61] sm:$0xff] %vm36_vm0, %v3627_v15  ;;  %v373_v16 = vpop.f32.mrb[5].mxu1  ;;  %v675_v17 = vld [vmem:[#allocation2 + $0x10] sm:$0xff]  ;;  %467 = vst.msk [vmem:[#allocation3 + $0x10] sm:$0xff] %vm36_vm0, %v676_v13 }
 0x165   :  { %806 = vrot.lane.b32.xlu0 %v773_v14, %s3890_s16  ;;  %437 = vst.msk [vmem:[#allocation2 + $0x51] sm:$0xff] %vm36_vm0, %v373_v16  ;;  %466 = vst.msk [vmem:[#allocation3 + $0x8] sm:$0xff] %vm36_vm0, %v675_v17  ;;  %v870_v19 = vld [vmem:[#allocation2 + $0x22] sm:$0xff]  ;;  %v772_v30 = vld [vmem:[#allocation2 + $0x11] sm:$0xff] }
 0x166   :  { %v579_v45 = vld [vmem:[#allocation2 + $0x12] sm:$0xff] }
 0x167   :  { %v3630_v18 = vpop.f32.mrb[6].mxu1  ;;  %v4169_v20 = vld [vmem:[#allocation2 + $0x40] sm:$0xff] }
 0x168   :  { %440 = vst.msk [vmem:[#allocation2 + $0x81] sm:$0xff] %vm36_vm0, %v3630_v18  ;;  %v383_v21 = vpop.f32.mrb[7].mxu1  ;;  %517 = vrot.lane.b32.xlu1 %v773_v14, %s3885_s12  ;;  %v4174_v22 = vld [vmem:[#allocation2 + $0x30] sm:$0xff]  ;;  %469 = vst.msk [vmem:[#allocation3 + $0x20] sm:$0xff] %vm36_vm0, %v4169_v20  ;;  %v485_v38 = vld [vmem:[#allocation2 + $0x41] sm:$0xff] }
 0x169   :  { %903 = vrot.lane.b32.xlu0 %v870_v19, %s3891_s17  ;;  %439 = vst.msk [vmem:[#allocation2 + $0x71] sm:$0xff] %vm36_vm0, %v383_v21  ;;  %468 = vst.msk [vmem:[#allocation3 + $0x18] sm:$0xff] %vm36_vm0, %v4174_v22  ;;  %v872_v42 = vld [vmem:[#allocation2 + $0x42] sm:$0xff]  ;;  %v484_v46 = vld [vmem:[#allocation2 + $0x31] sm:$0xff] }
 0x16a   :  { %v581_v48 = vld [vmem:[#allocation2 + $0x32] sm:$0xff] }
 0x16b   :  { %v3633_v24 = vpop.f32.mrb[8].mxu1  ;;  %v4181_v25 = vld [vmem:[#allocation2 + $0x60] sm:$0xff] }
 0x16c   :  { %442 = vst.msk [vmem:[#allocation2 + $0xc1] sm:$0xff] %vm36_vm0, %v3633_v24  ;;  %v393_v26 = vpop.f32.mrb[9].mxu1  ;;  %614 = vrot.lane.b32.xlu1 %v870_v19, %s3887_s14  ;;  %v4186_v27 = vld [vmem:[#allocation2 + $0x50] sm:$0xff]  ;;  %471 = vst.msk [vmem:[#allocation3 + $0x30] sm:$0xff] %vm36_vm0, %v4181_v25  ;;  %v487_v60 = vld [vmem:[#allocation2 + $0x61] sm:$0xff] }
 0x16d   :  { %707 = vrot.lane.b32.xlu0 %v675_v17, %s3889_s1  ;;  %441 = vst.msk [vmem:[#allocation2 + $0xb1] sm:$0xff] %vm36_vm0, %v393_v26  ;;  %470 = vst.msk [vmem:[#allocation3 + $0x28] sm:$0xff] %vm36_vm0, %v4186_v27  ;;  %v874_v62 = vld [vmem:[#allocation2 + $0x62] sm:$0xff]  ;;  %v486_v0 = vld [vmem:[#allocation2 + $0x51] sm:$0xff] }
 0x16e   :  { %v583_v1 = vld [vmem:[#allocation2 + $0x52] sm:$0xff] }
 0x16f   :  { %v3636_v28 = vpop.f32.mrb[10].mxu1  ;;  %v682_v2 = vld [vmem:[#allocation2 + $0x80] sm:$0xff] }
 0x170   :  { %444 = vst.msk [vmem:[#allocation2 + $0xe1] sm:$0xff] %vm36_vm0, %v3636_v28  ;;  %v403_v31 = vpop.f32.mrb[11].mxu1  ;;  %999 = vrot.lane.b32.xlu1 %v676_v13, %s3884_s0  ;;  %v4196_v32 = vld [vmem:[#allocation2 + $0x70] sm:$0xff]  ;;  %v779_v3 = vld [vmem:[#allocation2 + $0x81] sm:$0xff] }
 0x171   :  { %804 = vrot.lane.b32.xlu0 %v772_v30, %s3890_s16  ;;  %443 = vst.msk [vmem:[#allocation2 + $0xd1] sm:$0xff] %vm36_vm0, %v403_v31  ;;  %472 = vst.msk [vmem:[#allocation3 + $0x38] sm:$0xff] %vm36_vm0, %v4196_v32  ;;  %v1167_v6 = vld [vmem:[#allocation2 + $0x82] sm:$0xff]  ;;  %v488_v8 = vld [vmem:[#allocation2 + $0x71] sm:$0xff] }
 0x172   :  { %v585_v10 = vld [vmem:[#allocation2 + $0x72] sm:$0xff] }
 0x173   :  { %v3639_v33 = vpop.f32.mrb[12].mxu1  ;;  %v4201_v34 = vld [vmem:[#allocation2 + $0xc0] sm:$0xff] }
 0x174   :  { %446 = vst.msk [vmem:[#allocation2 + $0x101] sm:$0xff] %vm36_vm0, %v3639_v33  ;;  %v413_v35 = vpop.f32.mrb[13].mxu1  ;;  %1096 = vrot.lane.b32.xlu1 %v773_v14, %s3886_s13  ;;  %v4207_v36 = vld [vmem:[#allocation2 + $0xb0] sm:$0xff]  ;;  %475 = vst.msk [vmem:[#allocation3 + $0x50] sm:$0xff] %vm36_vm0, %v4201_v34  ;;  %v491_v16 = vld [vmem:[#allocation2 + $0xc1] sm:$0xff] }
 0x175   :  { %713 = vrot.lane.b32.xlu0 %v4169_v20, %s3889_s1  ;;  %445 = vst.msk [vmem:[#allocation2 + $0xf1] sm:$0xff] %vm36_vm0, %v413_v35  ;;  %474 = vst.msk [vmem:[#allocation3 + $0x48] sm:$0xff] %vm36_vm0, %v4207_v36 }
 0x177   :  { %v3642_v37 = vpop.f32.mrb[14].mxu1  ;;  %v4214_v39 = vld [vmem:[#allocation2 + $0xe0] sm:$0xff] }
 0x178   :  { %448 = vst.msk [vmem:[#allocation2 + $0x121] sm:$0xff] %vm36_vm0, %v3642_v37  ;;  %v423_v40 = vpop.f32.mrb[15].mxu1  ;;  %1193 = vrot.lane.b32.xlu1 %v870_v19, %s3888_s15  ;;  %v4219_v41 = vld [vmem:[#allocation2 + $0xd0] sm:$0xff]  ;;  %477 = vst.msk [vmem:[#allocation3 + $0x60] sm:$0xff] %vm36_vm0, %v4214_v39  ;;  %v588_v19 = vld [vmem:[#allocation2 + $0xc2] sm:$0xff] }
 0x179   :  { %521 = vrot.lane.b32.xlu0 %v485_v38, %s3885_s12  ;;  %447 = vst.msk [vmem:[#allocation2 + $0x111] sm:$0xff] %vm36_vm0, %v423_v40  ;;  %476 = vst.msk [vmem:[#allocation3 + $0x58] sm:$0xff] %vm36_vm0, %v4219_v41  ;;  %v493_v31 = vld [vmem:[#allocation2 + $0xe1] sm:$0xff] }
 0x17a   :  { %v880_v35 = vld [vmem:[#allocation2 + $0xe2] sm:$0xff] }
 0x17b   :  { %v4226_v43 = vld [vmem:[#allocation2 + $0x100] sm:$0xff] }
 0x17c   :  { %515 = vrot.lane.b32.xlu1 %v772_v30, %s3885_s12  ;;  %v4230_v44 = vld [vmem:[#allocation2 + $0xf0] sm:$0xff]  ;;  %479 = vst.msk [vmem:[#allocation3 + $0x70] sm:$0xff] %vm36_vm0, %v4226_v43 }
 0x17d   :  { %907 = vrot.lane.b32.xlu0 %v872_v42, %s3891_s17  ;;  %478 = vst.msk [vmem:[#allocation3 + $0x68] sm:$0xff] %vm36_vm0, %v4230_v44 }
 0x180   :  { %612 = vrot.lane.b32.xlu1 %v579_v45, %s3887_s14  ;;  %v4238_v47 = vld [vmem:[#allocation2 + $0x110] sm:$0xff] }
 0x181   :  { %519 = vrot.lane.b32.xlu0 %v484_v46, %s3885_s12  ;;  %480 = vst.msk [vmem:[#allocation3 + $0x78] sm:$0xff] %vm36_vm0, %v4238_v47  ;;  %vm755_vm0 = vcmask 261312  }
 0x184   :  { %901 = vrot.lane.b32.xlu1 %v579_v45, %s3891_s17  ;;  %v589_v45 = vld [vmem:[#allocation2 + $0xd2] sm:$0xff] }
 0x185   :  { %616 = vrot.lane.b32.xlu0 %v581_v48, %s3887_s14 }
 0x188   :  { %810 = vrot.lane.b32.xlu1 %v485_v38, %s3890_s16 }
 0x189   :  { %1001 = vrot.lane.b32.xlu0 %v4174_v22, %s3884_s0 }
 0x18c   :  { %618 = vrot.lane.b32.xlu1 %v872_v42, %s3887_s14 }
 0x18d   :  { %1098 = vrot.lane.b32.xlu0 %v484_v46, %s3886_s13 }
 0x190   :  { %1003 = vrot.lane.b32.xlu1 %v4169_v20, %s3884_s0 }
 0x191   :  { %905 = vrot.lane.b32.xlu0 %v581_v48, %s3891_s17 }
 0x194   :  { %1100 = vrot.lane.b32.xlu1 %v485_v38, %s3886_s13  ;;  %v492_v38 = vld [vmem:[#allocation2 + $0xd1] sm:$0xff] }
 0x195   :  { %717 = vrot.lane.b32.xlu0 %v4181_v25, %s3889_s1 }
 0x198   :  { %1197 = vrot.lane.b32.xlu1 %v872_v42, %s3888_s15 }
 0x199   :  { %525 = vrot.lane.b32.xlu0 %v487_v60, %s3885_s12 }
 0x19c   :  { %711 = vrot.lane.b32.xlu1 %v4174_v22, %s3889_s1 }
 0x19d   :  { %911 = vrot.lane.b32.xlu0 %v874_v62, %s3891_s17 }
 0x1a0   :  { %808 = vrot.lane.b32.xlu1 %v484_v46, %s3890_s16 }
 0x1a1   :  { %523 = vrot.lane.b32.xlu0 %v486_v0, %s3885_s12 }
 0x1a4   :  { %1195 = vrot.lane.b32.xlu1 %v581_v48, %s3888_s15 }
 0x1a5   :  { %620 = vrot.lane.b32.xlu0 %v583_v1, %s3887_s14 }
 0x1a8   :  { %814 = vrot.lane.b32.xlu1 %v487_v60, %s3890_s16 }
 0x1a9   :  { %1005 = vrot.lane.b32.xlu0 %v4186_v27, %s3884_s0 }
 0x1ac   :  { %622 = vrot.lane.b32.xlu1 %v874_v62, %s3887_s14 }
 0x1ad   :  { %1102 = vrot.lane.b32.xlu0 %v486_v0, %s3886_s13 }
 0x1b0   :  { %1007 = vrot.lane.b32.xlu1 %v4181_v25, %s3884_s0  ;;  %v780_v25 = vld [vmem:[#allocation2 + $0xb1] sm:$0xff] }
 0x1b1   :  { %909 = vrot.lane.b32.xlu0 %v583_v1, %s3891_s17 }
 0x1b4   :  { %1104 = vrot.lane.b32.xlu1 %v487_v60, %s3886_s13  ;;  %v882_v60 = vld [vmem:[#allocation2 + $0x102] sm:$0xff] }
 0x1b5   :  { %721 = vrot.lane.b32.xlu0 %v682_v2, %s3889_s1 }
 0x1b8   :  { %1201 = vrot.lane.b32.xlu1 %v874_v62, %s3888_s15  ;;  %v494_v62 = vld [vmem:[#allocation2 + $0xf1] sm:$0xff] }
 0x1b9   :  { %818 = vrot.lane.b32.xlu0 %v779_v3, %s3890_s16 }
 0x1bc   :  { %715 = vrot.lane.b32.xlu1 %v4186_v27, %s3889_s1 }
 0x1bd   :  { %1011 = vrot.lane.b32.xlu0 %v682_v2, %s3884_s0 }
 0x1c0   :  { %812 = vrot.lane.b32.xlu1 %v486_v0, %s3890_s16 }
 0x1c1   :  { %1108 = vrot.lane.b32.xlu0 %v779_v3, %s3886_s13 }
 0x1c4   :  { %1199 = vrot.lane.b32.xlu1 %v583_v1, %s3888_s15  ;;  %v591_v1 = vld [vmem:[#allocation2 + $0xf2] sm:$0xff] }
 0x1c5   :  { %1205 = vrot.lane.b32.xlu0 %v1167_v6, %s3888_s15 }
 0x1c8   :  { %915 = vrot.lane.b32.xlu1 %v1167_v6, %s3891_s17 }
 0x1c9   :  { %527 = vrot.lane.b32.xlu0 %v488_v8, %s3885_s12 }
 0x1cc   :  { %719 = vrot.lane.b32.xlu1 %v4196_v32, %s3889_s1 }
 0x1cd   :  { %624 = vrot.lane.b32.xlu0 %v585_v10, %s3887_s14 }
 0x1d0   :  { %816 = vrot.lane.b32.xlu1 %v488_v8, %s3890_s16 }
 0x1d1   :  { %1009 = vrot.lane.b32.xlu0 %v4196_v32, %s3884_s0 }
 0x1d4   :  { %913 = vrot.lane.b32.xlu1 %v585_v10, %s3891_s17 }
 0x1d5   :  { %1106 = vrot.lane.b32.xlu0 %v488_v8, %s3886_s13 }
 0x1d6   :  { %v710_v12 = vpop.permute.xlu1 %709 }
 0x1d7   :  { %v807_v13 = vpop.permute.xlu0 %806 }
 0x1d8   :  { %725 = vrot.lane.b32.xlu1 %v4201_v34, %s3889_s1 }
 0x1d9   :  { %1203 = vrot.lane.b32.xlu0 %v585_v10, %s3888_s15 }
 0x1da   :  { %v518_v14 = vpop.permute.xlu1 %517 }
 0x1db   :  { %v904_v15 = vpop.permute.xlu0 %903  ;;  %564 = vst.msk [vmem:[#allocation3 + $0x10] sm:$0xff] %vm561_vm5, %v518_v14 }
 0x1dc   :  { %533 = vrot.lane.b32.xlu1 %v491_v16, %s3885_s12 }
 0x1dd   :  { %822 = vrot.lane.b32.xlu0 %v491_v16, %s3890_s16 }
 0x1de   :  { %v615_v17 = vpop.permute.xlu1 %614 }
 0x1df   :  { %v708_v18 = vpop.permute.xlu0 %707  ;;  %661 = vst.msk [vmem:[#allocation3 + $0x10] sm:$0xff] %vm658_vm2, %v615_v17  ;;  %v690_v17 = vld [vmem:[#allocation2 + $0x120] sm:$0xff] }
 0x1e0   :  { %756 = vst.msk [vmem:[#allocation3] sm:$0xff] %vm755_vm0, %v708_v18  ;;  %630 = vrot.lane.b32.xlu1 %v588_v19, %s3887_s14 }
 0x1e1   :  { %919 = vrot.lane.b32.xlu0 %v588_v19, %s3891_s17 }
 0x1e2   :  { %v1000_v20 = vpop.permute.xlu1 %999 }
 0x1e3   :  { %v805_v21 = vpop.permute.xlu0 %804 }
 0x1e4   :  { %853 = vst.msk [vmem:[#allocation3] sm:$0xff] %vm852_vm6, %v805_v21  ;;  %1015 = vrot.lane.b32.xlu1 %v4201_v34, %s3884_s0  ;;  %v587_v34 = vld [vmem:[#allocation2 + $0xb2] sm:$0xff] }
 0x1e5   :  { %723 = vrot.lane.b32.xlu0 %v4207_v36, %s3889_s1 }
 0x1e6   :  { %v1097_v22 = vpop.permute.xlu1 %1096 }
 0x1e7   :  { %v714_v24 = vpop.permute.xlu0 %713 }
 0x1e8   :  { %1112 = vrot.lane.b32.xlu1 %v491_v16, %s3886_s13 }
 0x1e9   :  { %820 = vrot.lane.b32.xlu0 %v780_v25, %s3890_s16 }
 0x1ea   :  { %v1194_v26 = vpop.permute.xlu1 %1193 }
 0x1eb   :  { %v522_v27 = vpop.permute.xlu0 %521 }
 0x1ec   :  { %566 = vst.msk [vmem:[#allocation3 + $0x20] sm:$0xff] %vm561_vm5, %v522_v27  ;;  %1209 = vrot.lane.b32.xlu1 %v588_v19, %s3888_s15  ;;  %v496_v27 = vld [vmem:[#allocation2 + $0x111] sm:$0xff] }
 0x1ed   :  { %729 = vrot.lane.b32.xlu0 %v4214_v39, %s3889_s1 }
 0x1ee   :  { %v516_v28 = vpop.permute.xlu1 %515 }
 0x1ef   :  { %v908_v30 = vpop.permute.xlu0 %907  ;;  %563 = vst.msk [vmem:[#allocation3 + $0x8] sm:$0xff] %vm561_vm5, %v516_v28 }
 0x1f0   :  { %531 = vrot.lane.b32.xlu1 %v780_v25, %s3885_s12 }
 0x1f1   :  { %537 = vrot.lane.b32.xlu0 %v493_v31, %s3885_s12 }
 0x1f2   :  { %v613_v32 = vpop.permute.xlu1 %612 }
 0x1f3   :  { %v520_v33 = vpop.permute.xlu0 %519  ;;  %660 = vst.msk [vmem:[#allocation3 + $0x8] sm:$0xff] %vm658_vm2, %v613_v32 }
 0x1f4   :  { %565 = vst.msk [vmem:[#allocation3 + $0x18] sm:$0xff] %vm561_vm5, %v520_v33  ;;  %628 = vrot.lane.b32.xlu1 %v587_v34, %s3887_s14  ;;  %v593_v33 = vld [vmem:[#allocation2 + $0x112] sm:$0xff] }
 0x1f5   :  { %757 = vst.msk [vmem:[#allocation3 + $0x8] sm:$0xff] %vm755_vm0, %v710_v12  ;;  %923 = vrot.lane.b32.xlu0 %v880_v35, %s3891_s17 }
 0x1f6   :  { %854 = vst.msk [vmem:[#allocation3 + $0x8] sm:$0xff] %vm852_vm6, %v807_v13  ;;  %v902_v36 = vpop.permute.xlu1 %901 }
 0x1f7   :  { %951 = vst.msk [vmem:[#allocation3 + $0x8] sm:$0xff] %vm949_vm7, %v904_v15  ;;  %v617_v37 = vpop.permute.xlu0 %616  ;;  %950 = vst.msk [vmem:[#allocation3] sm:$0xff] %vm949_vm7, %v902_v36 }
 0x1f8   :  { %662 = vst.msk [vmem:[#allocation3 + $0x18] sm:$0xff] %vm658_vm2, %v617_v37  ;;  %917 = vrot.lane.b32.xlu1 %v587_v34, %s3891_s17 }
 0x1f9   :  { %1048 = vst.msk [vmem:[#allocation3] sm:$0xff] %vm1047_vm8, %v1000_v20  ;;  %535 = vrot.lane.b32.xlu0 %v492_v38, %s3885_s12 }
 0x1fa   :  { %759 = vst.msk [vmem:[#allocation3 + $0x18] sm:$0xff] %vm755_vm0, %v714_v24  ;;  %v811_v40 = vpop.permute.xlu1 %810 }
 0x1fb   :  { %1145 = vst.msk [vmem:[#allocation3] sm:$0xff] %vm1144_vm9, %v1097_v22  ;;  %v1002_v42 = vpop.permute.xlu0 %1001 }
 0x1fc   :  { %1242 = vst.msk [vmem:[#allocation3] sm:$0xff] %vm1241_vm10, %v1194_v26  ;;  %826 = vrot.lane.b32.xlu1 %v493_v31, %s3890_s16  ;;  %v4440_v26 = vld [vmem:[#allocation2 + $0x122] sm:$0xff] }
 0x1fd   :  { %856 = vst.msk [vmem:[#allocation3 + $0x18] sm:$0xff] %vm852_vm6, %v811_v40  ;;  %632 = vrot.lane.b32.xlu0 %v589_v45, %s3887_s14 }
 0x1fe   :  { %1049 = vst.msk [vmem:[#allocation3 + $0x8] sm:$0xff] %vm1047_vm8, %v1002_v42  ;;  %v619_v46 = vpop.permute.xlu1 %618 }
 0x1ff   :  { %953 = vst.msk [vmem:[#allocation3 + $0x18] sm:$0xff] %vm949_vm7, %v908_v30  ;;  %v1099_v48 = vpop.permute.xlu0 %1098 }
 0x200   :  { %663 = vst.msk [vmem:[#allocation3 + $0x20] sm:$0xff] %vm658_vm2, %v619_v46  ;;  %634 = vrot.lane.b32.xlu1 %v880_v35, %s3887_s14 }
 0x201   :  { %1146 = vst.msk [vmem:[#allocation3 + $0x8] sm:$0xff] %vm1144_vm9, %v1099_v48  ;;  %1017 = vrot.lane.b32.xlu0 %v4219_v41, %s3884_s0 }
 0x202   :  { %v1004_v50 = vpop.permute.xlu1 %1003 }
 0x203   :  { %v1258_v49 = vld [vmem:[#allocation3] sm:$0xff]  ;;  %v906_v51 = vpop.permute.xlu0 %905 }
 0x204   :  { %3661 = vmatprep.mubr.msk.f32.mxu1 %vm1290_vm11, %v1258_v49  ;;  %1019 = vrot.lane.b32.xlu1 %v4214_v39, %s3884_s0  ;;  %v495_v39 = vld [vmem:[#allocation2 + $0x101] sm:$0xff] }
 0x205   :  { %1114 = vrot.lane.b32.xlu0 %v492_v38, %s3886_s13 }
 0x206   :  { %v1101_v52 = vpop.permute.xlu1 %1100 }
 0x207   :  { %v718_v53 = vpop.permute.xlu0 %717 }
 0x208   :  { %1116 = vrot.lane.b32.xlu1 %v493_v31, %s3886_s13 }
 0x209   :  { %921 = vrot.lane.b32.xlu0 %v589_v45, %s3891_s17 }
 0x20a   :  { %v1198_v54 = vpop.permute.xlu1 %1197 }
 0x20b   :  { %v526_v55 = vpop.permute.xlu0 %525 }
 0x20c   :  { %568 = vst.msk [vmem:[#allocation3 + $0x30] sm:$0xff] %vm561_vm5, %v526_v55  ;;  %1213 = vrot.lane.b32.xlu1 %v880_v35, %s3888_s15 }
 0x20d   :  { %733 = vrot.lane.b32.xlu0 %v4226_v43, %s3889_s1 }
 0x20e   :  { %v712_v56 = vpop.permute.xlu1 %711 }
 0x20f   :  { %v912_v57 = vpop.permute.xlu0 %911  ;;  %758 = vst.msk [vmem:[#allocation3 + $0x10] sm:$0xff] %vm755_vm0, %v712_v56 }
 0x210   :  { %727 = vrot.lane.b32.xlu1 %v4219_v41, %s3889_s1 }
 0x211   :  { %541 = vrot.lane.b32.xlu0 %v495_v39, %s3885_s12 }
 0x212   :  { %v809_v58 = vpop.permute.xlu1 %808 }
 0x213   :  { %v524_v59 = vpop.permute.xlu0 %523  ;;  %855 = vst.msk [vmem:[#allocation3 + $0x10] sm:$0xff] %vm852_vm6, %v809_v58 }
 0x214   :  { %567 = vst.msk [vmem:[#allocation3 + $0x28] sm:$0xff] %vm561_vm5, %v524_v59  ;;  %824 = vrot.lane.b32.xlu1 %v492_v38, %s3890_s16 }
 0x215   :  { %952 = vst.msk [vmem:[#allocation3 + $0x10] sm:$0xff] %vm949_vm7, %v906_v51  ;;  %927 = vrot.lane.b32.xlu0 %v882_v60, %s3891_s17 }
 0x216   :  { %1050 = vst.msk [vmem:[#allocation3 + $0x10] sm:$0xff] %vm1047_vm8, %v1004_v50  ;;  %v1196_v41 = vpop.permute.xlu1 %1195 }
 0x217   :  { %1147 = vst.msk [vmem:[#allocation3 + $0x10] sm:$0xff] %vm1144_vm9, %v1101_v52  ;;  %v621_v61 = vpop.permute.xlu0 %620 }
 0x218   :  { %1244 = vst.msk [vmem:[#allocation3 + $0x10] sm:$0xff] %vm1241_vm10, %v1198_v54  ;;  %1243 = vst.msk [vmem:[#allocation3 + $0x8] sm:$0xff] %vm1241_vm10, %v1196_v41  ;;  %1211 = vrot.lane.b32.xlu1 %v589_v45, %s3888_s15 }
 0x219   :  { %664 = vst.msk [vmem:[#allocation3 + $0x28] sm:$0xff] %vm658_vm2, %v621_v61  ;;  %539 = vrot.lane.b32.xlu0 %v494_v62, %s3885_s12 }
 0x21a   :  { %761 = vst.msk [vmem:[#allocation3 + $0x28] sm:$0xff] %vm755_vm0, %v718_v53  ;;  %v815_v63 = vpop.permute.xlu1 %814 }
 0x21b   :  { %v1006_v0 = vpop.permute.xlu0 %1005  ;;  %858 = vst.msk [vmem:[#allocation3 + $0x28] sm:$0xff] %vm852_vm6, %v815_v63 }
 0x21c   :  { %1051 = vst.msk [vmem:[#allocation3 + $0x18] sm:$0xff] %vm1047_vm8, %v1006_v0  ;;  %830 = vrot.lane.b32.xlu1 %v495_v39, %s3890_s16 }
 0x21d   :  { %955 = vst.msk [vmem:[#allocation3 + $0x28] sm:$0xff] %vm949_vm7, %v912_v57  ;;  %636 = vrot.lane.b32.xlu0 %v591_v1, %s3887_s14 }
 0x21e   :  { %v623_v2 = vpop.permute.xlu1 %622 }
 0x21f   :  { %v1103_v3 = vpop.permute.xlu0 %1102  ;;  %v1259_v6 = vld [vmem:[#allocation3 + $0x8] sm:$0xff]  ;;  %v1260_v8 = vld [vmem:[#allocation3 + $0x10] sm:$0xff]  ;;  %665 = vst.msk [vmem:[#allocation3 + $0x30] sm:$0xff] %vm658_vm2, %v623_v2 }
 0x220   :  { %1148 = vst.msk [vmem:[#allocation3 + $0x18] sm:$0xff] %vm1144_vm9, %v1103_v3  ;;  %3662 = vmatmul.mubr.msk.f32.vlgmr.msra.gmra.mrb[16].mxu1 %vm1290_vm11, %v1259_v6  ;;  %638 = vrot.lane.b32.xlu1 %v882_v60, %s3887_s14 }
 0x221   :  { %1021 = vrot.lane.b32.xlu0 %v4230_v44, %s3884_s0  ;;  %3664 = vmatprep.mubr.msk.f32.mxu1 %vm1290_vm11, %v1260_v8 }
 0x222   :  { %v1008_v10 = vpop.permute.xlu1 %1007 }
 0x223   :  { %v910_v12 = vpop.permute.xlu0 %909 }
 0x224   :  { %1023 = vrot.lane.b32.xlu1 %v4226_v43, %s3884_s0  ;;  %v787_v43 = vld [vmem:[#allocation2 + $0x121] sm:$0xff] }
 0x225   :  { %1118 = vrot.lane.b32.xlu0 %v494_v62, %s3886_s13 }
 0x226   :  { %v1105_v13 = vpop.permute.xlu1 %1104 }
 0x227   :  { %v722_v14 = vpop.permute.xlu0 %721 }
 0x228   :  { %1120 = vrot.lane.b32.xlu1 %v495_v39, %s3886_s13 }
 0x229   :  { %925 = vrot.lane.b32.xlu0 %v591_v1, %s3891_s17 }
 0x22a   :  { %v1202_v15 = vpop.permute.xlu1 %1201 }
 0x22b   :  { %v819_v16 = vpop.permute.xlu0 %818 }
 0x22c   :  { %1217 = vrot.lane.b32.xlu1 %v882_v60, %s3888_s15 }
 0x22d   :  { %737 = vrot.lane.b32.xlu0 %v690_v17, %s3889_s1 }
 0x22e   :  { %v716_v18 = vpop.permute.xlu1 %715 }
 0x22f   :  { %v1012_v19 = vpop.permute.xlu0 %1011  ;;  %760 = vst.msk [vmem:[#allocation3 + $0x20] sm:$0xff] %vm755_vm0, %v716_v18 }
 0x230   :  { %731 = vrot.lane.b32.xlu1 %v4230_v44, %s3889_s1 }
 0x231   :  { %834 = vrot.lane.b32.xlu0 %v787_v43, %s3890_s16 }
 0x232   :  { %v813_v20 = vpop.permute.xlu1 %812 }
 0x233   :  { %v1109_v21 = vpop.permute.xlu0 %1108  ;;  %857 = vst.msk [vmem:[#allocation3 + $0x20] sm:$0xff] %vm852_vm6, %v813_v20 }
 0x234   :  { %954 = vst.msk [vmem:[#allocation3 + $0x20] sm:$0xff] %vm949_vm7, %v910_v12  ;;  %828 = vrot.lane.b32.xlu1 %v494_v62, %s3890_s16 }
 0x235   :  { %1027 = vrot.lane.b32.xlu0 %v690_v17, %s3884_s0  ;;  %1052 = vst.msk [vmem:[#allocation3 + $0x20] sm:$0xff] %vm1047_vm8, %v1008_v10 }
 0x236   :  { %1149 = vst.msk [vmem:[#allocation3 + $0x20] sm:$0xff] %vm1144_vm9, %v1105_v13  ;;  %v1200_v22 = vpop.permute.xlu1 %1199 }
 0x237   :  { %v1206_v24 = vpop.permute.xlu0 %1205  ;;  %1246 = vst.msk [vmem:[#allocation3 + $0x20] sm:$0xff] %vm1241_vm10, %v1202_v15  ;;  %1245 = vst.msk [vmem:[#allocation3 + $0x18] sm:$0xff] %vm1241_vm10, %v1200_v22 }
 0x238   :  { %1215 = vrot.lane.b32.xlu1 %v591_v1, %s3888_s15 }
 0x239   :  { %1124 = vrot.lane.b32.xlu0 %v787_v43, %s3886_s13 }
 0x23a   :  { %v916_v44 = vpop.permute.xlu1 %915 }
 0x23b   :  { %v528_v25 = vpop.permute.xlu0 %527 }
 0x23c   :  { %569 = vst.msk [vmem:[#allocation3 + $0x38] sm:$0xff] %vm561_vm5, %v528_v25  ;;  %931 = vrot.lane.b32.xlu1 %v4440_v26, %s3891_s17 }
 0x23d   :  { %543 = vrot.lane.b32.xlu0 %v496_v27, %s3885_s12 }
 0x23e   :  { %v720_v28 = vpop.permute.xlu1 %719  ;;  %v1261_v31 = vld [vmem:[#allocation3 + $0x18] sm:$0xff]  ;;  %v1262_v32 = vld [vmem:[#allocation3 + $0x20] sm:$0xff] }
 0x23f   :  { %v625_v30 = vpop.permute.xlu0 %624  ;;  %762 = vst.msk [vmem:[#allocation3 + $0x30] sm:$0xff] %vm755_vm0, %v720_v28  ;;  %3665 = vmatmul.mubr.msk.f32.gmra.mrb[18].mxu1 %vm1290_vm11, %v1261_v31 }
 0x240   :  { %666 = vst.msk [vmem:[#allocation3 + $0x38] sm:$0xff] %vm658_vm2, %v625_v30  ;;  %735 = vrot.lane.b32.xlu1 %v4238_v47, %s3889_s1  ;;  %3667 = vmatprep.mubr.msk.f32.mxu1 %vm1290_vm11, %v1262_v32 }
 0x241   :  { %763 = vst.msk [vmem:[#allocation3 + $0x38] sm:$0xff] %vm755_vm0, %v722_v14  ;;  %640 = vrot.lane.b32.xlu0 %v593_v33, %s3887_s14 }
 0x242   :  { %860 = vst.msk [vmem:[#allocation3 + $0x38] sm:$0xff] %vm852_vm6, %v819_v16  ;;  %v817_v34 = vpop.permute.xlu1 %816 }
 0x243   :  { %957 = vst.msk [vmem:[#allocation3 + $0x38] sm:$0xff] %vm949_vm7, %v916_v44  ;;  %v1010_v35 = vpop.permute.xlu0 %1009 }
 0x244   :  { %1055 = vst.msk [vmem:[#allocation3 + $0x38] sm:$0xff] %vm1047_vm8, %v4303_v4  ;;  %1053 = vst.msk [vmem:[#allocation3 + $0x28] sm:$0xff] %vm1047_vm8, %v1010_v35  ;;  %832 = vrot.lane.b32.xlu1 %v496_v27, %s3890_s16  ;;  %v1176_v4 = vld [vmem:[#allocation2 + $0x132] sm:$0xff] }
 0x245   :  { %859 = vst.msk [vmem:[#allocation3 + $0x30] sm:$0xff] %vm852_vm6, %v817_v34  ;;  %1025 = vrot.lane.b32.xlu0 %v4238_v47, %s3884_s0 }
 0x246   :  { %1152 = vst.msk [vmem:[#allocation3 + $0x38] sm:$0xff] %vm1144_vm9, %v4308_v5  ;;  %v914_v36 = vpop.permute.xlu1 %913 }
 0x247   :  { %1249 = vst.msk [vmem:[#allocation3 + $0x38] sm:$0xff] %vm1241_vm10, %v4314_v7  ;;  %v1107_v37 = vpop.permute.xlu0 %1106 }
 0x248   :  { %956 = vst.msk [vmem:[#allocation3 + $0x30] sm:$0xff] %vm949_vm7, %v914_v36  ;;  %929 = vrot.lane.b32.xlu1 %v593_v33, %s3891_s17 }
 0x249   :  { %1150 = vst.msk [vmem:[#allocation3 + $0x28] sm:$0xff] %vm1144_vm9, %v1107_v37  ;;  %1122 = vrot.lane.b32.xlu0 %v496_v27, %s3886_s13  ;;  %s3893_s13 = smov 112  }
 0x24a   :  { %1054 = vst.msk [vmem:[#allocation3 + $0x30] sm:$0xff] %vm1047_vm8, %v1012_v19  ;;  %v726_v47 = vpop.permute.xlu1 %725 }
 0x24b   :  { %1151 = vst.msk [vmem:[#allocation3 + $0x30] sm:$0xff] %vm1144_vm9, %v1109_v21  ;;  %v1204_v5 = vpop.permute.xlu0 %1203 }
 0x24c   :  { %1248 = vst.msk [vmem:[#allocation3 + $0x30] sm:$0xff] %vm1241_vm10, %v1206_v24  ;;  %1247 = vst.msk [vmem:[#allocation3 + $0x28] sm:$0xff] %vm1241_vm10, %v1204_v5  ;;  %1223 = vrot.lane.b32.xlu1 %v1176_v4, %s3888_s15 }
 0x24d   :  { %1219 = vrot.lane.b32.xlu0 %v593_v33, %s3888_s15 }
 0x24e   :  { %v534_v7 = vpop.permute.xlu1 %533  ;;  %v1265_v50 = vld [vmem:[#allocation3 + $0x38] sm:$0xff] }
 0x24f   :  { %v823_v38 = vpop.permute.xlu0 %822  ;;  %572 = vst.msk [vmem:[#allocation3 + $0x50] sm:$0xff] %vm561_vm5, %v534_v7 }
 0x251   :  { %1221 = vrot.lane.b32.xlu0 %v4440_v26, %s3888_s15 }
 0x252   :  { %v631_v40 = vpop.permute.xlu1 %630 }
 0x253   :  { %v920_v42 = vpop.permute.xlu0 %919  ;;  %v1263_v45 = vld [vmem:[#allocation3 + $0x28] sm:$0xff]  ;;  %669 = vst.msk [vmem:[#allocation3 + $0x50] sm:$0xff] %vm658_vm2, %v631_v40  ;;  %v1264_v46 = vld [vmem:[#allocation3 + $0x30] sm:$0xff] }
 0x254   :  { %3668 = vmatmul.mubr.msk.f32.gmra.mrb[20].mxu1 %vm1290_vm11, %v1263_v45 }
 0x255   :  { %3670 = vmatprep.mubr.msk.f32.mxu1 %vm1290_vm11, %v1264_v46 }
 0x256   :  { %v1016_v48 = vpop.permute.xlu1 %1015 }
 0x257   :  { %v724_v49 = vpop.permute.xlu0 %723 }
 0x258   :  { %764 = vst.msk [vmem:[#allocation3 + $0x40] sm:$0xff] %vm755_vm0, %v724_v49  ;;  %3671 = vmatmul.mubr.msk.f32.gmra.mrb[22].mxu1 %vm1290_vm11, %v1265_v50  ;;  %v4636_v49 = vld [vmem:[%s5861_s3] ss:$0 sm:$0xff]  ;;  %v1787_v50 = vld [vmem:[#allocation4 + $0x2] sm:$0xff]  ;;  %s3892_s3 = smov 96  }
 0x259   :  { %1819 = vrot.lane.b32.xlu1 %v1787_v50, %s3890_s16 }
 0x25a   :  { %v1113_v51 = vpop.permute.xlu1 %1112 }
 0x25b   :  { %v821_v52 = vpop.permute.xlu0 %820 }
 0x25c   :  { %861 = vst.msk [vmem:[#allocation3 + $0x40] sm:$0xff] %vm852_vm6, %v821_v52 }
 0x25e   :  { %v1210_v53 = vpop.permute.xlu1 %1209 }
 0x25f   :  { %v730_v54 = vpop.permute.xlu0 %729 }
 0x262   :  { %v532_v55 = vpop.permute.xlu1 %531 }
 0x263   :  { %v538_v56 = vpop.permute.xlu0 %537  ;;  %571 = vst.msk [vmem:[#allocation3 + $0x48] sm:$0xff] %vm561_vm5, %v532_v55 }
 0x264   :  { %574 = vst.msk [vmem:[#allocation3 + $0x60] sm:$0xff] %vm561_vm5, %v538_v56  ;;  %v1698_v56 = vld [vmem:[#allocation4 + $0xa1] sm:$0xff] }
 0x265   :  { %1738 = vrot.lane.b32.xlu1 %v1698_v56, %s3887_s14 }
 0x266   :  { %v629_v57 = vpop.permute.xlu1 %628 }
 0x267   :  { %v924_v39 = vpop.permute.xlu0 %923  ;;  %668 = vst.msk [vmem:[#allocation3 + $0x48] sm:$0xff] %vm658_vm2, %v629_v57  ;;  %v2183_v57 = vld [vmem:[#allocation4 + $0x90] sm:$0xff] }
 0x268   :  { %765 = vst.msk [vmem:[#allocation3 + $0x48] sm:$0xff] %vm755_vm0, %v726_v47 }
 0x269   :  { %862 = vst.msk [vmem:[#allocation3 + $0x48] sm:$0xff] %vm852_vm6, %v823_v38 }
 0x26a   :  { %959 = vst.msk [vmem:[#allocation3 + $0x48] sm:$0xff] %vm949_vm7, %v920_v42  ;;  %v918_v58 = vpop.permute.xlu1 %917 }
 0x26b   :  { %v536_v59 = vpop.permute.xlu0 %535  ;;  %958 = vst.msk [vmem:[#allocation3 + $0x40] sm:$0xff] %vm949_vm7, %v918_v58 }
 0x26c   :  { %573 = vst.msk [vmem:[#allocation3 + $0x58] sm:$0xff] %vm561_vm5, %v536_v59  ;;  %v1795_v59 = vld [vmem:[#allocation4 + $0xa2] sm:$0xff] }
 0x26d   :  { %1056 = vst.msk [vmem:[#allocation3 + $0x40] sm:$0xff] %vm1047_vm8, %v1016_v48  ;;  %1835 = vrot.lane.b32.xlu1 %v1795_v59, %s3890_s16 }
 0x26e   :  { %1153 = vst.msk [vmem:[#allocation3 + $0x40] sm:$0xff] %vm1144_vm9, %v1113_v51  ;;  %v827_v60 = vpop.permute.xlu1 %826  ;;  %v1690_v51 = vld [vmem:[#allocation4 + $0x1] sm:$0xff] }
 0x26f   :  { %1250 = vst.msk [vmem:[#allocation3 + $0x40] sm:$0xff] %vm1241_vm10, %v1210_v53  ;;  %v633_v41 = vpop.permute.xlu0 %632  ;;  %1722 = vrot.lane.b32.xlu0 %v1690_v51, %s3887_s14 }
 0x270   :  { %670 = vst.msk [vmem:[#allocation3 + $0x58] sm:$0xff] %vm658_vm2, %v633_v41 }
 0x271   :  { %767 = vst.msk [vmem:[#allocation3 + $0x58] sm:$0xff] %vm755_vm0, %v730_v54 }
 0x272   :  { %864 = vst.msk [vmem:[#allocation3 + $0x58] sm:$0xff] %vm852_vm6, %v827_v60  ;;  %v635_v61 = vpop.permute.xlu1 %634  ;;  %v2280_v60 = vld [vmem:[#allocation4 + $0x91] sm:$0xff] }
 0x273   :  { %961 = vst.msk [vmem:[#allocation3 + $0x58] sm:$0xff] %vm949_vm7, %v924_v39  ;;  %v1018_v62 = vpop.permute.xlu0 %1017  ;;  %2222 = vrot.lane.b32.xlu0 %v2183_v57, %s3892_s3 }
 0x274   :  { %671 = vst.msk [vmem:[#allocation3 + $0x60] sm:$0xff] %vm658_vm2, %v635_v61 }
 0x275   :  { %1057 = vst.msk [vmem:[#allocation3 + $0x48] sm:$0xff] %vm1047_vm8, %v1018_v62 }
 0x276   :  { %v1266_v63 = vld [vmem:[#allocation3 + $0x40] sm:$0xff]  ;;  %v1020_v0 = vpop.permute.xlu1 %1019 }
 0x277   :  { %v1115_v1 = vpop.permute.xlu0 %1114  ;;  %3673 = vmatprep.mubr.msk.f32.mxu1 %vm1290_vm11, %v1266_v63  ;;  %2319 = vrot.lane.b32.xlu0 %v2280_v60, %s3893_s13 }
 0x278   :  { %1154 = vst.msk [vmem:[#allocation3 + $0x48] sm:$0xff] %vm1144_vm9, %v1115_v1 }
 0x27a   :  { %v1117_v2 = vpop.permute.xlu1 %1116 }
 0x27b   :  { %v922_v3 = vpop.permute.xlu0 %921 }
 0x27e   :  { %v1214_v6 = vpop.permute.xlu1 %1213 }
 0x27f   :  { %v734_v8 = vpop.permute.xlu0 %733 }
 0x282   :  { %v728_v10 = vpop.permute.xlu1 %727 }
 0x283   :  { %v542_v12 = vpop.permute.xlu0 %541  ;;  %766 = vst.msk [vmem:[#allocation3 + $0x50] sm:$0xff] %vm755_vm0, %v728_v10 }
 0x284   :  { %576 = vst.msk [vmem:[#allocation3 + $0x70] sm:$0xff] %vm561_vm5, %v542_v12 }
 0x286   :  { %v825_v13 = vpop.permute.xlu1 %824 }
 0x287   :  { %v928_v14 = vpop.permute.xlu0 %927  ;;  %863 = vst.msk [vmem:[#allocation3 + $0x50] sm:$0xff] %vm852_vm6, %v825_v13 }
 0x288   :  { %960 = vst.msk [vmem:[#allocation3 + $0x50] sm:$0xff] %vm949_vm7, %v922_v3 }
 0x289   :  { %1058 = vst.msk [vmem:[#allocation3 + $0x50] sm:$0xff] %vm1047_vm8, %v1020_v0 }
 0x28a   :  { %1155 = vst.msk [vmem:[#allocation3 + $0x50] sm:$0xff] %vm1144_vm9, %v1117_v2  ;;  %v1212_v15 = vpop.permute.xlu1 %1211 }
 0x28b   :  { %v540_v16 = vpop.permute.xlu0 %539  ;;  %1252 = vst.msk [vmem:[#allocation3 + $0x50] sm:$0xff] %vm1241_vm10, %v1214_v6  ;;  %1251 = vst.msk [vmem:[#allocation3 + $0x48] sm:$0xff] %vm1241_vm10, %v1212_v15 }
 0x28c   :  { %575 = vst.msk [vmem:[#allocation3 + $0x68] sm:$0xff] %vm561_vm5, %v540_v16 }
 0x28e   :  { %v831_v17 = vpop.permute.xlu1 %830 }
 0x28f   :  { %v637_v18 = vpop.permute.xlu0 %636 }
 0x290   :  { %672 = vst.msk [vmem:[#allocation3 + $0x68] sm:$0xff] %vm658_vm2, %v637_v18 }
 0x291   :  { %769 = vst.msk [vmem:[#allocation3 + $0x68] sm:$0xff] %vm755_vm0, %v734_v8 }
 0x292   :  { %866 = vst.msk [vmem:[#allocation3 + $0x68] sm:$0xff] %vm852_vm6, %v831_v17  ;;  %v639_v19 = vpop.permute.xlu1 %638  ;;  %v1267_v20 = vld [vmem:[#allocation3 + $0x48] sm:$0xff]  ;;  %v1268_v21 = vld [vmem:[#allocation3 + $0x50] sm:$0xff] }
 0x293   :  { %963 = vst.msk [vmem:[#allocation3 + $0x68] sm:$0xff] %vm949_vm7, %v928_v14  ;;  %v1022_v43 = vpop.permute.xlu0 %1021  ;;  %3674 = vmatmul.mubr.msk.f32.gmra.mrb[24].mxu1 %vm1290_vm11, %v1267_v20 }
 0x294   :  { %673 = vst.msk [vmem:[#allocation3 + $0x70] sm:$0xff] %vm658_vm2, %v639_v19  ;;  %3676 = vmatprep.mubr.msk.f32.mxu1 %vm1290_vm11, %v1268_v21 }
 0x295   :  { %1059 = vst.msk [vmem:[#allocation3 + $0x58] sm:$0xff] %vm1047_vm8, %v1022_v43 }
 0x296   :  { %v1024_v22 = vpop.permute.xlu1 %1023 }
 0x297   :  { %v1119_v24 = vpop.permute.xlu0 %1118 }
 0x298   :  { %1156 = vst.msk [vmem:[#allocation3 + $0x58] sm:$0xff] %vm1144_vm9, %v1119_v24 }
 0x29a   :  { %v1121_v44 = vpop.permute.xlu1 %1120 }
 0x29b   :  { %v926_v25 = vpop.permute.xlu0 %925 }
 0x29e   :  { %v1218_v26 = vpop.permute.xlu1 %1217 }
 0x29f   :  { %v738_v27 = vpop.permute.xlu0 %737 }
 0x2a2   :  { %v732_v28 = vpop.permute.xlu1 %731 }
 0x2a3   :  { %v835_v30 = vpop.permute.xlu0 %834  ;;  %768 = vst.msk [vmem:[#allocation3 + $0x60] sm:$0xff] %vm755_vm0, %v732_v28 }
 0x2a6   :  { %v829_v31 = vpop.permute.xlu1 %828 }
 0x2a7   :  { %v1028_v32 = vpop.permute.xlu0 %1027  ;;  %865 = vst.msk [vmem:[#allocation3 + $0x60] sm:$0xff] %vm852_vm6, %v829_v31 }
 0x2a8   :  { %962 = vst.msk [vmem:[#allocation3 + $0x60] sm:$0xff] %vm949_vm7, %v926_v25 }
 0x2a9   :  { %1060 = vst.msk [vmem:[#allocation3 + $0x60] sm:$0xff] %vm1047_vm8, %v1024_v22 }
 0x2aa   :  { %1157 = vst.msk [vmem:[#allocation3 + $0x60] sm:$0xff] %vm1144_vm9, %v1121_v44  ;;  %v1216_v33 = vpop.permute.xlu1 %1215 }
 0x2ab   :  { %v1125_v34 = vpop.permute.xlu0 %1124  ;;  %1254 = vst.msk [vmem:[#allocation3 + $0x60] sm:$0xff] %vm1241_vm10, %v1218_v26  ;;  %1253 = vst.msk [vmem:[#allocation3 + $0x58] sm:$0xff] %vm1241_vm10, %v1216_v33 }
 0x2ae   :  { %v932_v35 = vpop.permute.xlu1 %931 }
 0x2af   :  { %v544_v36 = vpop.permute.xlu0 %543 }
 0x2b0   :  { %577 = vst.msk [vmem:[#allocation3 + $0x78] sm:$0xff] %vm561_vm5, %v544_v36  ;;  %vm2256_vm5 = vcmask 917248  }
 0x2b2   :  { %v736_v37 = vpop.permute.xlu1 %735  ;;  %v1269_v47 = vld [vmem:[#allocation3 + $0x58] sm:$0xff]  ;;  %v1270_v5 = vld [vmem:[#allocation3 + $0x60] sm:$0xff] }
 0x2b3   :  { %v641_v4 = vpop.permute.xlu0 %640  ;;  %770 = vst.msk [vmem:[#allocation3 + $0x70] sm:$0xff] %vm755_vm0, %v736_v37  ;;  %3677 = vmatmul.mubr.msk.f32.gmra.mrb[26].mxu1 %vm1290_vm11, %v1269_v47 }
 0x2b4   :  { %674 = vst.msk [vmem:[#allocation3 + $0x78] sm:$0xff] %vm658_vm2, %v641_v4  ;;  %3679 = vmatprep.mubr.msk.f32.mxu1 %vm1290_vm11, %v1270_v5  ;;  %vm2353_vm2 = vcmask 1048448  }
 0x2b5   :  { %771 = vst.msk [vmem:[#allocation3 + $0x78] sm:$0xff] %vm755_vm0, %v738_v27  ;;  %vm2839_vm0 = vcmask 1041409  }
 0x2b6   :  { %868 = vst.msk [vmem:[#allocation3 + $0x78] sm:$0xff] %vm852_vm6, %v835_v30  ;;  %v833_v23 = vpop.permute.xlu1 %832 }
 0x2b7   :  { %965 = vst.msk [vmem:[#allocation3 + $0x78] sm:$0xff] %vm949_vm7, %v932_v35  ;;  %v1026_v7 = vpop.permute.xlu0 %1025 }
 0x2b8   :  { %1063 = vst.msk [vmem:[#allocation3 + $0x78] sm:$0xff] %vm1047_vm8, %v4318_v9  ;;  %1061 = vst.msk [vmem:[#allocation3 + $0x68] sm:$0xff] %vm1047_vm8, %v1026_v7 }
 0x2b9   :  { %867 = vst.msk [vmem:[#allocation3 + $0x70] sm:$0xff] %vm852_vm6, %v833_v23  ;;  %vm2841_vm6 = vcmask 1043459  }
 0x2ba   :  { %1160 = vst.msk [vmem:[#allocation3 + $0x78] sm:$0xff] %vm1144_vm9, %v4326_v11  ;;  %v930_v38 = vpop.permute.xlu1 %929 }
 0x2bb   :  { %v1123_v40 = vpop.permute.xlu0 %1122  ;;  %964 = vst.msk [vmem:[#allocation3 + $0x70] sm:$0xff] %vm949_vm7, %v930_v38  ;;  %vm2843_vm7 = vcmask 1045509  }
 0x2bc   :  { %1158 = vst.msk [vmem:[#allocation3 + $0x68] sm:$0xff] %vm1144_vm9, %v1123_v40 }
 0x2bd   :  { %1062 = vst.msk [vmem:[#allocation3 + $0x70] sm:$0xff] %vm1047_vm8, %v1028_v32  ;;  %vm2845_vm8 = vcmask 1047559  }
 0x2be   :  { %1159 = vst.msk [vmem:[#allocation3 + $0x70] sm:$0xff] %vm1144_vm9, %v1125_v34  ;;  %v1224_v45 = vpop.permute.xlu1 %1223  ;;  %vm2861_vm9 = vcmask 255104  }
 0x2bf   :  { %v1220_v42 = vpop.permute.xlu0 %1219  ;;  %1257 = vst.msk [vmem:[#allocation3 + $0x78] sm:$0xff] %vm1241_vm10, %v1224_v45 }
 0x2c0   :  { %1255 = vst.msk [vmem:[#allocation3 + $0x68] sm:$0xff] %vm1241_vm10, %v1220_v42 }
 0x2c3   :  { %v1222_v9 = vpop.permute.xlu0 %1221 }
 0x2c4   :  { %1256 = vst.msk [vmem:[#allocation3 + $0x70] sm:$0xff] %vm1241_vm10, %v1222_v9  ;;  %vm2889_vm10 = vcmask 386304  }
 0x2c6   :  { %v1273_v46 = vld [vmem:[#allocation3 + $0x78] sm:$0xff] }
 0x2c7   :  { %v1271_v11 = vld [vmem:[#allocation3 + $0x68] sm:$0xff] }
 0x2c8   :  { %3680 = vmatmul.mubr.msk.f32.gmra.mrb[28].mxu1 %vm1290_vm11, %v1271_v11 }
 0x2cb   :  { %v1272_v48 = vld [vmem:[#allocation3 + $0x70] sm:$0xff] }
 0x2cc   :  { %3682 = vmatprep.mubr.msk.f32.mxu1 %vm1290_vm11, %v1272_v48 }
 0x2cd   :  { %3683 = vmatmul.mubr.msk.f32.gmra.mrb[30].mxu1 %vm1290_vm11, %v1273_v46  ;;  %vm2903_vm11 = vcmask 517504  }
 0x2f3   :  { %v3663_v52 = vpop.f32.mrb[16].mxu1 }
 0x2f4   :  { %v1411_v53 = vadd.f32 %v3663_v52, %v4636_v49  ;;  %v1405_v54 = vpop.f32.mrb[17].mxu1 }
 0x2f5   :  { %v1406_v55 = vadd.f32 %v4636_v49, %v1405_v54 }
 0x2f6   :  { %v1485_v39 = vsel %vm78_vm12, %v1411_v53, 0.0 }
 0x2f7   :  { %v1484_v58 = vsel %vm78_vm12, %v1406_v55, 0.0 }
 0x2f8   :  { %v1486_v41 = vadd.f32 %v1485_v39, %v1484_v58 }
 0x312   :  { %v3666_v61 = vpop.f32.mrb[18].mxu1 }
 0x313   :  { %v1415_v62 = vpop.f32.mrb[19].mxu1  ;;  %v1421_v63 = vadd.f32 %v3666_v61, %v4636_v49 }
 0x314   :  { %v1416_v0 = vadd.f32 %v4636_v49, %v1415_v62 }
 0x315   :  { %v1489_v3 = vsel %vm78_vm12, %v1421_v63, 0.0 }
 0x316   :  { %v1487_v1 = vsel %vm78_vm12, %v1416_v0, 0.0 }
 0x317   :  { %v1488_v2 = vadd.f32 %v1487_v1, %v1486_v41 }
 0x319   :  { %v1490_v6 = vadd.f32 %v1489_v3, %v1488_v2 }
 0x327   :  { %v3669_v8 = vpop.f32.mrb[20].mxu1 }
 0x328   :  { %v1425_v10 = vpop.f32.mrb[21].mxu1  ;;  %v1431_v12 = vadd.f32 %v3669_v8, %v4636_v49  ;;  %v2434_v8 = vld [vmem:[%s5862_s4] sm:$0xff] }
 0x329   :  { %v1426_v13 = vadd.f32 %v4636_v49, %v1425_v10  ;;  %v2435_v10 = vld [vmem:[%s5862_s4 + $0x8] sm:$0xff] }
 0x32a   :  { %v1493_v18 = vsel %vm78_vm12, %v1431_v12, 0.0 }
 0x32b   :  { %v1491_v14 = vsel %vm78_vm12, %v1426_v13, 0.0  ;;  %v3672_v15 = vpop.f32.mrb[22].mxu1 }
 0x32c   :  { %v1492_v16 = vadd.f32 %v1491_v14, %v1490_v6  ;;  %v1435_v17 = vpop.f32.mrb[23].mxu1  ;;  %v1441_v19 = vadd.f32 %v3672_v15, %v4636_v49 }
 0x32d   :  { %v1436_v43 = vadd.f32 %v4636_v49, %v1435_v17  ;;  %v2436_v17 = vld [vmem:[%s5862_s4 + $0x10] sm:$0xff] }
 0x32e   :  { %v1494_v20 = vadd.f32 %v1493_v18, %v1492_v16  ;;  %v1497_v24 = vsel %vm78_vm12, %v1441_v19, 0.0  ;;  %v2437_v18 = vld [vmem:[%s5862_s4 + $0x18] sm:$0xff] }
 0x32f   :  { %v1495_v21 = vsel %vm78_vm12, %v1436_v43, 0.0 }
 0x330   :  { %v1496_v22 = vadd.f32 %v1495_v21, %v1494_v20  ;;  %v3713_v20 = vpack.c.bf16 %v2437_v18, %v2436_v17  ;;  %v2448_v18 = vld [vmem:[%s5862_s4 + $0x70] sm:$0xff] }
 0x332   :  { %v1498_v44 = vadd.f32 %v1497_v24, %v1496_v22  ;;  %v1658_v22 = vld [vmem:[#allocation4] sm:$0xff] }
 0x333   :  { %v1666_v24 = vld [vmem:[#allocation4 + $0xa0] sm:$0xff]  ;;  %1674 = vst.msk [vmem:[#allocation5] sm:$0xff] %vm78_vm12, %v1658_v22 }
 0x334   :  { %v1499_v25 = vrot.slane %v1498_v44, 4  ;;  %1682 = vst.msk [vmem:[#allocation5 + $0x80] sm:$0xff] %vm78_vm12, %v1666_v24  ;;  %v2451_v24 = vld [vmem:[%s5862_s4 + $0x88] sm:$0xff] }
 0x336   :  { %v1500_v26 = vadd.f32 %v1499_v25, %v1498_v44  ;;  %v2438_v44 = vld [vmem:[%s5862_s4 + $0x20] sm:$0xff] }
 0x338   :  { %v1501_v27 = vrot.slane %v1500_v26, 2 }
 0x33a   :  { %v1502_v28 = vadd.f32 %v1501_v27, %v1500_v26  ;;  %v1723_v26 = vpop.permute.xlu0 %1722  ;;  %v2439_v27 = vld [vmem:[%s5862_s4 + $0x28] sm:$0xff] }
 0x33b   :  { %1771 = vst.msk [vmem:[#allocation5] sm:$0xff] %vm1770_vm14, %v1723_v26 }
 0x33c   :  { %v1503_v30 = vrot.slane %v1502_v28, 1 }
 0x33e   :  { %v1504_v31 = vadd.f32 %v1503_v30, %v1502_v28  ;;  %v3716_v30 = vpack.c.bf16 %v2439_v27, %v2438_v44 }
 0x340   :  { %v1527_v32 = vmul.f32 0.015625, %v1504_v31  ;;  %v2440_v31 = vld [vmem:[%s5862_s4 + $0x30] sm:$0xff] }
 0x342   :  { %v4660_v33 = vsub.f32 %v1406_v55, %v1527_v32  ;;  %v4662_v34 = vsub.f32 %v1411_v53, %v1527_v32  ;;  %v4664_v35 = vsub.f32 %v1416_v0, %v1527_v32  ;;  %v4666_v36 = vsub.f32 %v1421_v63, %v1527_v32 }
 0x343   :  { %v4668_v37 = vsub.f32 %v1426_v13, %v1527_v32  ;;  %v4670_v4 = vsub.f32 %v1431_v12, %v1527_v32  ;;  %v4672_v47 = vsub.f32 %v1436_v43, %v1527_v32  ;;  %v4674_v5 = vsub.f32 %v1441_v19, %v1527_v32  ;;  %v1820_v43 = vpop.permute.xlu1 %1819  ;;  %v2441_v32 = vld [vmem:[%s5862_s4 + $0x38] sm:$0xff] }
 0x344   :  { %v1545_v23 = vmul.f32 %v4660_v33, %v4660_v33  ;;  %v1546_v7 = vmul.f32 %v4662_v34, %v4662_v34  ;;  %v1547_v38 = vmul.f32 %v4664_v35, %v4664_v35  ;;  %v1548_v40 = vmul.f32 %v4666_v36, %v4666_v36  ;;  %1868 = vst.msk [vmem:[#allocation5] sm:$0xff] %vm1867_vm15, %v1820_v43  ;;  %v2449_v43 = vld [vmem:[%s5862_s4 + $0x78] sm:$0xff] }
 0x345   :  { %v1549_v11 = vmul.f32 %v4668_v37, %v4668_v37  ;;  %v1550_v50 = vmul.f32 %v4670_v4, %v4670_v4  ;;  %v1551_v53 = vmul.f32 %v4672_v47, %v4672_v47  ;;  %v1552_v56 = vmul.f32 %v4674_v5, %v4674_v5 }
 0x346   :  { %v1561_v42 = vsel %vm78_vm12, %v1545_v23, 0.0  ;;  %v1562_v45 = vsel %vm78_vm12, %v1546_v7, 0.0  ;;  %v1564_v46 = vsel %vm78_vm12, %v1547_v38, 0.0  ;;  %v1566_v51 = vsel %vm78_vm12, %v1548_v40, 0.0 }
 0x347   :  { %v1563_v9 = vadd.f32 %v1562_v45, %v1561_v42  ;;  %v1568_v54 = vsel %vm78_vm12, %v1549_v11, 0.0  ;;  %v1570_v57 = vsel %vm78_vm12, %v1550_v50, 0.0  ;;  %v1572_v58 = vsel %vm78_vm12, %v1551_v53, 0.0  ;;  %v1739_v23 = vpop.permute.xlu1 %1738 }
 0x348   :  { %v1574_v60 = vsel %vm78_vm12, %v1552_v56, 0.0  ;;  %v3710_v12 = vpack.c.bf16 %v2435_v10, %v2434_v8  ;;  %v3894_v13 = vmov 0.0|0.0   ;;  %1779 = vst.msk [vmem:[#allocation5 + $0x80] sm:$0xff] %vm1770_vm14, %v1739_v23  ;;  %v3719_v38 = vpack.c.bf16 %v2441_v32, %v2440_v31  ;;  %v2445_v56 = vld [vmem:[%s5862_s4 + $0x58] sm:$0xff] }
 0x349   :  { %v1565_v48 = vadd.f32 %v1564_v46, %v1563_v9  ;;  %3709 = vmatprep.subr.bf16.mxu0 %v3894_v13  ;;  %v3731_v22 = vpack.c.bf16 %v2449_v43, %v2448_v18 }
 0x34a   :  { %3711 = vmatpush1.bf16.msra.mxu0 %v3710_v12 }
 0x34b   :  { %v1567_v52 = vadd.f32 %v1566_v51, %v1565_v48  ;;  %3712 = vmatprep.subr.bf16.mxu0 %v3894_v13  ;;  %v1836_v51 = vpop.permute.xlu1 %1835 }
 0x34c   :  { %1876 = vst.msk [vmem:[#allocation5 + $0x80] sm:$0xff] %vm1867_vm15, %v1836_v51 }
 0x34d   :  { %v1569_v55 = vadd.f32 %v1568_v54, %v1567_v52 }
 0x34e   :  { %3714 = vmatpush1.bf16.msra.mxu0 %v3713_v20  ;;  %v2450_v20 = vld [vmem:[%s5862_s4 + $0x80] sm:$0xff] }
 0x34f   :  { %v1571_v39 = vadd.f32 %v1570_v57, %v1569_v55  ;;  %3715 = vmatprep.subr.bf16.mxu0 %v3894_v13  ;;  %v2444_v55 = vld [vmem:[%s5862_s4 + $0x50] sm:$0xff]  ;;  %v3734_v44 = vpack.c.bf16 %v2451_v24, %v2450_v20 }
 0x350   :  { %v3725_v57 = vpack.c.bf16 %v2445_v56, %v2444_v55 }
 0x351   :  { %v1573_v59 = vadd.f32 %v1572_v58, %v1571_v39  ;;  %v2446_v39 = vld [vmem:[%s5862_s4 + $0x60] sm:$0xff]  ;;  %v2447_v58 = vld [vmem:[%s5862_s4 + $0x68] sm:$0xff] }
 0x352   :  { %3717 = vmatpush1.bf16.msra.mxu0 %v3716_v30 }
 0x353   :  { %v1575_v41 = vadd.f32 %v1574_v60, %v1573_v59  ;;  %3718 = vmatprep.subr.bf16.mxu0 %v3894_v13 }
 0x355   :  { %v1576_v61 = vrot.slane %v1575_v41, 4 }
 0x356   :  { %3720 = vmatpush1.bf16.msra.mxu0 %v3719_v38 }
 0x357   :  { %v1577_v62 = vadd.f32 %v1576_v61, %v1575_v41  ;;  %3721 = vmatprep.subr.bf16.mxu0 %v3894_v13  ;;  %v3728_v41 = vpack.c.bf16 %v2447_v58, %v2446_v39 }
 0x359   :  { %v1578_v63 = vrot.slane %v1577_v62, 2 }
 0x35b   :  { %v1579_v0 = vadd.f32 %v1578_v63, %v1577_v62 }
 0x35d   :  { %v1580_v1 = vrot.slane %v1579_v0, 1 }
 0x35f   :  { %v1581_v2 = vadd.f32 %v1580_v1, %v1579_v0 }
 0x361   :  { %v1603_v3 = vmul.f32 0.015625, %v1581_v2 }
 0x363   :  { %v1605_v6 = vadd.f32 1e-05, %v1603_v3 }
 0x365   :  { %3850 = vrsqrt.f32 %v1605_v6 }
 0x366   :  { %v3675_v14 = vpop.f32.mrb[24].mxu1 }
 0x367   :  { %v4708_v15 = vadd.f32 %v3675_v14, %v4636_v49  ;;  %v1445_v16 = vpop.f32.mrb[25].mxu1 }
 0x368   :  { %v4718_v19 = vadd.f32 %v4636_v49, %v1445_v16 }
 0x369   :  { %v1506_v21 = vsel %vm78_vm12, %v4708_v15, 0.0 }
 0x36a   :  { %v1505_v25 = vsel %vm78_vm12, %v4718_v19, 0.0 }
 0x36b   :  { %v4732_v28 = vadd.f32 %v1506_v21, %v1505_v25 }
 0x36f   :  { %v3851_v7 = vpop.eup %3850 }
 0x370   :  { %v1609_v40 = vmul.f32 %v3851_v7, %v4660_v33  ;;  %v1610_v42 = vmul.f32 %v3851_v7, %v4662_v34  ;;  %v1611_v45 = vmul.f32 %v3851_v7, %v4664_v35  ;;  %v1612_v9 = vmul.f32 %v3851_v7, %v4666_v36  ;;  %v2442_v33 = vld [vmem:[%s5862_s4 + $0x40] sm:$0xff]  ;;  %v2443_v34 = vld [vmem:[%s5862_s4 + $0x48] sm:$0xff] }
 0x371   :  { %v1613_v11 = vmul.f32 %v3851_v7, %v4668_v37  ;;  %v1614_v46 = vmul.f32 %v3851_v7, %v4670_v4  ;;  %v1615_v48 = vmul.f32 %v3851_v7, %v4672_v47  ;;  %v1616_v50 = vmul.f32 %v3851_v7, %v4674_v5 }
 0x372   :  { %v1625_v35 = vmax.f32 %v1609_v40, 0.0  ;;  %v1626_v36 = vmax.f32 %v1610_v42, 0.0  ;;  %v1627_v52 = vmax.f32 %v1611_v45, 0.0  ;;  %v1628_v53 = vmax.f32 %v1612_v9, 0.0 }
 0x373   :  { %v1629_v37 = vmax.f32 %v1613_v11, 0.0  ;;  %v1630_v4 = vmax.f32 %v1614_v46, 0.0  ;;  %v1631_v47 = vmax.f32 %v1615_v48, 0.0  ;;  %v1632_v54 = vmax.f32 %v1616_v50, 0.0 }
 0x374   :  { %1642 = vst.msk [vmem:[#allocation4 + $0x11] sm:$0xff] %vm78_vm12, %v1625_v35  ;;  %1643 = vst.msk [vmem:[#allocation4 + $0x21] sm:$0xff] %vm78_vm12, %v1626_v36  ;;  %v3722_v5 = vpack.c.bf16 %v2443_v34, %v2442_v33 }
 0x375   :  { %1644 = vst.msk [vmem:[#allocation4 + $0x31] sm:$0xff] %vm78_vm12, %v1627_v52  ;;  %1645 = vst.msk [vmem:[#allocation4 + $0x41] sm:$0xff] %vm78_vm12, %v1628_v53 }
 0x376   :  { %1646 = vst.msk [vmem:[#allocation4 + $0x51] sm:$0xff] %vm78_vm12, %v1629_v37  ;;  %1647 = vst.msk [vmem:[#allocation4 + $0x61] sm:$0xff] %vm78_vm12, %v1630_v4  ;;  %3723 = vmatpush1.bf16.msra.mxu0 %v3722_v5 }
 0x377   :  { %1648 = vst.msk [vmem:[#allocation4 + $0x71] sm:$0xff] %vm78_vm12, %v1631_v47  ;;  %1649 = vst.msk [vmem:[#allocation4 + $0x81] sm:$0xff] %vm78_vm12, %v1632_v54  ;;  %3724 = vmatprep.subr.bf16.mxu0 %v3894_v13 }
 0x37a   :  { %3726 = vmatpush1.bf16.msra.mxu0 %v3725_v57 }
 0x37b   :  { %v1981_v59 = vld [vmem:[#allocation4 + $0x11] sm:$0xff]  ;;  %v2370_v61 = vld [vmem:[#allocation4 + $0x22] sm:$0xff]  ;;  %3727 = vmatprep.subr.bf16.mxu0 %v3894_v13 }
 0x37c   :  { %v1884_v60 = vld [vmem:[#allocation4 + $0x10] sm:$0xff]  ;;  %2013 = vrot.lane.b32.xlu1 %v1981_v59, %s3888_s15  ;;  %v2176_v62 = vld [vmem:[#allocation4 + $0x20] sm:$0xff]  ;;  %2386 = vst.msk [vmem:[#allocation5 + $0x8] sm:$0xff] %vm78_vm12, %v2370_v61 }
 0x37d   :  { %1916 = vrot.lane.b32.xlu0 %v1884_v60, %s3884_s0  ;;  %1675 = vst.msk [vmem:[#allocation5 + $0x10] sm:$0xff] %vm78_vm12, %v1884_v60  ;;  %v1886_v63 = vld [vmem:[#allocation4 + $0x30] sm:$0xff]  ;;  %1676 = vst.msk [vmem:[#allocation5 + $0x20] sm:$0xff] %vm78_vm12, %v2176_v62  ;;  %v4790_v1 = vld [vmem:[#allocation4 + $0x40] sm:$0xff] }
 0x37e   :  { %v4786_v0 = vld [vmem:[#allocation4 + $0x32] sm:$0xff]  ;;  %v4792_v2 = vld [vmem:[#allocation4 + $0x42] sm:$0xff]  ;;  %1677 = vst.msk [vmem:[#allocation5 + $0x30] sm:$0xff] %vm78_vm12, %v1886_v63  ;;  %3729 = vmatpush1.bf16.msra.mxu0 %v3728_v41  ;;  %1678 = vst.msk [vmem:[#allocation5 + $0x40] sm:$0xff] %vm78_vm12, %v4790_v1 }
 0x37f   :  { %2387 = vst.msk [vmem:[#allocation5 + $0x18] sm:$0xff] %vm78_vm12, %v4786_v0  ;;  %v2078_v3 = vld [vmem:[#allocation4 + $0x12] sm:$0xff]  ;;  %2388 = vst.msk [vmem:[#allocation5 + $0x28] sm:$0xff] %vm78_vm12, %v4792_v2  ;;  %v4807_v10 = vld [vmem:[#allocation4 + $0x60] sm:$0xff]  ;;  %3730 = vmatprep.subr.bf16.mxu0 %v3894_v13 }
 0x380   :  { %v4797_v6 = vld [vmem:[#allocation4 + $0x50] sm:$0xff]  ;;  %2110 = vrot.lane.b32.xlu1 %v2078_v3, %s3895_s30  ;;  %v4809_v12 = vld [vmem:[#allocation4 + $0x62] sm:$0xff]  ;;  %1680 = vst.msk [vmem:[#allocation5 + $0x60] sm:$0xff] %vm78_vm12, %v4807_v10 }
 0x381   :  { %v4799_v8 = vld [vmem:[#allocation4 + $0x52] sm:$0xff]  ;;  %1724 = vrot.lane.b32.xlu0 %v1981_v59, %s3887_s14  ;;  %1679 = vst.msk [vmem:[#allocation5 + $0x50] sm:$0xff] %vm78_vm12, %v4797_v6  ;;  %2390 = vst.msk [vmem:[#allocation5 + $0x48] sm:$0xff] %vm78_vm12, %v4809_v12  ;;  %v4824_v17 = vld [vmem:[#allocation4 + $0x82] sm:$0xff] }
 0x382   :  { %2389 = vst.msk [vmem:[#allocation5 + $0x38] sm:$0xff] %vm78_vm12, %v4799_v8  ;;  %v4815_v14 = vld [vmem:[#allocation4 + $0x70] sm:$0xff]  ;;  %2392 = vst.msk [vmem:[#allocation5 + $0x68] sm:$0xff] %vm78_vm12, %v4824_v17  ;;  %3732 = vmatpush1.bf16.msra.mxu0 %v3731_v22  ;;  %v2273_v26 = vld [vmem:[#allocation4 + $0x21] sm:$0xff] }
 0x383   :  { %v4817_v16 = vld [vmem:[#allocation4 + $0x72] sm:$0xff]  ;;  %1681 = vst.msk [vmem:[#allocation5 + $0x70] sm:$0xff] %vm78_vm12, %v4815_v14  ;;  %v2403_v21 = vld [vmem:[#allocation5 + $0x8] sm:$0xff]  ;;  %3733 = vmatprep.subr.bf16.mxu0 %v3894_v13 }
 0x384   :  { %2391 = vst.msk [vmem:[#allocation5 + $0x58] sm:$0xff] %vm78_vm12, %v4817_v16  ;;  %2208 = vrot.lane.b32.xlu1 %v2176_v62, %s3892_s3  ;;  %3513 = vmatprep.mubr.msk.f32.mxu0 %vm78_vm12, %v2403_v21  ;;  %v1983_v38 = vld [vmem:[#allocation4 + $0x31] sm:$0xff]  ;;  %v2275_v35 = vld [vmem:[#allocation4 + $0x41] sm:$0xff] }
 0x385   :  { %1821 = vrot.lane.b32.xlu0 %v2078_v3, %s3890_s16  ;;  %v1985_v56 = vld [vmem:[#allocation4 + $0x51] sm:$0xff]  ;;  %v2277_v24 = vld [vmem:[#allocation4 + $0x61] sm:$0xff] }
 0x386   :  { %v3678_v25 = vpop.f32.mrb[26].mxu1  ;;  %3735 = vmatpush1.bf16.msra.mxu0 %v3734_v44 }
 0x387   :  { %v1455_v27 = vpop.f32.mrb[27].mxu1  ;;  %v1461_v30 = vadd.f32 %v3678_v25, %v4636_v49 }
 0x388   :  { %2305 = vrot.lane.b32.xlu1 %v2273_v26, %s3893_s13  ;;  %v1456_v31 = vadd.f32 %v4636_v49, %v1455_v27 }
 0x389   :  { %1918 = vrot.lane.b32.xlu0 %v2176_v62, %s3884_s0  ;;  %v1510_v13 = vsel %vm78_vm12, %v1461_v30, 0.0 }
 0x38a   :  { %v1508_v32 = vsel %vm78_vm12, %v1456_v31, 0.0 }
 0x38b   :  { %v1509_v23 = vadd.f32 %v1508_v32, %v4732_v28 }
 0x38c   :  { %1726 = vrot.lane.b32.xlu1 %v2273_v26, %s3887_s14 }
 0x38d   :  { %2015 = vrot.lane.b32.xlu0 %v2273_v26, %s3888_s15  ;;  %v1511_v7 = vadd.f32 %v1510_v13, %v1509_v23 }
 0x390   :  { %1823 = vrot.lane.b32.xlu1 %v2370_v61, %s3890_s16 }
 0x391   :  { %2112 = vrot.lane.b32.xlu0 %v2370_v61, %s3895_s30 }
 0x394   :  { %1920 = vrot.lane.b32.xlu1 %v1886_v63, %s3884_s0 }
 0x395   :  { %2210 = vrot.lane.b32.xlu0 %v1886_v63, %s3892_s3 }
 0x398   :  { %2017 = vrot.lane.b32.xlu1 %v1983_v38, %s3888_s15 }
 0x399   :  { %2307 = vrot.lane.b32.xlu0 %v1983_v38, %s3893_s13 }
 0x39b   :  { %v3681_v28 = vpop.f32.mrb[28].mxu1 }
 0x39c   :  { %v1465_v40 = vpop.f32.mrb[29].mxu1  ;;  %2114 = vrot.lane.b32.xlu1 %v4786_v0, %s3895_s30  ;;  %v1471_v42 = vadd.f32 %v3681_v28, %v4636_v49 }
 0x39d   :  { %1728 = vrot.lane.b32.xlu0 %v1983_v38, %s3887_s14  ;;  %v1466_v45 = vadd.f32 %v4636_v49, %v1465_v40  ;;  %v1987_v40 = vld [vmem:[#allocation4 + $0x71] sm:$0xff] }
 0x39e   :  { %v1514_v48 = vsel %vm78_vm12, %v1471_v42, 0.0 }
 0x39f   :  { %v1512_v9 = vsel %vm78_vm12, %v1466_v45, 0.0 }
 0x3a0   :  { %v1513_v11 = vadd.f32 %v1512_v9, %v1511_v7  ;;  %v3684_v46 = vpop.f32.mrb[30].mxu1  ;;  %2212 = vrot.lane.b32.xlu1 %v4790_v1, %s3892_s3 }
 0x3a1   :  { %1825 = vrot.lane.b32.xlu0 %v4786_v0, %s3890_s16  ;;  %v1475_v50 = vpop.f32.mrb[31].mxu1  ;;  %v1481_v51 = vadd.f32 %v3684_v46, %v4636_v49 }
 0x3a2   :  { %v1476_v33 = vadd.f32 %v4636_v49, %v1475_v50  ;;  %v1515_v34 = vadd.f32 %v1514_v48, %v1513_v11  ;;  %v2182_v11 = vld [vmem:[#allocation4 + $0x80] sm:$0xff]  ;;  %v2377_v48 = vld [vmem:[#allocation4 + $0x92] sm:$0xff]  ;;  %v4967_v50 = vpop.permute.xlu0 %2222 }
 0x3a3   :  { %v1518_v53 = vsel %vm78_vm12, %v1481_v51, 0.0  ;;  %2393 = vst.msk [vmem:[#allocation5 + $0x78] sm:$0xff] %vm78_vm12, %v2377_v48 }
 0x3a4   :  { %v1516_v36 = vsel %vm78_vm12, %v1476_v33, 0.0  ;;  %2309 = vrot.lane.b32.xlu1 %v2275_v35, %s3893_s13 }
 0x3a5   :  { %1922 = vrot.lane.b32.xlu0 %v4790_v1, %s3884_s0  ;;  %v1517_v52 = vadd.f32 %v1516_v36, %v1515_v34 }
 0x3a7   :  { %v1519_v37 = vadd.f32 %v1518_v53, %v1517_v52 }
 0x3a8   :  { %1730 = vrot.lane.b32.xlu1 %v2275_v35, %s3887_s14 }
 0x3a9   :  { %2019 = vrot.lane.b32.xlu0 %v2275_v35, %s3888_s15  ;;  %v1520_v4 = vrot.slane %v1519_v37, 4 }
 0x3ab   :  { %v1521_v47 = vadd.f32 %v1520_v4, %v1519_v37 }
 0x3ac   :  { %1827 = vrot.lane.b32.xlu1 %v4792_v2, %s3890_s16 }
 0x3ad   :  { %2116 = vrot.lane.b32.xlu0 %v4792_v2, %s3895_s30  ;;  %v1522_v49 = vrot.slane %v1521_v47, 2 }
 0x3af   :  { %v1523_v54 = vadd.f32 %v1522_v49, %v1521_v47 }
 0x3b0   :  { %1924 = vrot.lane.b32.xlu1 %v4797_v6, %s3884_s0 }
 0x3b1   :  { %2214 = vrot.lane.b32.xlu0 %v4797_v6, %s3892_s3  ;;  %v1524_v5 = vrot.slane %v1523_v54, 1 }
 0x3b3   :  { %v1525_v55 = vadd.f32 %v1524_v5, %v1523_v54 }
 0x3b4   :  { %2021 = vrot.lane.b32.xlu1 %v1985_v56, %s3888_s15 }
 0x3b5   :  { %2311 = vrot.lane.b32.xlu0 %v1985_v56, %s3893_s13  ;;  %v1528_v57 = vmul.f32 0.015625, %v1525_v55 }
 0x3b7   :  { %v4894_v39 = vsub.f32 %v4718_v19, %v1528_v57  ;;  %v4897_v58 = vsub.f32 %v4708_v15, %v1528_v57  ;;  %v4899_v59 = vsub.f32 %v1456_v31, %v1528_v57  ;;  %v4901_v60 = vsub.f32 %v1461_v30, %v1528_v57 }
 0x3b8   :  { %v4903_v41 = vsub.f32 %v1466_v45, %v1528_v57  ;;  %v4905_v61 = vsub.f32 %v1471_v42, %v1528_v57  ;;  %v4907_v62 = vsub.f32 %v1476_v33, %v1528_v57  ;;  %v4909_v63 = vsub.f32 %v1481_v51, %v1528_v57  ;;  %2118 = vrot.lane.b32.xlu1 %v4799_v8, %s3895_s30 }
 0x3b9   :  { %v1553_v19 = vmul.f32 %v4894_v39, %v4894_v39  ;;  %v1554_v15 = vmul.f32 %v4897_v58, %v4897_v58  ;;  %v1555_v0 = vmul.f32 %v4899_v59, %v4899_v59  ;;  %1732 = vrot.lane.b32.xlu0 %v1985_v56, %s3887_s14  ;;  %v1556_v1 = vmul.f32 %v4901_v60, %v4901_v60 }
 0x3ba   :  { %v1557_v18 = vmul.f32 %v4903_v41, %v4903_v41  ;;  %v1558_v21 = vmul.f32 %v4905_v61, %v4905_v61  ;;  %v1559_v25 = vmul.f32 %v4907_v62, %v4907_v62 }
 0x3bb   :  { %v1582_v2 = vsel %vm78_vm12, %v1553_v19, 0.0  ;;  %v1583_v3 = vsel %vm78_vm12, %v1554_v15, 0.0  ;;  %v1585_v43 = vsel %vm78_vm12, %v1555_v0, 0.0  ;;  %v1587_v22 = vsel %vm78_vm12, %v1556_v1, 0.0 }
 0x3bc   :  { %v1584_v6 = vadd.f32 %v1583_v3, %v1582_v2  ;;  %2216 = vrot.lane.b32.xlu1 %v4807_v10, %s3892_s3  ;;  %v1589_v26 = vsel %vm78_vm12, %v1557_v18, 0.0  ;;  %v1591_v30 = vsel %vm78_vm12, %v1558_v21, 0.0  ;;  %v1593_v32 = vsel %vm78_vm12, %v1559_v25, 0.0 }
 0x3bd   :  { %1829 = vrot.lane.b32.xlu0 %v4799_v8, %s3890_s16  ;;  %v1560_v8 = vmul.f32 %v4909_v63, %v4909_v63 }
 0x3be   :  { %v1586_v20 = vadd.f32 %v1585_v43, %v1584_v6 }
 0x3bf   :  { %v1595_v13 = vsel %vm78_vm12, %v1560_v8, 0.0 }
 0x3c0   :  { %v1588_v44 = vadd.f32 %v1587_v22, %v1586_v20  ;;  %2313 = vrot.lane.b32.xlu1 %v2277_v24, %s3893_s13 }
 0x3c1   :  { %1926 = vrot.lane.b32.xlu0 %v4807_v10, %s3884_s0 }
 0x3c2   :  { %v1590_v27 = vadd.f32 %v1589_v26, %v1588_v44 }
 0x3c4   :  { %v1592_v31 = vadd.f32 %v1591_v30, %v1590_v27  ;;  %1734 = vrot.lane.b32.xlu1 %v2277_v24, %s3887_s14 }
 0x3c5   :  { %2023 = vrot.lane.b32.xlu0 %v2277_v24, %s3888_s15 }
 0x3c6   :  { %v1594_v23 = vadd.f32 %v1593_v32, %v1592_v31 }
 0x3c8   :  { %v1596_v7 = vadd.f32 %v1595_v13, %v1594_v23  ;;  %1831 = vrot.lane.b32.xlu1 %v4809_v12, %s3890_s16  ;;  %v2405_v13 = vld [vmem:[#allocation5 + $0x18] sm:$0xff] }
 0x3c9   :  { %2120 = vrot.lane.b32.xlu0 %v4809_v12, %s3895_s30 }
 0x3ca   :  { %v1597_v10 = vrot.slane %v1596_v7, 4 }
 0x3cc   :  { %v1598_v38 = vadd.f32 %v1597_v10, %v1596_v7  ;;  %1928 = vrot.lane.b32.xlu1 %v4815_v14, %s3884_s0 }
 0x3cd   :  { %2218 = vrot.lane.b32.xlu0 %v4815_v14, %s3892_s3  ;;  %v2279_v14 = vld [vmem:[#allocation4 + $0x81] sm:$0xff] }
 0x3ce   :  { %v1599_v28 = vrot.slane %v1598_v38, 2 }
 0x3d0   :  { %v1600_v42 = vadd.f32 %v1599_v28, %v1598_v38  ;;  %2025 = vrot.lane.b32.xlu1 %v1987_v40, %s3888_s15 }
 0x3d1   :  { %2315 = vrot.lane.b32.xlu0 %v1987_v40, %s3893_s13 }
 0x3d2   :  { %v1601_v45 = vrot.slane %v1600_v42, 1 }
 0x3d4   :  { %v1602_v9 = vadd.f32 %v1601_v45, %v1600_v42  ;;  %2122 = vrot.lane.b32.xlu1 %v4817_v16, %s3895_s30 }
 0x3d5   :  { %1736 = vrot.lane.b32.xlu0 %v1987_v40, %s3887_s14 }
 0x3d6   :  { %v1604_v12 = vmul.f32 0.015625, %v1602_v9 }
 0x3d8   :  { %v1606_v46 = vadd.f32 1e-05, %v1604_v12  ;;  %2220 = vrot.lane.b32.xlu1 %v2182_v11, %s3892_s3 }
 0x3d9   :  { %1833 = vrot.lane.b32.xlu0 %v4817_v16, %s3890_s16 }
 0x3da   :  { %3852 = vrsqrt.f32 %v1606_v46  ;;  %v2407_v46 = vld [vmem:[#allocation5 + $0x28] sm:$0xff] }
 0x3dc   :  { %2317 = vrot.lane.b32.xlu1 %v2279_v14, %s3893_s13 }
 0x3dd   :  { %1930 = vrot.lane.b32.xlu0 %v2182_v11, %s3884_s0 }
 0x3e1   :  { %2027 = vrot.lane.b32.xlu0 %v2279_v14, %s3888_s15 }
 0x3e4   :  { %v3853_v51 = vpop.eup %3852 }
 0x3e5   :  { %v1617_v33 = vmul.f32 %v3853_v51, %v4894_v39  ;;  %v1618_v34 = vmul.f32 %v3853_v51, %v4897_v58  ;;  %v1619_v16 = vmul.f32 %v3853_v51, %v4899_v59  ;;  %v1620_v35 = vmul.f32 %v3853_v51, %v4901_v60  ;;  %2124 = vrot.lane.b32.xlu0 %v4824_v17, %s3895_s30  ;;  %v4979_v39 = vpop.permute.xlu0 %2319 }
 0x3e6   :  { %v1621_v36 = vmul.f32 %v3853_v51, %v4903_v41  ;;  %v1622_v52 = vmul.f32 %v3853_v51, %v4905_v61  ;;  %v1623_v53 = vmul.f32 %v3853_v51, %v4907_v62  ;;  %v1624_v37 = vmul.f32 %v3853_v51, %v4909_v63 }
 0x3e7   :  { %v1633_v4 = vmax.f32 %v1617_v33, 0.0  ;;  %v1634_v47 = vmax.f32 %v1618_v34, 0.0  ;;  %v1635_v49 = vmax.f32 %v1619_v16, 0.0  ;;  %v1636_v54 = vmax.f32 %v1620_v35, 0.0 }
 0x3e8   :  { %v1637_v5 = vmax.f32 %v1621_v36, 0.0  ;;  %v1638_v55 = vmax.f32 %v1622_v52, 0.0  ;;  %v1639_v56 = vmax.f32 %v1623_v53, 0.0  ;;  %v1640_v57 = vmax.f32 %v1624_v37, 0.0  ;;  %v2409_v52 = vld [vmem:[#allocation5 + $0x38] sm:$0xff] }
 0x3e9   :  { %1650 = vst.msk [vmem:[#allocation4 + $0xb1] sm:$0xff] %vm78_vm12, %v1633_v4  ;;  %1651 = vst.msk [vmem:[#allocation4 + $0xc1] sm:$0xff] %vm78_vm12, %v1634_v47 }
 0x3ea   :  { %1652 = vst.msk [vmem:[#allocation4 + $0xd1] sm:$0xff] %vm78_vm12, %v1635_v49  ;;  %1653 = vst.msk [vmem:[#allocation4 + $0xe1] sm:$0xff] %vm78_vm12, %v1636_v54 }
 0x3eb   :  { %1654 = vst.msk [vmem:[#allocation4 + $0xf1] sm:$0xff] %vm78_vm12, %v1637_v5  ;;  %1655 = vst.msk [vmem:[#allocation4 + $0x101] sm:$0xff] %vm78_vm12, %v1638_v55 }
 0x3ec   :  { %1656 = vst.msk [vmem:[#allocation4 + $0x111] sm:$0xff] %vm78_vm12, %v1639_v56  ;;  %1657 = vst.msk [vmem:[#allocation4 + $0x121] sm:$0xff] %vm78_vm12, %v1640_v57 }
 0x3ee   :  { %v2014_v17 = vpop.permute.xlu1 %2013 }
 0x3ef   :  { %v1917_v58 = vpop.permute.xlu0 %1916 }
 0x3f0   :  { %1965 = vst.msk [vmem:[#allocation5] sm:$0xff] %vm1964_vm1, %v1917_v58  ;;  %v1892_v59 = vld [vmem:[#allocation4 + $0xb0] sm:$0xff]  ;;  %v1893_v41 = vld [vmem:[#allocation4 + $0xc0] sm:$0xff] }
 0x3f1   :  { %v1699_v60 = vld [vmem:[#allocation4 + $0xb1] sm:$0xff]  ;;  %2062 = vst.msk [vmem:[#allocation5] sm:$0xff] %vm2061_vm3, %v2014_v17  ;;  %1932 = vrot.lane.b32.xlu1 %v1892_v59, %s3884_s0  ;;  %v4993_v61 = vld [vmem:[#allocation4 + $0xc2] sm:$0xff] }
 0x3f2   :  { %1740 = vrot.lane.b32.xlu0 %v1699_v60, %s3887_s14  ;;  %1683 = vst.msk [vmem:[#allocation5 + $0x90] sm:$0xff] %vm78_vm12, %v1892_v59  ;;  %v2111_v62 = vpop.permute.xlu1 %2110  ;;  %v4996_v19 = vld [vmem:[#allocation4 + $0xd0] sm:$0xff]  ;;  %2394 = vst.msk [vmem:[#allocation5 + $0x88] sm:$0xff] %vm78_vm12, %v4993_v61  ;;  %v5005_v0 = vld [vmem:[#allocation4 + $0xe0] sm:$0xff] }
 0x3f3   :  { %v1725_v63 = vpop.permute.xlu0 %1724  ;;  %v4998_v15 = vld [vmem:[#allocation4 + $0xd2] sm:$0xff]  ;;  %1684 = vst.msk [vmem:[#allocation5 + $0xa0] sm:$0xff] %vm78_vm12, %v1893_v41  ;;  %v5007_v1 = vld [vmem:[#allocation4 + $0xe2] sm:$0xff]  ;;  %1685 = vst.msk [vmem:[#allocation5 + $0xb0] sm:$0xff] %vm78_vm12, %v4996_v19 }
 0x3f4   :  { %2159 = vst.msk [vmem:[#allocation5] sm:$0xff] %vm2158_vm4, %v2111_v62  ;;  %v1796_v2 = vld [vmem:[#allocation4 + $0xb2] sm:$0xff]  ;;  %v5023_v18 = vld [vmem:[#allocation4 + $0x100] sm:$0xff]  ;;  %v2411_v17 = vld [vmem:[#allocation5 + $0x48] sm:$0xff] }
 0x3f5   :  { %1772 = vst.msk [vmem:[#allocation5 + $0x10] sm:$0xff] %vm1770_vm14, %v1725_v63  ;;  %v5013_v3 = vld [vmem:[#allocation4 + $0xf0] sm:$0xff]  ;;  %2029 = vrot.lane.b32.xlu1 %v1699_v60, %s3888_s15  ;;  %v5025_v43 = vld [vmem:[#allocation4 + $0x102] sm:$0xff] }
 0x3f6   :  { %2395 = vst.msk [vmem:[#allocation5 + $0x98] sm:$0xff] %vm78_vm12, %v4998_v15  ;;  %v5015_v6 = vld [vmem:[#allocation4 + $0xf2] sm:$0xff]  ;;  %2396 = vst.msk [vmem:[#allocation5 + $0xa8] sm:$0xff] %vm78_vm12, %v5007_v1  ;;  %1837 = vrot.lane.b32.xlu0 %v1796_v2, %s3890_s16  ;;  %v2209_v20 = vpop.permute.xlu1 %2208  ;;  %v5041_v44 = vld [vmem:[#allocation4 + $0x122] sm:$0xff] }
 0x3f7   :  { %1686 = vst.msk [vmem:[#allocation5 + $0xc0] sm:$0xff] %vm78_vm12, %v5005_v0  ;;  %2397 = vst.msk [vmem:[#allocation5 + $0xb8] sm:$0xff] %vm78_vm12, %v5015_v6  ;;  %v1822_v21 = vpop.permute.xlu0 %1821  ;;  %v5031_v22 = vld [vmem:[#allocation4 + $0x110] sm:$0xff]  ;;  %v1990_v27 = vld [vmem:[#allocation4 + $0xc1] sm:$0xff] }
 0x3f8   :  { %1687 = vst.msk [vmem:[#allocation5 + $0xd0] sm:$0xff] %vm78_vm12, %v5013_v3  ;;  %v5033_v24 = vld [vmem:[#allocation4 + $0x112] sm:$0xff]  ;;  %2398 = vst.msk [vmem:[#allocation5 + $0xc8] sm:$0xff] %vm78_vm12, %v5025_v43  ;;  %v1992_v51 = vld [vmem:[#allocation4 + $0xe1] sm:$0xff] }
 0x3f9   :  { %1688 = vst.msk [vmem:[#allocation5 + $0xe0] sm:$0xff] %vm78_vm12, %v5023_v18  ;;  %2399 = vst.msk [vmem:[#allocation5 + $0xd8] sm:$0xff] %vm78_vm12, %v5033_v24  ;;  %2126 = vrot.lane.b32.xlu1 %v1796_v2, %s3895_s30  ;;  %v2282_v38 = vld [vmem:[#allocation4 + $0xd1] sm:$0xff]  ;;  %v1994_v60 = vld [vmem:[#allocation4 + $0x101] sm:$0xff] }
 0x3fa   :  { %2257 = vst.msk [vmem:[#allocation5] sm:$0xff] %vm2256_vm5, %v2209_v20  ;;  %1934 = vrot.lane.b32.xlu0 %v1893_v41, %s3884_s0  ;;  %v2306_v25 = vpop.permute.xlu1 %2305  ;;  %v2284_v4 = vld [vmem:[#allocation4 + $0xf1] sm:$0xff] }
 0x3fb   :  { %1869 = vst.msk [vmem:[#allocation5 + $0x10] sm:$0xff] %vm1867_vm15, %v1822_v21  ;;  %v1919_v26 = vpop.permute.xlu0 %1918  ;;  %v2286_v2 = vld [vmem:[#allocation4 + $0x111] sm:$0xff] }
 0x3fc   :  { %1689 = vst.msk [vmem:[#allocation5 + $0xf0] sm:$0xff] %vm78_vm12, %v5031_v22  ;;  %2400 = vst.msk [vmem:[#allocation5 + $0xe8] sm:$0xff] %vm78_vm12, %v5041_v44 }
 0x3fd   :  { %2354 = vst.msk [vmem:[#allocation5] sm:$0xff] %vm2353_vm2, %v2306_v25  ;;  %2224 = vrot.lane.b32.xlu1 %v1893_v41, %s3892_s3 }
 0x3fe   :  { %1966 = vst.msk [vmem:[#allocation5 + $0x10] sm:$0xff] %vm1964_vm1, %v1919_v26  ;;  %2031 = vrot.lane.b32.xlu0 %v1990_v27, %s3888_s15  ;;  %v1727_v8 = vpop.permute.xlu1 %1726  ;;  %v1899_v26 = vld [vmem:[#allocation4 + $0x120] sm:$0xff] }
 0x3ff   :  { %v2016_v30 = vpop.permute.xlu0 %2015  ;;  %1773 = vst.msk [vmem:[#allocation5 + $0x20] sm:$0xff] %vm1770_vm14, %v1727_v8 }
 0x400   :  { %2063 = vst.msk [vmem:[#allocation5 + $0x10] sm:$0xff] %vm2061_vm3, %v2016_v30  ;;  %v1996_v30 = vld [vmem:[#allocation4 + $0x121] sm:$0xff] }
 0x401   :  { %2321 = vrot.lane.b32.xlu1 %v1990_v27, %s3893_s13 }
 0x402   :  { %2128 = vrot.lane.b32.xlu0 %v4993_v61, %s3895_s30  ;;  %v1824_v31 = vpop.permute.xlu1 %1823 }
 0x403   :  { %v2113_v32 = vpop.permute.xlu0 %2112  ;;  %1870 = vst.msk [vmem:[#allocation5 + $0x20] sm:$0xff] %vm1867_vm15, %v1824_v31 }
 0x404   :  { %v2402_v23 = vld [vmem:[#allocation5] sm:$0xff]  ;;  %2160 = vst.msk [vmem:[#allocation5 + $0x10] sm:$0xff] %vm2158_vm4, %v2113_v32  ;;  %v2191_v32 = vld [vmem:[#allocation4 + $0x130] sm:$0xff] }
 0x405   :  { %2572 = vmatmul.mubr.f32.vlgmr.msra.gmra.mrb[0].mxu0 %v2402_v23  ;;  %1742 = vrot.lane.b32.xlu1 %v1990_v27, %s3887_s14  ;;  %v2385_v23 = vld [vmem:[#allocation4 + $0x132] sm:$0xff] }
 0x406   :  { %3514 = vmatprep.mubr.msk.f32.mxu0 %vm78_vm12, %v2405_v13  ;;  %2226 = vrot.lane.b32.xlu0 %v4996_v19, %s3892_s3  ;;  %v1921_v7 = vpop.permute.xlu1 %1920  ;;  %2401 = vst.msk [vmem:[#allocation5 + $0xf8] sm:$0xff] %vm78_vm12, %v2385_v23  ;;  %v2431_v23 = vld [vmem:[#allocation5 + $0xe8] sm:$0xff] }
 0x407   :  { %v2211_v10 = vpop.permute.xlu0 %2210  ;;  %1967 = vst.msk [vmem:[#allocation5 + $0x20] sm:$0xff] %vm1964_vm1, %v1921_v7 }
 0x408   :  { %2258 = vst.msk [vmem:[#allocation5 + $0x10] sm:$0xff] %vm2256_vm5, %v2211_v10  ;;  %v2288_v10 = vld [vmem:[#allocation4 + $0x131] sm:$0xff] }
 0x409   :  { %1839 = vrot.lane.b32.xlu1 %v4993_v61, %s3890_s16 }
 0x40a   :  { %2323 = vrot.lane.b32.xlu0 %v2282_v38, %s3893_s13  ;;  %v2018_v28 = vpop.permute.xlu1 %2017 }
 0x40b   :  { %v2308_v40 = vpop.permute.xlu0 %2307  ;;  %2064 = vst.msk [vmem:[#allocation5 + $0x20] sm:$0xff] %vm2061_vm3, %v2018_v28  ;;  %v2419_v28 = vld [vmem:[#allocation5 + $0x88] sm:$0xff] }
 0x40c   :  { %2355 = vst.msk [vmem:[#allocation5 + $0x10] sm:$0xff] %vm2353_vm2, %v2308_v40 }
 0x40d   :  { %1936 = vrot.lane.b32.xlu1 %v4996_v19, %s3884_s0 }
 0x40e   :  { %1744 = vrot.lane.b32.xlu0 %v2282_v38, %s3887_s14  ;;  %v2115_v42 = vpop.permute.xlu1 %2114 }
 0x40f   :  { %v1729_v45 = vpop.permute.xlu0 %1728  ;;  %2161 = vst.msk [vmem:[#allocation5 + $0x20] sm:$0xff] %vm2158_vm4, %v2115_v42 }
 0x410   :  { %1774 = vst.msk [vmem:[#allocation5 + $0x30] sm:$0xff] %vm1770_vm14, %v1729_v45 }
 0x411   :  { %2033 = vrot.lane.b32.xlu1 %v2282_v38, %s3888_s15 }
 0x412   :  { %1841 = vrot.lane.b32.xlu0 %v4998_v15, %s3890_s16  ;;  %v2213_v9 = vpop.permute.xlu1 %2212 }
 0x413   :  { %v1826_v12 = vpop.permute.xlu0 %1825  ;;  %v2404_v11 = vld [vmem:[#allocation5 + $0x10] sm:$0xff]  ;;  %2259 = vst.msk [vmem:[#allocation5 + $0x20] sm:$0xff] %vm2256_vm5, %v2213_v9 }
 0x414   :  { %1871 = vst.msk [vmem:[#allocation5 + $0x30] sm:$0xff] %vm1867_vm15, %v1826_v12  ;;  %2577 = vmatmul.mubr.f32.gmra.mrb[2].mxu0 %v2404_v11 }
 0x415   :  { %3515 = vmatprep.mubr.msk.f32.mxu0 %vm78_vm12, %v2407_v46  ;;  %2130 = vrot.lane.b32.xlu1 %v4998_v15, %s3895_s30  ;;  %v2413_v15 = vld [vmem:[#allocation5 + $0x58] sm:$0xff] }
 0x416   :  { %1938 = vrot.lane.b32.xlu0 %v5005_v0, %s3884_s0  ;;  %v2310_v14 = vpop.permute.xlu1 %2309 }
 0x417   :  { %v1923_v48 = vpop.permute.xlu0 %1922  ;;  %2356 = vst.msk [vmem:[#allocation5 + $0x20] sm:$0xff] %vm2353_vm2, %v2310_v14 }
 0x418   :  { %1968 = vst.msk [vmem:[#allocation5 + $0x30] sm:$0xff] %vm1964_vm1, %v1923_v48 }
 0x419   :  { %2228 = vrot.lane.b32.xlu1 %v5005_v0, %s3892_s3 }
 0x41a   :  { %2035 = vrot.lane.b32.xlu0 %v1992_v51, %s3888_s15  ;;  %v1731_v33 = vpop.permute.xlu1 %1730 }
 0x41b   :  { %v2020_v34 = vpop.permute.xlu0 %2019  ;;  %1775 = vst.msk [vmem:[#allocation5 + $0x40] sm:$0xff] %vm1770_vm14, %v1731_v33 }
 0x41c   :  { %2065 = vst.msk [vmem:[#allocation5 + $0x30] sm:$0xff] %vm2061_vm3, %v2020_v34 }
 0x41d   :  { %2325 = vrot.lane.b32.xlu1 %v1992_v51, %s3893_s13 }
 0x41e   :  { %2132 = vrot.lane.b32.xlu0 %v5007_v1, %s3895_s30  ;;  %v1828_v16 = vpop.permute.xlu1 %1827  ;;  %v2406_v36 = vld [vmem:[#allocation5 + $0x20] sm:$0xff] }
 0x41f   :  { %v2117_v35 = vpop.permute.xlu0 %2116  ;;  %1872 = vst.msk [vmem:[#allocation5 + $0x40] sm:$0xff] %vm1867_vm15, %v1828_v16  ;;  %2582 = vmatmul.mubr.f32.gmra.mrb[4].mxu0 %v2406_v36  ;;  %v2421_v16 = vld [vmem:[#allocation5 + $0x98] sm:$0xff] }
 0x420   :  { %2162 = vst.msk [vmem:[#allocation5 + $0x30] sm:$0xff] %vm2158_vm4, %v2117_v35  ;;  %3516 = vmatprep.mubr.msk.f32.mxu0 %vm78_vm12, %v2409_v52 }
 0x421   :  { %1746 = vrot.lane.b32.xlu1 %v1992_v51, %s3887_s14 }
 0x422   :  { %2230 = vrot.lane.b32.xlu0 %v5013_v3, %s3892_s3  ;;  %v1925_v53 = vpop.permute.xlu1 %1924 }
 0x423   :  { %v2215_v37 = vpop.permute.xlu0 %2214  ;;  %1969 = vst.msk [vmem:[#allocation5 + $0x40] sm:$0xff] %vm1964_vm1, %v1925_v53 }
 0x424   :  { %2260 = vst.msk [vmem:[#allocation5 + $0x30] sm:$0xff] %vm2256_vm5, %v2215_v37 }
 0x425   :  { %1843 = vrot.lane.b32.xlu1 %v5007_v1, %s3890_s16 }
 0x426   :  { %2327 = vrot.lane.b32.xlu0 %v2284_v4, %s3893_s13  ;;  %v2022_v47 = vpop.permute.xlu1 %2021 }
 0x427   :  { %v2312_v49 = vpop.permute.xlu0 %2311  ;;  %2066 = vst.msk [vmem:[#allocation5 + $0x40] sm:$0xff] %vm2061_vm3, %v2022_v47 }
 0x428   :  { %2357 = vst.msk [vmem:[#allocation5 + $0x30] sm:$0xff] %vm2353_vm2, %v2312_v49 }
 0x429   :  { %1940 = vrot.lane.b32.xlu1 %v5013_v3, %s3884_s0 }
 0x42a   :  { %1748 = vrot.lane.b32.xlu0 %v2284_v4, %s3887_s14  ;;  %v2119_v54 = vpop.permute.xlu1 %2118 }
 0x42b   :  { %2163 = vst.msk [vmem:[#allocation5 + $0x40] sm:$0xff] %vm2158_vm4, %v2119_v54  ;;  %v1733_v5 = vpop.permute.xlu0 %1732 }
 0x42c   :  { %1776 = vst.msk [vmem:[#allocation5 + $0x50] sm:$0xff] %vm1770_vm14, %v1733_v5 }
 0x42d   :  { %2037 = vrot.lane.b32.xlu1 %v2284_v4, %s3888_s15  ;;  %v2423_v4 = vld [vmem:[#allocation5 + $0xa8] sm:$0xff] }
 0x42e   :  { %1845 = vrot.lane.b32.xlu0 %v5015_v6, %s3890_s16  ;;  %v2217_v55 = vpop.permute.xlu1 %2216 }
 0x42f   :  { %v2408_v56 = vld [vmem:[#allocation5 + $0x30] sm:$0xff]  ;;  %2261 = vst.msk [vmem:[#allocation5 + $0x40] sm:$0xff] %vm2256_vm5, %v2217_v55  ;;  %v1830_v57 = vpop.permute.xlu0 %1829 }
 0x430   :  { %2587 = vmatmul.mubr.f32.gmra.mrb[6].mxu0 %v2408_v56  ;;  %1873 = vst.msk [vmem:[#allocation5 + $0x50] sm:$0xff] %vm1867_vm15, %v1830_v57 }
 0x431   :  { %3517 = vmatprep.mubr.msk.f32.mxu0 %vm78_vm12, %v2411_v17  ;;  %2134 = vrot.lane.b32.xlu1 %v5015_v6, %s3895_s30 }
 0x432   :  { %1942 = vrot.lane.b32.xlu0 %v5023_v18, %s3884_s0  ;;  %v2314_v58 = vpop.permute.xlu1 %2313 }
 0x433   :  { %2358 = vst.msk [vmem:[#allocation5 + $0x40] sm:$0xff] %vm2353_vm2, %v2314_v58  ;;  %v1927_v59 = vpop.permute.xlu0 %1926 }
 0x434   :  { %1970 = vst.msk [vmem:[#allocation5 + $0x50] sm:$0xff] %vm1964_vm1, %v1927_v59 }
 0x435   :  { %2232 = vrot.lane.b32.xlu1 %v5023_v18, %s3892_s3 }
 0x436   :  { %2039 = vrot.lane.b32.xlu0 %v1994_v60, %s3888_s15  ;;  %v1735_v41 = vpop.permute.xlu1 %1734 }
 0x437   :  { %1777 = vst.msk [vmem:[#allocation5 + $0x60] sm:$0xff] %vm1770_vm14, %v1735_v41  ;;  %v2024_v61 = vpop.permute.xlu0 %2023  ;;  %v2425_v41 = vld [vmem:[#allocation5 + $0xb8] sm:$0xff] }
 0x438   :  { %2067 = vst.msk [vmem:[#allocation5 + $0x50] sm:$0xff] %vm2061_vm3, %v2024_v61 }
 0x439   :  { %2329 = vrot.lane.b32.xlu1 %v1994_v60, %s3893_s13 }
 0x43a   :  { %2136 = vrot.lane.b32.xlu0 %v5025_v43, %s3895_s30  ;;  %v1832_v62 = vpop.permute.xlu1 %1831  ;;  %v2410_v63 = vld [vmem:[#allocation5 + $0x40] sm:$0xff] }
 0x43b   :  { %1874 = vst.msk [vmem:[#allocation5 + $0x60] sm:$0xff] %vm1867_vm15, %v1832_v62  ;;  %v2121_v19 = vpop.permute.xlu0 %2120  ;;  %2592 = vmatmul.mubr.f32.gmra.mrb[8].mxu0 %v2410_v63 }
 0x43c   :  { %2164 = vst.msk [vmem:[#allocation5 + $0x50] sm:$0xff] %vm2158_vm4, %v2121_v19  ;;  %3518 = vmatprep.mubr.msk.f32.mxu0 %vm78_vm12, %v2413_v15 }
 0x43d   :  { %1750 = vrot.lane.b32.xlu1 %v1994_v60, %s3887_s14 }
 0x43e   :  { %2234 = vrot.lane.b32.xlu0 %v5031_v22, %s3892_s3  ;;  %v1929_v0 = vpop.permute.xlu1 %1928 }
 0x43f   :  { %1971 = vst.msk [vmem:[#allocation5 + $0x60] sm:$0xff] %vm1964_vm1, %v1929_v0  ;;  %v2219_v1 = vpop.permute.xlu0 %2218  ;;  %v2427_v0 = vld [vmem:[#allocation5 + $0xc8] sm:$0xff] }
 0x440   :  { %2262 = vst.msk [vmem:[#allocation5 + $0x50] sm:$0xff] %vm2256_vm5, %v2219_v1 }
 0x441   :  { %1847 = vrot.lane.b32.xlu1 %v5025_v43, %s3890_s16 }
 0x442   :  { %2331 = vrot.lane.b32.xlu0 %v2286_v2, %s3893_s13  ;;  %v2026_v3 = vpop.permute.xlu1 %2025 }
 0x443   :  { %2068 = vst.msk [vmem:[#allocation5 + $0x60] sm:$0xff] %vm2061_vm3, %v2026_v3  ;;  %v2316_v6 = vpop.permute.xlu0 %2315 }
 0x444   :  { %2359 = vst.msk [vmem:[#allocation5 + $0x50] sm:$0xff] %vm2353_vm2, %v2316_v6 }
 0x445   :  { %1944 = vrot.lane.b32.xlu1 %v5031_v22, %s3884_s0  ;;  %v2415_v22 = vld [vmem:[#allocation5 + $0x68] sm:$0xff] }
 0x446   :  { %1752 = vrot.lane.b32.xlu0 %v2286_v2, %s3887_s14  ;;  %v2123_v18 = vpop.permute.xlu1 %2122 }
 0x447   :  { %2165 = vst.msk [vmem:[#allocation5 + $0x60] sm:$0xff] %vm2158_vm4, %v2123_v18  ;;  %v1737_v20 = vpop.permute.xlu0 %1736 }
 0x448   :  { %1778 = vst.msk [vmem:[#allocation5 + $0x70] sm:$0xff] %vm1770_vm14, %v1737_v20 }
 0x449   :  { %2041 = vrot.lane.b32.xlu1 %v2286_v2, %s3888_s15 }
 0x44a   :  { %1849 = vrot.lane.b32.xlu0 %v5033_v24, %s3890_s16  ;;  %v2221_v43 = vpop.permute.xlu1 %2220 }
 0x44b   :  { %2263 = vst.msk [vmem:[#allocation5 + $0x60] sm:$0xff] %vm2256_vm5, %v2221_v43  ;;  %v1834_v21 = vpop.permute.xlu0 %1833  ;;  %v2412_v25 = vld [vmem:[#allocation5 + $0x50] sm:$0xff] }
 0x44c   :  { %1875 = vst.msk [vmem:[#allocation5 + $0x70] sm:$0xff] %vm1867_vm15, %v1834_v21  ;;  %2597 = vmatmul.mubr.f32.gmra.mrb[10].mxu0 %v2412_v25 }
 0x44d   :  { %3519 = vmatprep.mubr.msk.f32.mxu0 %vm78_vm12, %v2415_v22  ;;  %2138 = vrot.lane.b32.xlu1 %v5033_v24, %s3895_s30  ;;  %v2417_v24 = vld [vmem:[#allocation5 + $0x78] sm:$0xff] }
 0x44e   :  { %1946 = vrot.lane.b32.xlu0 %v1899_v26, %s3884_s0  ;;  %v2318_v27 = vpop.permute.xlu1 %2317 }
 0x44f   :  { %2360 = vst.msk [vmem:[#allocation5 + $0x60] sm:$0xff] %vm2353_vm2, %v2318_v27  ;;  %v1931_v8 = vpop.permute.xlu0 %1930  ;;  %v2429_v27 = vld [vmem:[#allocation5 + $0xd8] sm:$0xff] }
 0x450   :  { %1972 = vst.msk [vmem:[#allocation5 + $0x70] sm:$0xff] %vm1964_vm1, %v1931_v8 }
 0x451   :  { %2236 = vrot.lane.b32.xlu1 %v1899_v26, %s3892_s3 }
 0x452   :  { %2043 = vrot.lane.b32.xlu0 %v1996_v30, %s3888_s15 }
 0x453   :  { %v2028_v31 = vpop.permute.xlu0 %2027 }
 0x454   :  { %2069 = vst.msk [vmem:[#allocation5 + $0x70] sm:$0xff] %vm2061_vm3, %v2028_v31 }
 0x455   :  { %2333 = vrot.lane.b32.xlu1 %v1996_v30, %s3893_s13 }
 0x456   :  { %v2414_v13 = vld [vmem:[#allocation5 + $0x60] sm:$0xff]  ;;  %2238 = vrot.lane.b32.xlu0 %v2191_v32, %s3892_s3 }
 0x457   :  { %v2125_v7 = vpop.permute.xlu0 %2124  ;;  %2602 = vmatmul.mubr.f32.gmra.mrb[12].mxu0 %v2414_v13 }
 0x458   :  { %2166 = vst.msk [vmem:[#allocation5 + $0x70] sm:$0xff] %vm2158_vm4, %v2125_v7  ;;  %3520 = vmatprep.mubr.msk.f32.mxu0 %vm78_vm12, %v2417_v24 }
 0x459   :  { %2264 = vst.msk [vmem:[#allocation5 + $0x70] sm:$0xff] %vm2256_vm5, %v4967_v50  ;;  %2140 = vrot.lane.b32.xlu1 %v5041_v44, %s3895_s30 }
 0x45a   :  { %2361 = vst.msk [vmem:[#allocation5 + $0x70] sm:$0xff] %vm2353_vm2, %v4979_v39 }
 0x45d   :  { %2335 = vrot.lane.b32.xlu1 %v2288_v10, %s3893_s13 }
 0x461   :  { %v2416_v38 = vld [vmem:[#allocation5 + $0x70] sm:$0xff] }
 0x462   :  { %2607 = vmatmul.mubr.f32.gmra.mrb[14].mxu0 %v2416_v38 }
 0x463   :  { %3521 = vmatprep.mubr.msk.f32.mxu0 %vm78_vm12, %v2419_v28  ;;  %v1933_v40 = vpop.permute.xlu1 %1932 }
 0x464   :  { %v1741_v42 = vpop.permute.xlu0 %1740  ;;  %1973 = vst.msk [vmem:[#allocation5 + $0x80] sm:$0xff] %vm1964_vm1, %v1933_v40 }
 0x465   :  { %1780 = vst.msk [vmem:[#allocation5 + $0x90] sm:$0xff] %vm1770_vm14, %v1741_v42 }
 0x467   :  { %v2030_v50 = vpop.permute.xlu1 %2029 }
 0x468   :  { %v1838_v45 = vpop.permute.xlu0 %1837  ;;  %2070 = vst.msk [vmem:[#allocation5 + $0x80] sm:$0xff] %vm2061_vm3, %v2030_v50  ;;  %v2433_v50 = vld [vmem:[#allocation5 + $0xf8] sm:$0xff] }
 0x469   :  { %1877 = vst.msk [vmem:[#allocation5 + $0x90] sm:$0xff] %vm1867_vm15, %v1838_v45 }
 0x46b   :  { %v2127_v39 = vpop.permute.xlu1 %2126 }
 0x46c   :  { %v1935_v44 = vpop.permute.xlu0 %1934  ;;  %2167 = vst.msk [vmem:[#allocation5 + $0x80] sm:$0xff] %vm2158_vm4, %v2127_v39 }
 0x46d   :  { %1974 = vst.msk [vmem:[#allocation5 + $0x90] sm:$0xff] %vm1964_vm1, %v1935_v44 }
 0x46f   :  { %v2225_v9 = vpop.permute.xlu1 %2224 }
 0x470   :  { %v2032_v12 = vpop.permute.xlu0 %2031  ;;  %2265 = vst.msk [vmem:[#allocation5 + $0x80] sm:$0xff] %vm2256_vm5, %v2225_v9 }
 0x471   :  { %2071 = vst.msk [vmem:[#allocation5 + $0x90] sm:$0xff] %vm2061_vm3, %v2032_v12 }
 0x473   :  { %v2322_v11 = vpop.permute.xlu1 %2321 }
 0x474   :  { %v2129_v46 = vpop.permute.xlu0 %2128  ;;  %2362 = vst.msk [vmem:[#allocation5 + $0x80] sm:$0xff] %vm2353_vm2, %v2322_v11  ;;  %v5245_v11 = vld [vmem:[%s5863_s5] ss:$0 sm:$0xff] }
 0x475   :  { %2168 = vst.msk [vmem:[#allocation5 + $0x90] sm:$0xff] %vm2158_vm4, %v2129_v46 }
 0x477   :  { %v1743_v14 = vpop.permute.xlu1 %1742 }
 0x478   :  { %v2227_v48 = vpop.permute.xlu0 %2226  ;;  %1781 = vst.msk [vmem:[#allocation5 + $0xa0] sm:$0xff] %vm1770_vm14, %v1743_v14 }
 0x479   :  { %2266 = vst.msk [vmem:[#allocation5 + $0x90] sm:$0xff] %vm2256_vm5, %v2227_v48 }
 0x47b   :  { %v1840_v51 = vpop.permute.xlu1 %1839  ;;  %v2418_v34 = vld [vmem:[#allocation5 + $0x80] sm:$0xff] }
 0x47c   :  { %v2324_v33 = vpop.permute.xlu0 %2323  ;;  %1878 = vst.msk [vmem:[#allocation5 + $0xa0] sm:$0xff] %vm1867_vm15, %v1840_v51  ;;  %2612 = vmatmul.mubr.f32.gmra.mrb[16].mxu0 %v2418_v34 }
 0x47d   :  { %2363 = vst.msk [vmem:[#allocation5 + $0x90] sm:$0xff] %vm2353_vm2, %v2324_v33  ;;  %3522 = vmatprep.mubr.msk.f32.mxu0 %vm78_vm12, %v2421_v16 }
 0x47f   :  { %v1937_v35 = vpop.permute.xlu1 %1936 }
 0x480   :  { %v1745_v36 = vpop.permute.xlu0 %1744  ;;  %1975 = vst.msk [vmem:[#allocation5 + $0xa0] sm:$0xff] %vm1964_vm1, %v1937_v35 }
 0x481   :  { %1782 = vst.msk [vmem:[#allocation5 + $0xb0] sm:$0xff] %vm1770_vm14, %v1745_v36 }
 0x483   :  { %v2034_v52 = vpop.permute.xlu1 %2033 }
 0x484   :  { %v1842_v53 = vpop.permute.xlu0 %1841  ;;  %v2420_v37 = vld [vmem:[#allocation5 + $0x90] sm:$0xff]  ;;  %2072 = vst.msk [vmem:[#allocation5 + $0xa0] sm:$0xff] %vm2061_vm3, %v2034_v52 }
 0x485   :  { %1879 = vst.msk [vmem:[#allocation5 + $0xb0] sm:$0xff] %vm1867_vm15, %v1842_v53  ;;  %2617 = vmatmul.mubr.f32.gmra.mrb[18].mxu0 %v2420_v37 }
 0x486   :  { %3523 = vmatprep.mubr.msk.f32.mxu0 %vm78_vm12, %v2423_v4 }
 0x487   :  { %v2131_v47 = vpop.permute.xlu1 %2130 }
 0x488   :  { %v1939_v49 = vpop.permute.xlu0 %1938  ;;  %2169 = vst.msk [vmem:[#allocation5 + $0xa0] sm:$0xff] %vm2158_vm4, %v2131_v47 }
 0x489   :  { %1976 = vst.msk [vmem:[#allocation5 + $0xb0] sm:$0xff] %vm1964_vm1, %v1939_v49 }
 0x48b   :  { %v2229_v54 = vpop.permute.xlu1 %2228 }
 0x48c   :  { %v2036_v5 = vpop.permute.xlu0 %2035  ;;  %2267 = vst.msk [vmem:[#allocation5 + $0xa0] sm:$0xff] %vm2256_vm5, %v2229_v54 }
 0x48d   :  { %2073 = vst.msk [vmem:[#allocation5 + $0xb0] sm:$0xff] %vm2061_vm3, %v2036_v5 }
 0x48f   :  { %v2326_v55 = vpop.permute.xlu1 %2325 }
 0x490   :  { %v2133_v56 = vpop.permute.xlu0 %2132  ;;  %2364 = vst.msk [vmem:[#allocation5 + $0xa0] sm:$0xff] %vm2353_vm2, %v2326_v55 }
 0x491   :  { %2170 = vst.msk [vmem:[#allocation5 + $0xb0] sm:$0xff] %vm2158_vm4, %v2133_v56 }
 0x493   :  { %v1747_v57 = vpop.permute.xlu1 %1746 }
 0x494   :  { %v2231_v17 = vpop.permute.xlu0 %2230  ;;  %1783 = vst.msk [vmem:[#allocation5 + $0xc0] sm:$0xff] %vm1770_vm14, %v1747_v57 }
 0x495   :  { %2268 = vst.msk [vmem:[#allocation5 + $0xb0] sm:$0xff] %vm2256_vm5, %v2231_v17 }
 0x497   :  { %v1844_v58 = vpop.permute.xlu1 %1843  ;;  %v2422_v60 = vld [vmem:[#allocation5 + $0xa0] sm:$0xff] }
 0x498   :  { %v2328_v59 = vpop.permute.xlu0 %2327  ;;  %1880 = vst.msk [vmem:[#allocation5 + $0xc0] sm:$0xff] %vm1867_vm15, %v1844_v58  ;;  %2622 = vmatmul.mubr.f32.gmra.mrb[20].mxu0 %v2422_v60 }
 0x499   :  { %2365 = vst.msk [vmem:[#allocation5 + $0xb0] sm:$0xff] %vm2353_vm2, %v2328_v59  ;;  %3524 = vmatprep.mubr.msk.f32.mxu0 %vm78_vm12, %v2425_v41 }
 0x49b   :  { %v1941_v61 = vpop.permute.xlu1 %1940 }
 0x49c   :  { %v1749_v62 = vpop.permute.xlu0 %1748  ;;  %1977 = vst.msk [vmem:[#allocation5 + $0xc0] sm:$0xff] %vm1964_vm1, %v1941_v61 }
 0x49d   :  { %1784 = vst.msk [vmem:[#allocation5 + $0xd0] sm:$0xff] %vm1770_vm14, %v1749_v62 }
 0x49f   :  { %v2038_v63 = vpop.permute.xlu1 %2037 }
 0x4a0   :  { %v1846_v19 = vpop.permute.xlu0 %1845  ;;  %v2424_v15 = vld [vmem:[#allocation5 + $0xb0] sm:$0xff]  ;;  %2074 = vst.msk [vmem:[#allocation5 + $0xc0] sm:$0xff] %vm2061_vm3, %v2038_v63 }
 0x4a1   :  { %1881 = vst.msk [vmem:[#allocation5 + $0xd0] sm:$0xff] %vm1867_vm15, %v1846_v19  ;;  %2627 = vmatmul.mubr.f32.gmra.mrb[22].mxu0 %v2424_v15 }
 0x4a2   :  { %3525 = vmatprep.mubr.msk.f32.mxu0 %vm78_vm12, %v2427_v0 }
 0x4a3   :  { %v2135_v1 = vpop.permute.xlu1 %2134 }
 0x4a4   :  { %v1943_v2 = vpop.permute.xlu0 %1942  ;;  %2171 = vst.msk [vmem:[#allocation5 + $0xc0] sm:$0xff] %vm2158_vm4, %v2135_v1 }
 0x4a5   :  { %1978 = vst.msk [vmem:[#allocation5 + $0xd0] sm:$0xff] %vm1964_vm1, %v1943_v2 }
 0x4a7   :  { %v2233_v3 = vpop.permute.xlu1 %2232 }
 0x4a8   :  { %v2040_v6 = vpop.permute.xlu0 %2039  ;;  %2269 = vst.msk [vmem:[#allocation5 + $0xc0] sm:$0xff] %vm2256_vm5, %v2233_v3 }
 0x4a9   :  { %2075 = vst.msk [vmem:[#allocation5 + $0xd0] sm:$0xff] %vm2061_vm3, %v2040_v6 }
 0x4ab   :  { %v2330_v18 = vpop.permute.xlu1 %2329 }
 0x4ac   :  { %v2137_v20 = vpop.permute.xlu0 %2136  ;;  %2366 = vst.msk [vmem:[#allocation5 + $0xc0] sm:$0xff] %vm2353_vm2, %v2330_v18 }
 0x4ad   :  { %2172 = vst.msk [vmem:[#allocation5 + $0xd0] sm:$0xff] %vm2158_vm4, %v2137_v20 }
 0x4af   :  { %v1751_v43 = vpop.permute.xlu1 %1750 }
 0x4b0   :  { %v2235_v21 = vpop.permute.xlu0 %2234  ;;  %1785 = vst.msk [vmem:[#allocation5 + $0xe0] sm:$0xff] %vm1770_vm14, %v1751_v43 }
 0x4b1   :  { %2270 = vst.msk [vmem:[#allocation5 + $0xd0] sm:$0xff] %vm2256_vm5, %v2235_v21 }
 0x4b3   :  { %v1848_v25 = vpop.permute.xlu1 %1847  ;;  %v2426_v26 = vld [vmem:[#allocation5 + $0xc0] sm:$0xff] }
 0x4b4   :  { %v2332_v22 = vpop.permute.xlu0 %2331  ;;  %1882 = vst.msk [vmem:[#allocation5 + $0xe0] sm:$0xff] %vm1867_vm15, %v1848_v25  ;;  %2632 = vmatmul.mubr.f32.gmra.mrb[24].mxu0 %v2426_v26 }
 0x4b5   :  { %2367 = vst.msk [vmem:[#allocation5 + $0xd0] sm:$0xff] %vm2353_vm2, %v2332_v22  ;;  %3526 = vmatprep.mubr.msk.f32.mxu0 %vm78_vm12, %v2429_v27 }
 0x4b7   :  { %v1945_v8 = vpop.permute.xlu1 %1944 }
 0x4b8   :  { %v1753_v30 = vpop.permute.xlu0 %1752  ;;  %1979 = vst.msk [vmem:[#allocation5 + $0xe0] sm:$0xff] %vm1964_vm1, %v1945_v8 }
 0x4b9   :  { %1786 = vst.msk [vmem:[#allocation5 + $0xf0] sm:$0xff] %vm1770_vm14, %v1753_v30  ;;  %vm2983_vm14 = vcmask 911104  }
 0x4bb   :  { %v2042_v31 = vpop.permute.xlu1 %2041 }
 0x4bc   :  { %v1850_v32 = vpop.permute.xlu0 %1849  ;;  %v2428_v24 = vld [vmem:[#allocation5 + $0xd0] sm:$0xff]  ;;  %2076 = vst.msk [vmem:[#allocation5 + $0xe0] sm:$0xff] %vm2061_vm3, %v2042_v31 }
 0x4bd   :  { %1883 = vst.msk [vmem:[#allocation5 + $0xf0] sm:$0xff] %vm1867_vm15, %v1850_v32  ;;  %2637 = vmatmul.mubr.f32.gmra.mrb[26].mxu0 %v2428_v24  ;;  %vm2997_vm15 = vcmask 1042304  }
 0x4be   :  { %3527 = vmatprep.mubr.msk.f32.mxu0 %vm78_vm12, %v2431_v23 }
 0x4bf   :  { %v2139_v13 = vpop.permute.xlu1 %2138 }
 0x4c0   :  { %2173 = vst.msk [vmem:[#allocation5 + $0xe0] sm:$0xff] %vm2158_vm4, %v2139_v13  ;;  %v1947_v7 = vpop.permute.xlu0 %1946 }
 0x4c1   :  { %1980 = vst.msk [vmem:[#allocation5 + $0xf0] sm:$0xff] %vm1964_vm1, %v1947_v7  ;;  %vm3447_vm1 = vcmask 9216  }
 0x4c3   :  { %v2237_v10 = vpop.permute.xlu1 %2236 }
 0x4c4   :  { %2271 = vst.msk [vmem:[#allocation5 + $0xe0] sm:$0xff] %vm2256_vm5, %v2237_v10  ;;  %v2044_v38 = vpop.permute.xlu0 %2043 }
 0x4c5   :  { %2077 = vst.msk [vmem:[#allocation5 + $0xf0] sm:$0xff] %vm2061_vm3, %v2044_v38 }
 0x4c7   :  { %v2334_v28 = vpop.permute.xlu1 %2333 }
 0x4c8   :  { %2368 = vst.msk [vmem:[#allocation5 + $0xe0] sm:$0xff] %vm2353_vm2, %v2334_v28  ;;  %v2239_v40 = vpop.permute.xlu0 %2238 }
 0x4cb   :  { %v2141_v42 = vpop.permute.xlu1 %2140 }
 0x4cc   :  { %2174 = vst.msk [vmem:[#allocation5 + $0xf0] sm:$0xff] %vm2158_vm4, %v2141_v42 }
 0x4cd   :  { %2272 = vst.msk [vmem:[#allocation5 + $0xf0] sm:$0xff] %vm2256_vm5, %v2239_v40 }
 0x4cf   :  { %v2336_v45 = vpop.permute.xlu1 %2335  ;;  %v2430_v39 = vld [vmem:[#allocation5 + $0xe0] sm:$0xff] }
 0x4d0   :  { %2369 = vst.msk [vmem:[#allocation5 + $0xf0] sm:$0xff] %vm2353_vm2, %v2336_v45  ;;  %2642 = vmatmul.mubr.f32.gmra.mrb[28].mxu0 %v2430_v39 }
 0x4d1   :  { %3528 = vmatprep.mubr.msk.f32.mxu0 %vm78_vm12, %v2433_v50 }
 0x4d7   :  { %v2432_v12 = vld [vmem:[#allocation5 + $0xf0] sm:$0xff] }
 0x4d8   :  { %v2573_v44 = vpop.f32.mrb[0].mxu0  ;;  %2647 = vmatmul.mubr.f32.gmra.mrb[30].mxu0 %v2432_v12 }
 0x4d9   :  { %v2575_v9 = vpop.f32.mrb[1].mxu0  ;;  %v2574_v46 = vadd.f32 %v5245_v11, %v2573_v44 }
 0x4db   :  { %v2652_v33 = vsel %vm78_vm12, %v2574_v46, 0.0 }
 0x4e7   :  { %v2578_v14 = vpop.f32.mrb[2].mxu0 }
 0x4e8   :  { %v2579_v48 = vadd.f32 %v5245_v11, %v2578_v14  ;;  %v2580_v51 = vpop.f32.mrb[3].mxu0 }
 0x4ea   :  { %v2653_v34 = vsel %vm78_vm12, %v2579_v48, 0.0 }
 0x4eb   :  { %v2654_v16 = vadd.f32 %v2653_v34, %v2652_v33 }
 0x4f2   :  { %v2583_v35 = vpop.f32.mrb[4].mxu0 }
 0x4f3   :  { %v2584_v36 = vadd.f32 %v5245_v11, %v2583_v35  ;;  %v2585_v52 = vpop.f32.mrb[5].mxu0 }
 0x4f5   :  { %v2655_v53 = vsel %vm78_vm12, %v2584_v36, 0.0 }
 0x4f6   :  { %v2656_v37 = vadd.f32 %v2655_v53, %v2654_v16 }
 0x503   :  { %v2588_v4 = vpop.f32.mrb[6].mxu0 }
 0x504   :  { %v2589_v47 = vadd.f32 %v5245_v11, %v2588_v4  ;;  %v2590_v49 = vpop.f32.mrb[7].mxu0 }
 0x506   :  { %v2657_v54 = vsel %vm78_vm12, %v2589_v47, 0.0 }
 0x507   :  { %v2658_v5 = vadd.f32 %v2657_v54, %v2656_v37 }
 0x50e   :  { %v2593_v55 = vpop.f32.mrb[8].mxu0 }
 0x50f   :  { %v2594_v56 = vadd.f32 %v5245_v11, %v2593_v55  ;;  %v2595_v57 = vpop.f32.mrb[9].mxu0 }
 0x511   :  { %v2659_v17 = vsel %vm78_vm12, %v2594_v56, 0.0 }
 0x512   :  { %v2660_v58 = vadd.f32 %v2659_v17, %v2658_v5 }
 0x51f   :  { %v2598_v59 = vpop.f32.mrb[10].mxu0 }
 0x520   :  { %v2599_v60 = vadd.f32 %v5245_v11, %v2598_v59  ;;  %v2600_v41 = vpop.f32.mrb[11].mxu0 }
 0x522   :  { %v2661_v61 = vsel %vm78_vm12, %v2599_v60, 0.0 }
 0x523   :  { %v2662_v62 = vadd.f32 %v2661_v61, %v2660_v58 }
 0x52a   :  { %v2603_v63 = vpop.f32.mrb[12].mxu0 }
 0x52b   :  { %v2604_v19 = vadd.f32 %v5245_v11, %v2603_v63  ;;  %v2605_v15 = vpop.f32.mrb[13].mxu0 }
 0x52d   :  { %v2663_v0 = vsel %vm78_vm12, %v2604_v19, 0.0 }
 0x52e   :  { %v2664_v1 = vadd.f32 %v2663_v0, %v2662_v62 }
 0x535   :  { %v2608_v2 = vpop.f32.mrb[14].mxu0 }
 0x536   :  { %v2609_v3 = vadd.f32 %v5245_v11, %v2608_v2  ;;  %v2610_v6 = vpop.f32.mrb[15].mxu0 }
 0x538   :  { %v2665_v18 = vsel %vm78_vm12, %v2609_v3, 0.0 }
 0x539   :  { %v2666_v20 = vadd.f32 %v2665_v18, %v2664_v1 }
 0x53b   :  { %v2667_v43 = vrot.slane %v2666_v20, 4 }
 0x53d   :  { %v2668_v21 = vadd.f32 %v2667_v43, %v2666_v20 }
 0x53f   :  { %v2669_v25 = vrot.slane %v2668_v21, 2 }
 0x541   :  { %v2670_v22 = vadd.f32 %v2669_v25, %v2668_v21 }
 0x543   :  { %v2671_v26 = vrot.slane %v2670_v22, 1 }
 0x545   :  { %v2672_v27 = vadd.f32 %v2671_v26, %v2670_v22 }
 0x547   :  { %v2694_v8 = vmul.f32 0.015625, %v2672_v27 }
 0x549   :  { %v5263_v30 = vsub.f32 %v2574_v46, %v2694_v8  ;;  %v5265_v31 = vsub.f32 %v2579_v48, %v2694_v8  ;;  %v2698_v32 = vsub.f32 %v2584_v36, %v2694_v8  ;;  %v2699_v24 = vsub.f32 %v2589_v47, %v2694_v8 }
 0x54a   :  { %v2700_v23 = vsub.f32 %v2594_v56, %v2694_v8  ;;  %v2701_v13 = vsub.f32 %v2599_v60, %v2694_v8  ;;  %v2702_v7 = vsub.f32 %v2604_v19, %v2694_v8  ;;  %v2703_v10 = vsub.f32 %v2609_v3, %v2694_v8 }
 0x54b   :  { %v2712_v38 = vmul.f32 %v5263_v30, %v5263_v30  ;;  %v2713_v28 = vmul.f32 %v5265_v31, %v5265_v31  ;;  %v2714_v40 = vmul.f32 %v2698_v32, %v2698_v32  ;;  %v2715_v42 = vmul.f32 %v2699_v24, %v2699_v24 }
 0x54c   :  { %v2716_v44 = vmul.f32 %v2700_v23, %v2700_v23  ;;  %v2717_v48 = vmul.f32 %v2701_v13, %v2701_v13  ;;  %v2718_v34 = vmul.f32 %v2702_v7, %v2702_v7  ;;  %v2719_v36 = vmul.f32 %v2703_v10, %v2703_v10 }
 0x54d   :  { %v2728_v50 = vsel %vm78_vm12, %v2712_v38, 0.0  ;;  %v2729_v45 = vsel %vm78_vm12, %v2713_v28, 0.0  ;;  %v2731_v9 = vsel %vm78_vm12, %v2714_v40, 0.0  ;;  %v2733_v51 = vsel %vm78_vm12, %v2715_v42, 0.0 }
 0x54e   :  { %v2730_v39 = vadd.f32 %v2729_v45, %v2728_v50  ;;  %v2735_v16 = vsel %vm78_vm12, %v2716_v44, 0.0  ;;  %v2737_v52 = vsel %vm78_vm12, %v2717_v48, 0.0  ;;  %v2739_v4 = vsel %vm78_vm12, %v2718_v34, 0.0 }
 0x54f   :  { %v2613_v12 = vpop.f32.mrb[16].mxu0  ;;  %v2741_v55 = vsel %vm78_vm12, %v2719_v36, 0.0 }
 0x550   :  { %v2732_v46 = vadd.f32 %v2731_v9, %v2730_v39  ;;  %v2615_v14 = vpop.f32.mrb[17].mxu0  ;;  %v5278_v37 = vadd.f32 %v5245_v11, %v2613_v12 }
 0x552   :  { %v2734_v33 = vadd.f32 %v2733_v51, %v2732_v46  ;;  %v2673_v57 = vsel %vm78_vm12, %v5278_v37, 0.0 }
 0x554   :  { %v2736_v35 = vadd.f32 %v2735_v16, %v2734_v33 }
 0x556   :  { %v2738_v53 = vadd.f32 %v2737_v52, %v2736_v35  ;;  %v3179_v52 = vld [vmem:[%s5864_s6 + $0x8] sm:$0xff] }
 0x558   :  { %v2618_v47 = vpop.f32.mrb[18].mxu0  ;;  %v2740_v49 = vadd.f32 %v2739_v4, %v2738_v53  ;;  %v3181_v53 = vld [vmem:[%s5864_s6 + $0x18] sm:$0xff]  ;;  %v3178_v4 = vld [vmem:[%s5864_s6] sm:$0xff] }
 0x559   :  { %v5282_v54 = vadd.f32 %v5245_v11, %v2618_v47  ;;  %v2620_v5 = vpop.f32.mrb[19].mxu0  ;;  %v3736_v47 = vpack.c.bf16 %v3181_v53, %v3179_v52 }
 0x55a   :  { %v2742_v56 = vadd.f32 %v2741_v55, %v2740_v49  ;;  %v3180_v49 = vld [vmem:[%s5864_s6 + $0x10] sm:$0xff]  ;;  %v3183_v5 = vld [vmem:[%s5864_s6 + $0x28] sm:$0xff]  ;;  %v3185_v55 = vld [vmem:[%s5864_s6 + $0x38] sm:$0xff] }
 0x55b   :  { %v2674_v17 = vsel %vm78_vm12, %v5282_v54, 0.0  ;;  %3737 = vmatprep.subr.bf16.mxu1 %v3736_v47 }
 0x55c   :  { %v2675_v58 = vadd.f32 %v2674_v17, %v2673_v57  ;;  %v2743_v59 = vrot.slane %v2742_v56, 4  ;;  %v3740_v57 = vpack.c.bf16 %v3185_v55, %v3183_v5  ;;  %v3182_v17 = vld [vmem:[%s5864_s6 + $0x20] sm:$0xff] }
 0x55e   :  { %v2744_v60 = vadd.f32 %v2743_v59, %v2742_v56  ;;  %v3738_v56 = vpack.c.bf16 %v3180_v49, %v3178_v4  ;;  %v3187_v59 = vld [vmem:[%s5864_s6 + $0x48] sm:$0xff] }
 0x560   :  { %v2745_v41 = vrot.slane %v2744_v60, 2  ;;  %3739 = vmatpush1.bf16.msra.mxu1 %v3738_v56 }
 0x561   :  { %3741 = vmatprep.subr.bf16.mxu1 %v3740_v57 }
 0x562   :  { %v2746_v61 = vadd.f32 %v2745_v41, %v2744_v60  ;;  %v3189_v60 = vld [vmem:[%s5864_s6 + $0x58] sm:$0xff] }
 0x564   :  { %v2747_v62 = vrot.slane %v2746_v61, 1 }
 0x566   :  { %v2748_v63 = vadd.f32 %v2747_v62, %v2746_v61  ;;  %v3744_v61 = vpack.c.bf16 %v3189_v60, %v3187_v59  ;;  %v3186_v62 = vld [vmem:[%s5864_s6 + $0x40] sm:$0xff] }
 0x568   :  { %v2770_v19 = vmul.f32 0.015625, %v2748_v63  ;;  %v3188_v63 = vld [vmem:[%s5864_s6 + $0x50] sm:$0xff] }
 0x56a   :  { %v2772_v15 = vadd.f32 1e-05, %v2770_v19  ;;  %v3191_v19 = vld [vmem:[%s5864_s6 + $0x68] sm:$0xff] }
 0x56b   :  { %v2623_v0 = vpop.f32.mrb[20].mxu0 }
 0x56c   :  { %3854 = vrsqrt.f32 %v2772_v15  ;;  %v5290_v1 = vadd.f32 %v5245_v11, %v2623_v0  ;;  %v2625_v2 = vpop.f32.mrb[21].mxu0  ;;  %v3193_v15 = vld [vmem:[%s5864_s6 + $0x78] sm:$0xff]  ;;  %v3746_v0 = vpack.c.bf16 %v3188_v63, %v3186_v62 }
 0x56d   :  { %v3748_v2 = vpack.c.bf16 %v3193_v15, %v3191_v19 }
 0x56e   :  { %v2676_v3 = vsel %vm78_vm12, %v5290_v1, 0.0 }
 0x56f   :  { %v2677_v6 = vadd.f32 %v2676_v3, %v2675_v58  ;;  %v3184_v58 = vld [vmem:[%s5864_s6 + $0x30] sm:$0xff]  ;;  %v3190_v3 = vld [vmem:[%s5864_s6 + $0x60] sm:$0xff] }
 0x570   :  { %v3742_v41 = vpack.c.bf16 %v3184_v58, %v3182_v17 }
 0x572   :  { %3743 = vmatpush1.bf16.msra.mxu1 %v3742_v41 }
 0x573   :  { %3745 = vmatprep.subr.bf16.mxu1 %v3744_v61 }
 0x574   :  { %v2628_v18 = vpop.f32.mrb[22].mxu0 }
 0x575   :  { %v5295_v20 = vadd.f32 %v5245_v11, %v2628_v18  ;;  %v2630_v43 = vpop.f32.mrb[23].mxu0  ;;  %v3195_v18 = vld [vmem:[%s5864_s6 + $0x88] sm:$0xff] }
 0x576   :  { %v3855_v21 = vpop.eup %3854  ;;  %v3197_v43 = vld [vmem:[%s5864_s6 + $0x98] sm:$0xff]  ;;  %3747 = vmatpush1.bf16.msra.mxu1 %v3746_v0 }
 0x577   :  { %v2678_v25 = vsel %vm78_vm12, %v5295_v20, 0.0  ;;  %v2780_v22 = vmul.f32 %v3855_v21, %v2700_v23  ;;  %v2781_v26 = vmul.f32 %v3855_v21, %v2701_v13  ;;  %v2782_v27 = vmul.f32 %v3855_v21, %v2702_v7  ;;  %3749 = vmatprep.subr.bf16.mxu1 %v3748_v2 }
 0x578   :  { %v2783_v8 = vmul.f32 %v3855_v21, %v2703_v10  ;;  %v2679_v38 = vadd.f32 %v2678_v25, %v2677_v6  ;;  %v2778_v28 = vmul.f32 %v3855_v21, %v2698_v32  ;;  %v2779_v40 = vmul.f32 %v3855_v21, %v2699_v24  ;;  %v3192_v6 = vld [vmem:[%s5864_s6 + $0x70] sm:$0xff] }
 0x579   :  { %v2776_v42 = vmul.f32 %v3855_v21, %v5263_v30  ;;  %v2796_v50 = vmax.f32 %v2780_v22, 0.0  ;;  %v2797_v45 = vmax.f32 %v2781_v26, 0.0  ;;  %v2798_v39 = vmax.f32 %v2782_v27, 0.0 }
 0x57a   :  { %v2799_v44 = vmax.f32 %v2783_v8, 0.0  ;;  %v2794_v12 = vmax.f32 %v2778_v28, 0.0  ;;  %v2795_v46 = vmax.f32 %v2779_v40, 0.0  ;;  %v2777_v23 = vmul.f32 %v3855_v21, %v5265_v31  ;;  %v3194_v8 = vld [vmem:[%s5864_s6 + $0x80] sm:$0xff]  ;;  %v3199_v40 = vld [vmem:[%s5864_s6 + $0xa8] sm:$0xff] }
 0x57b   :  { %v5302_v14 = vmax.f32 %v2796_v50, %v2797_v45  ;;  %v2792_v13 = vmax.f32 %v2776_v42, 0.0  ;;  %v3750_v26 = vpack.c.bf16 %v3192_v6, %v3190_v3  ;;  %v3752_v27 = vpack.c.bf16 %v3197_v43, %v3195_v18  ;;  %v3201_v42 = vld [vmem:[%s5864_s6 + $0xb8] sm:$0xff] }
 0x57c   :  { %v5300_v9 = vmax.f32 %v2798_v39, %v2799_v44  ;;  %v5305_v7 = vmax.f32 %v2794_v12, %v2795_v46  ;;  %v2793_v10 = vmax.f32 %v2777_v23, 0.0  ;;  %v3756_v39 = vpack.c.bf16 %v3201_v42, %v3199_v40  ;;  %v3198_v44 = vld [vmem:[%s5864_s6 + $0xa0] sm:$0xff]  ;;  %v3200_v12 = vld [vmem:[%s5864_s6 + $0xb0] sm:$0xff]  ;;  %v3203_v46 = vld [vmem:[%s5864_s6 + $0xc8] sm:$0xff] }
 0x57d   :  { %3751 = vmatpush1.bf16.msra.mxu1 %v3750_v26  ;;  %v3205_v23 = vld [vmem:[%s5864_s6 + $0xd8] sm:$0xff] }
 0x57e   :  { %v5307_v32 = vmax.f32 %v2792_v13, %v2793_v10  ;;  %3753 = vmatprep.subr.bf16.mxu1 %v3752_v27 }
 0x587   :  { %v2633_v24 = vpop.f32.mrb[24].mxu0 }
 0x588   :  { %v5310_v30 = vadd.f32 %v5245_v11, %v2633_v24  ;;  %v2635_v48 = vpop.f32.mrb[25].mxu0 }
 0x589   :  { %v3758_v48 = vpack.c.bf16 %v3200_v12, %v3198_v44  ;;  %v3896_v12 = vmov 1983009808  }
 0x58a   :  { %v2680_v51 = vsel %vm78_vm12, %v5310_v30, 0.0 }
 0x58b   :  { %v2681_v33 = vadd.f32 %v2680_v51, %v2679_v38  ;;  %v3196_v38 = vld [vmem:[%s5864_s6 + $0x90] sm:$0xff]  ;;  %v3760_v51 = vpack.c.bf16 %v3205_v23, %v3203_v46  ;;  %v2821_v46 = vunpack.c.l.s4 %v3896_v12 }
 0x58c   :  { %v3754_v45 = vpack.c.bf16 %v3196_v38, %v3194_v8 }
 0x58e   :  { %3755 = vmatpush1.bf16.msra.mxu1 %v3754_v45 }
 0x58f   :  { %3757 = vmatprep.subr.bf16.mxu1 %v3756_v39 }
 0x590   :  { %v2638_v34 = vpop.f32.mrb[26].mxu0 }
 0x591   :  { %v5315_v16 = vadd.f32 %v5245_v11, %v2638_v34  ;;  %v2640_v31 = vpop.f32.mrb[27].mxu0  ;;  %v3204_v34 = vld [vmem:[%s5864_s6 + $0xd0] sm:$0xff] }
 0x592   :  { %3759 = vmatpush1.bf16.msra.mxu1 %v3758_v48  ;;  %v3091_v48 = vrot.slane %v5300_v9, 1 }
 0x593   :  { %v2682_v35 = vsel %vm78_vm12, %v5315_v16, 0.0  ;;  %3761 = vmatprep.subr.bf16.mxu1 %v3760_v51 }
 0x594   :  { %v2683_v36 = vadd.f32 %v2682_v35, %v2681_v33  ;;  %v3202_v33 = vld [vmem:[%s5864_s6 + $0xc0] sm:$0xff]  ;;  %v3207_v35 = vld [vmem:[%s5864_s6 + $0xe8] sm:$0xff] }
 0x595   :  { %v3762_v52 = vpack.c.bf16 %v3204_v34, %v3202_v33  ;;  %v3003_v33 = vrot.slane %v5302_v14, 1 }
 0x597   :  { %3763 = vmatpush1.bf16.msra.mxu1 %v3762_v52 }
 0x5a3   :  { %v2643_v21 = vpop.f32.mrb[28].mxu0 }
 0x5a4   :  { %v2644_v25 = vadd.f32 %v5245_v11, %v2643_v21  ;;  %v2645_v22 = vpop.f32.mrb[29].mxu0 }
 0x5a6   :  { %v2684_v28 = vsel %vm78_vm12, %v2644_v25, 0.0 }
 0x5a7   :  { %v2685_v50 = vadd.f32 %v2684_v28, %v2683_v36 }
 0x5ab   :  { %v2648_v13 = vpop.f32.mrb[30].mxu0 }
 0x5ac   :  { %v2649_v10 = vadd.f32 %v5245_v11, %v2648_v13  ;;  %v2650_v24 = vpop.f32.mrb[31].mxu0  ;;  %v3209_v11 = vld [vmem:[%s5864_s6 + $0xf8] sm:$0xff] }
 0x5ad   :  { %v3764_v4 = vpack.c.bf16 %v3209_v11, %v3207_v35  ;;  %v5448_v24 = vshrl.u32 %v136_v29, 7  ;;  %v2909_v35 = vrot.slane %v5305_v7, 1  ;;  %v2812_v11 = vrot.slane %v5307_v32, 1 }
 0x5ae   :  { %v2686_v31 = vsel %vm78_vm12, %v2649_v10, 0.0 }
 0x5af   :  { %v2687_v36 = vadd.f32 %v2686_v31, %v2685_v50  ;;  %3765 = vmatprep.subr.bf16.mxu1 %v3764_v4  ;;  %v3095_v31 = vmax.f32 %v5300_v9, %v3091_v48  ;;  %v2816_v4 = vmax.f32 %v5307_v32, %v2812_v11 }
 0x5b1   :  { %v2688_v53 = vrot.slane %v2687_v36, 4  ;;  %v3137_v52 = vcombine.high %v3095_v31, %v3095_v31 }
 0x5b3   :  { %v2689_v47 = vadd.f32 %v2688_v53, %v2687_v36  ;;  %v3007_v36 = vmax.f32 %v5302_v14, %v3003_v33  ;;  %v2913_v53 = vmax.f32 %v5305_v7, %v2909_v35  ;;  %v2863_v14 = vcombine.high %v2816_v4, %v2816_v4 }
 0x5b5   :  { %v2690_v49 = vrot.slane %v2689_v47, 2 }
 0x5b7   :  { %v2691_v5 = vadd.f32 %v2690_v49, %v2689_v47  ;;  %v3047_v49 = vcombine.high %v3007_v36, %v3007_v36 }
 0x5b9   :  { %v2692_v55 = vrot.slane %v2691_v5, 1 }
 0x5bb   :  { %v2693_v56 = vadd.f32 %v2692_v55, %v2691_v5 }
 0x5bd   :  { %v2695_v57 = vmul.f32 0.015625, %v2693_v56  ;;  %v2957_v56 = vcombine.high %v2913_v53, %v2913_v53 }
 0x5bf   :  { %v5414_v17 = vsub.f32 %v5278_v37, %v2695_v57  ;;  %v5417_v58 = vsub.f32 %v5282_v54, %v2695_v57  ;;  %v5420_v59 = vsub.f32 %v5290_v1, %v2695_v57  ;;  %v5423_v60 = vsub.f32 %v5295_v20, %v2695_v57 }
 0x5c0   :  { %v5426_v41 = vsub.f32 %v5310_v30, %v2695_v57  ;;  %v2709_v61 = vsub.f32 %v5315_v16, %v2695_v57  ;;  %v2710_v62 = vsub.f32 %v2644_v25, %v2695_v57  ;;  %v2711_v63 = vsub.f32 %v2649_v10, %v2695_v57 }
 0x5c1   :  { %v2720_v37 = vmul.f32 %v5414_v17, %v5414_v17  ;;  %v2721_v54 = vmul.f32 %v5417_v58, %v5417_v58  ;;  %v2722_v1 = vmul.f32 %v5420_v59, %v5420_v59  ;;  %v2723_v20 = vmul.f32 %v5423_v60, %v5423_v60 }
 0x5c2   :  { %v2724_v16 = vmul.f32 %v5426_v41, %v5426_v41  ;;  %v2725_v3 = vmul.f32 %v2709_v61, %v2709_v61  ;;  %v2726_v43 = vmul.f32 %v2710_v62, %v2710_v62  ;;  %v2727_v22 = vmul.f32 %v2711_v63, %v2711_v63 }
 0x5c3   :  { %v2749_v19 = vsel %vm78_vm12, %v2720_v37, 0.0  ;;  %v2750_v30 = vsel %vm78_vm12, %v2721_v54, 0.0  ;;  %v2752_v0 = vsel %vm78_vm12, %v2722_v1, 0.0  ;;  %v2754_v6 = vsel %vm78_vm12, %v2723_v20, 0.0 }
 0x5c4   :  { %v2751_v15 = vadd.f32 %v2750_v30, %v2749_v19  ;;  %v2756_v21 = vsel %vm78_vm12, %v2724_v16, 0.0  ;;  %v2758_v26 = vsel %vm78_vm12, %v2725_v3, 0.0  ;;  %v2760_v8 = vsel %vm78_vm12, %v2726_v43, 0.0  ;;  %v3206_v43 = vld [vmem:[%s5864_s6 + $0xe0] sm:$0xff] }
 0x5c5   :  { %v2762_v28 = vsel %vm78_vm12, %v2727_v22, 0.0  ;;  %v2822_v10 = vunpack.c.0.s8 %v2821_v46  ;;  %vm2941_vm12 = vcmask 648704  }
 0x5c6   :  { %v2753_v2 = vadd.f32 %v2752_v0, %v2751_v15 }
 0x5c7   :  { %v5453_v34 = vsub.s32 %v2822_v10, %v5448_v24 }
 0x5c8   :  { %v2755_v18 = vadd.f32 %v2754_v6, %v2753_v2 }
 0x5c9   :  { %v5460_v29 = vrot.slane %v3095_v31, %v5453_v34  ;;  %v5465_v47 = vrot.slane %v3007_v36, %v5453_v34  ;;  %v5470_v55 = vrot.slane %v3137_v52, %v5453_v34 }
 0x5ca   :  { %v2757_v25 = vadd.f32 %v2756_v21, %v2755_v18  ;;  %v5486_v18 = vrot.slane %v2816_v4, %v5453_v34  ;;  %v3208_v21 = vld [vmem:[%s5864_s6 + $0xf0] sm:$0xff] }
 0x5cb   :  { %v3124_v9 = vcombine.high %v5460_v29, %v5460_v29  ;;  %v3164_v12 = vcombine.high %v5470_v55, %v5470_v55 }
 0x5cc   :  { %v2759_v27 = vadd.f32 %v2758_v26, %v2757_v25  ;;  %v3211_v25 = vld [vmem:[%s5864_s6 + $0x108] sm:$0xff]  ;;  %v5498_v26 = vrot.slane %v2863_v14, %v5453_v34  ;;  %v2849_v10 = vcombine.high %v5486_v18, %v5486_v18 }
 0x5ce   :  { %v2761_v38 = vadd.f32 %v2760_v8, %v2759_v27  ;;  %v5501_v27 = vrot.slane %v2957_v56, %v5453_v34  ;;  %v3766_v8 = vpack.c.bf16 %v3208_v21, %v3206_v43  ;;  %v2891_v33 = vcombine.high %v5498_v26, %v5498_v26 }
 0x5d0   :  { %v2763_v40 = vadd.f32 %v2762_v28, %v2761_v38  ;;  %v3213_v38 = vld [vmem:[%s5864_s6 + $0x118] sm:$0xff]  ;;  %3767 = vmatpush1.bf16.msra.mxu1 %v3766_v8  ;;  %v2985_v31 = vcombine.high %v5501_v27, %v5501_v27 }
 0x5d2   :  { %v2764_v42 = vrot.slane %v2763_v40, 4 }
 0x5d4   :  { %v2765_v50 = vadd.f32 %v2764_v42, %v2763_v40 }
 0x5d6   :  { %v2766_v45 = vrot.slane %v2765_v50, 2 }
 0x5d8   :  { %v2767_v39 = vadd.f32 %v2766_v45, %v2765_v50  ;;  %v3768_v50 = vpack.c.bf16 %v3213_v38, %v3211_v25 }
 0x5da   :  { %v2768_v44 = vrot.slane %v2767_v39, 1  ;;  %3769 = vmatprep.subr.bf16.mxu1 %v3768_v50 }
 0x5dc   :  { %v2769_v23 = vadd.f32 %v2768_v44, %v2767_v39 }
 0x5de   :  { %v2771_v13 = vmul.f32 0.015625, %v2769_v23 }
 0x5e0   :  { %v2773_v51 = vadd.f32 1e-05, %v2771_v13 }
 0x5e2   :  { %3856 = vrsqrt.f32 %v2773_v51 }
 0x5ec   :  { %v3857_v5 = vpop.eup %3856 }
 0x5ed   :  { %v2789_v57 = vmul.f32 %v3857_v5, %v2709_v61  ;;  %v2790_v37 = vmul.f32 %v3857_v5, %v2710_v62  ;;  %v2791_v54 = vmul.f32 %v3857_v5, %v2711_v63  ;;  %v2786_v7 = vmul.f32 %v3857_v5, %v5420_v59 }
 0x5ee   :  { %v2787_v32 = vmul.f32 %v3857_v5, %v5423_v60  ;;  %v2788_v1 = vmul.f32 %v3857_v5, %v5426_v41  ;;  %v2784_v20 = vmul.f32 %v3857_v5, %v5414_v17  ;;  %v2785_v19 = vmul.f32 %v3857_v5, %v5417_v58 }
 0x5ef   :  { %v2805_v30 = vmax.f32 %v2789_v57, 0.0  ;;  %v2806_v15 = vmax.f32 %v2790_v37, 0.0  ;;  %v2807_v16 = vmax.f32 %v2791_v54, 0.0  ;;  %v2802_v0 = vmax.f32 %v2786_v7, 0.0 }
 0x5f0   :  { %v2803_v2 = vmax.f32 %v2787_v32, 0.0  ;;  %v2804_v3 = vmax.f32 %v2788_v1, 0.0  ;;  %v2800_v61 = vmax.f32 %v2784_v20, 0.0  ;;  %v2801_v62 = vmax.f32 %v2785_v19, 0.0 }
 0x5f1   :  { %v3088_v63 = vmax.f32 %v2806_v15, %v2807_v16  ;;  %v5478_v59 = vrot.slane %v2913_v53, %v5453_v34  ;;  %v3034_v60 = vcombine.high %v5465_v47, %v5465_v47  ;;  %v5483_v17 = vrot.slane %v3047_v49, %v5453_v34 }
 0x5f2   :  { %v2906_v58 = vmax.f32 %v2802_v0, %v2803_v2  ;;  %v3000_v41 = vmax.f32 %v2804_v3, %v2805_v30  ;;  %v2809_v6 = vmax.f32 %v2800_v61, %v2801_v62 }
 0x5f3   :  { %v3092_v22 = vrot.slane %v3088_v63, 1  ;;  %v2943_v39 = vcombine.high %v5478_v59, %v5478_v59  ;;  %v3074_v44 = vcombine.high %v5483_v17, %v5483_v17 }
 0x5f4   :  { %v2910_v28 = vrot.slane %v2906_v58, 1  ;;  %v3004_v40 = vrot.slane %v3000_v41, 1  ;;  %v2813_v42 = vrot.slane %v2809_v6, 1 }
 0x5f5   :  { %v3096_v45 = vmax.f32 %v3088_v63, %v3092_v22 }
 0x5f6   :  { %v5512_v46 = vmax.f32 %v2906_v58, %v2910_v28  ;;  %v3008_v23 = vmax.f32 %v3000_v41, %v3004_v40  ;;  %v2817_v13 = vmax.f32 %v2809_v6, %v2813_v42 }
 0x5f7   :  { %v3112_v48 = vrot.slane %v3096_v45, %v5453_v34  ;;  %v3145_v51 = vcombine.high %v3096_v45, %v3096_v45 }
 0x5f8   :  { %v2930_v35 = vrot.slane %v5512_v46, %v5453_v34  ;;  %v5524_v11 = vrot.slane %v3008_v23, %v5453_v34  ;;  %v5527_v36 = vrot.slane %v2817_v13, %v5453_v34  ;;  %v3055_v52 = vcombine.high %v3008_v23, %v3008_v23 }
 0x5f9   :  { %v5530_v53 = vrot.slane %v3145_v51, %v5453_v34  ;;  %v3115_v4 = vrot.slane %v3112_v48, 7  ;;  %v2871_v49 = vcombine.high %v2817_v13, %v2817_v13  ;;  %v3125_v5 = vcombine.high %v3112_v48, %v3112_v48 }
 0x5fa   :  { %v2933_v14 = vrot.slane %v2930_v35, 7  ;;  %v3035_v56 = vcombine.high %v5524_v11, %v5524_v11  ;;  %v2850_v57 = vcombine.high %v5527_v36, %v5527_v36  ;;  %v3062_v37 = vrot.slane %v3055_v52, %v5453_v34 }
 0x5fb   :  { %v3116_v54 = vsel %vm2839_vm0, %v3115_v4, %v5460_v29  ;;  %v2878_v7 = vrot.slane %v2871_v49, %v5453_v34  ;;  %v3128_v32 = vrot.slane %v3125_v5, 7  ;;  %v2944_v1 = vcombine.high %v2930_v35, %v2930_v35 }
 0x5fc   :  { %v3117_v20 = vsel %vm2841_vm6, %v3115_v4, %v3116_v54  ;;  %v2934_v19 = vsel %vm2839_vm0, %v2933_v14, %v5478_v59  ;;  %v3038_v30 = vrot.slane %v3035_v56, 7  ;;  %v2853_v15 = vrot.slane %v2850_v57, 7 }
 0x5fd   :  { %v3118_v16 = vsel %vm2843_vm7, %v3115_v4, %v3117_v20  ;;  %v2935_v0 = vsel %vm2841_vm6, %v2933_v14, %v2934_v19  ;;  %v3065_v2 = vrot.slane %v3062_v37, 7  ;;  %v2881_v3 = vrot.slane %v2878_v7, 7 }
 0x5fe   :  { %v3119_v61 = vsel %vm2845_vm8, %v3115_v4, %v3118_v16  ;;  %v2936_v62 = vsel %vm2843_vm7, %v2933_v14, %v2935_v0  ;;  %v3039_v63 = vsel %vm2839_vm0, %v3038_v30, %v3034_v60  ;;  %v2854_v58 = vsel %vm2839_vm0, %v2853_v15, %v2849_v10 }
 0x5ff   :  { %3120 = vrot.lane.b32.xlu1 %v3119_v61, %s3888_s15  ;;  %v2937_v41 = vsel %vm2845_vm8, %v2933_v14, %v2936_v62  ;;  %v3040_v6 = vsel %vm2841_vm6, %v3038_v30, %v3039_v63  ;;  %v2855_v43 = vsel %vm2841_vm6, %v2853_v15, %v2854_v58  ;;  %v3066_v21 = vsel %vm2839_vm0, %v3065_v2, %v5483_v17  ;;  %v3215_v58 = vld [vmem:[%s5864_s6 + $0x128] sm:$0xff] }
 0x600   :  { %2938 = vrot.lane.b32.xlu0 %v2937_v41, %s3888_s15  ;;  %v3041_v25 = vsel %vm2843_vm7, %v3038_v30, %v3040_v6  ;;  %v2856_v22 = vsel %vm2843_vm7, %v2853_v15, %v2855_v43  ;;  %v3067_v60 = vsel %vm2841_vm6, %v3065_v2, %v3066_v21  ;;  %v2882_v8 = vsel %vm2839_vm0, %v2881_v3, %v5498_v26  ;;  %v3210_v26 = vld [vmem:[%s5864_s6 + $0x100] sm:$0xff]  ;;  %v3217_v41 = vld [vmem:[%s5864_s6 + $0x138] sm:$0xff] }
 0x601   :  { %v3042_v38 = vsel %vm2845_vm8, %v3038_v30, %v3041_v25  ;;  %v2857_v28 = vsel %vm2845_vm8, %v2853_v15, %v2856_v22  ;;  %v3068_v40 = vsel %vm2843_vm7, %v3065_v2, %v3067_v60  ;;  %v2883_v42 = vsel %vm2841_vm6, %v2881_v3, %v2882_v8  ;;  %v3214_v8 = vld [vmem:[%s5864_s6 + $0x120] sm:$0xff] }
 0x602   :  { %v3069_v50 = vsel %vm2845_vm8, %v3065_v2, %v3068_v40  ;;  %v2884_v45 = vsel %vm2843_vm7, %v2881_v3, %v2883_v42  ;;  %v3129_v23 = vsel %vm2839_vm0, %v3128_v32, %v3124_v9  ;;  %v2947_v13 = vrot.slane %v2944_v1, 7  ;;  %v3221_v40 = vld [vmem:[%s5864_s6 + $0x158] sm:$0xff] }
 0x603   :  { %3043 = vrot.lane.b32.xlu1 %v3042_v38, %s3887_s14  ;;  %v2885_v10 = vsel %vm2845_vm8, %v2881_v3, %v2884_v45  ;;  %v3130_v48 = vsel %vm2841_vm6, %v3128_v32, %v3129_v23  ;;  %v3155_v51 = vrot.slane %v5530_v53, 7  ;;  %v2965_v35 = vcombine.high %v5512_v46, %v5512_v46  ;;  %v3216_v38 = vld [vmem:[%s5864_s6 + $0x130] sm:$0xff] }
 0x604   :  { %2858 = vrot.lane.b32.xlu0 %v2857_v28, %s3887_s14  ;;  %v3131_v52 = vsel %vm2843_vm7, %v3128_v32, %v3130_v48  ;;  %v2948_v29 = vsel %vm2839_vm0, %v2947_v13, %v2943_v39  ;;  %v3075_v9 = vcombine.high %v3062_v37, %v3062_v37  ;;  %v2892_v4 = vcombine.high %v2878_v7, %v2878_v7  ;;  %v3220_v48 = vld [vmem:[%s5864_s6 + $0x150] sm:$0xff] }
 0x605   :  { %v3132_v49 = vsel %vm2845_vm8, %v3128_v32, %v3131_v52  ;;  %v2949_v5 = vsel %vm2841_vm6, %v2947_v13, %v2948_v29  ;;  %v3156_v14 = vsel %vm2839_vm0, %v3155_v51, %v5470_v55  ;;  %v2972_v46 = vrot.slane %v2965_v35, %v5453_v34  ;;  %v3223_v52 = vld [vmem:[%s5864_s6 + $0x168] sm:$0xff]  ;;  %v3225_v29 = vld [vmem:[%s5864_s6 + $0x178] sm:$0xff] }
 0x606   :  { %v2950_v56 = vsel %vm2843_vm7, %v2947_v13, %v2949_v5  ;;  %v3157_v57 = vsel %vm2841_vm6, %v3155_v51, %v3156_v14  ;;  %v3078_v54 = vrot.slane %v3075_v9, 7  ;;  %v2895_v1 = vrot.slane %v2892_v4, 7  ;;  %v3222_v5 = vld [vmem:[%s5864_s6 + $0x160] sm:$0xff]  ;;  %v3224_v14 = vld [vmem:[%s5864_s6 + $0x170] sm:$0xff] }
 0x607   :  { %3070 = vrot.lane.b32.xlu1 %v3069_v50, %s3890_s16  ;;  %v2951_v59 = vsel %vm2845_vm8, %v2947_v13, %v2950_v56  ;;  %v3158_v39 = vsel %vm2843_vm7, %v3155_v51, %v3157_v57  ;;  %v2975_v37 = vrot.slane %v2972_v46, 7  ;;  %v3165_v7 = vcombine.high %v5530_v53, %v5530_v53  ;;  %v3229_v56 = vld [vmem:[%s5864_s6 + $0x198] sm:$0xff]  ;;  %v3226_v57 = vld [vmem:[%s5864_s6 + $0x180] sm:$0xff] }
 0x608   :  { %2886 = vrot.lane.b32.xlu0 %v2885_v10, %s3890_s16  ;;  %v3159_v34 = vsel %vm2845_vm8, %v3155_v51, %v3158_v39  ;;  %v3079_v32 = vsel %vm2839_vm0, %v3078_v54, %v3074_v44  ;;  %v2896_v20 = vsel %vm2839_vm0, %v2895_v1, %v2891_v33  ;;  %v2986_v19 = vcombine.high %v2972_v46, %v2972_v46  ;;  %v3212_v33 = vld [vmem:[%s5864_s6 + $0x110] sm:$0xff]  ;;  %v3218_v10 = vld [vmem:[%s5864_s6 + $0x140] sm:$0xff]  ;;  %v3227_v46 = vld [vmem:[%s5864_s6 + $0x188] sm:$0xff] }
 0x609   :  { %v2976_v30 = vsel %vm2839_vm0, %v2975_v37, %v5501_v27  ;;  %v3080_v53 = vsel %vm2841_vm6, %v3078_v54, %v3079_v32  ;;  %v2897_v15 = vsel %vm2841_vm6, %v2895_v1, %v2896_v20  ;;  %v3168_v16 = vrot.slane %v3165_v7, 7  ;;  %v3338_v39 = vld [vmem:[%s5866_s8] sm:$0xff]  ;;  %v3356_v32 = vld [vmem:[%s5866_s8 + $0x90] sm:$0xff]  ;;  %v3357_v20 = vld [vmem:[%s5866_s8 + $0x98] sm:$0xff] }
 0x60a   :  { %v2977_v0 = vsel %vm2841_vm6, %v2975_v37, %v2976_v30  ;;  %v3081_v17 = vsel %vm2843_vm7, %v3078_v54, %v3080_v53  ;;  %v2898_v44 = vsel %vm2843_vm7, %v2895_v1, %v2897_v15  ;;  %v2989_v2 = vrot.slane %v2986_v19, 7  ;;  %v3340_v15 = vld [vmem:[%s5866_s8 + $0x10] sm:$0xff] }
 0x60b   :  { %3133 = vrot.lane.b32.xlu1 %v3132_v49, %s3895_s30  ;;  %v2978_v3 = vsel %vm2843_vm7, %v2975_v37, %v2977_v0  ;;  %v3082_v61 = vsel %vm2845_vm8, %v3078_v54, %v3081_v17  ;;  %v2899_v62 = vsel %vm2845_vm8, %v2895_v1, %v2898_v44  ;;  %v3169_v63 = vsel %vm2839_vm0, %v3168_v16, %v3164_v12  ;;  %v3228_v54 = vld [vmem:[%s5864_s6 + $0x190] sm:$0xff]  ;;  %v3354_v1 = vld [vmem:[%s5866_s8 + $0x80] sm:$0xff]  ;;  %v3231_v17 = vld [vmem:[%s5864_s6 + $0x1a8] sm:$0xff] }
 0x60c   :  { %2952 = vrot.lane.b32.xlu0 %v2951_v59, %s3895_s30  ;;  %v2979_v6 = vsel %vm2845_vm8, %v2975_v37, %v2978_v3  ;;  %v3170_v43 = vsel %vm2841_vm6, %v3168_v16, %v3169_v63  ;;  %v2990_v55 = vsel %vm2839_vm0, %v2989_v2, %v2985_v31  ;;  %v3027_v12 = vrot.slane %v5524_v11, 7  ;;  %v3355_v59 = vld [vmem:[%s5866_s8 + $0x88] sm:$0xff]  ;;  %v3358_v0 = vld [vmem:[%s5866_s8 + $0xa0] sm:$0xff]  ;;  %v3233_v44 = vld [vmem:[%s5864_s6 + $0x1b8] sm:$0xff] }
 0x60d   :  { %v3171_v21 = vsel %vm2843_vm7, %v3168_v16, %v3170_v43  ;;  %v2991_v25 = vsel %vm2841_vm6, %v2989_v2, %v2990_v55  ;;  %v2838_v22 = vrot.slane %v5527_v36, 7  ;;  %v3770_v60 = vpack.c.bf16 %v3212_v33, %v3210_v26  ;;  %v3219_v36 = vld [vmem:[%s5864_s6 + $0x148] sm:$0xff]  ;;  %v3230_v3 = vld [vmem:[%s5864_s6 + $0x1a0] sm:$0xff]  ;;  %v3361_v43 = vld [vmem:[%s5866_s8 + $0xb8] sm:$0xff] }
 0x60e   :  { %v3172_v27 = vsel %vm2845_vm8, %v3168_v16, %v3171_v21  ;;  %v2992_v31 = vsel %vm2843_vm7, %v2989_v2, %v2991_v25  ;;  %v3028_v11 = vsel %vm2839_vm0, %v3027_v12, %v5465_v47  ;;  %v3772_v28 = vpack.c.bf16 %v3217_v41, %v3215_v58  ;;  %v3341_v16 = vld [vmem:[%s5866_s8 + $0x18] sm:$0xff]  ;;  %v3343_v63 = vld [vmem:[%s5866_s8 + $0x28] sm:$0xff]  ;;  %v3232_v41 = vld [vmem:[%s5864_s6 + $0x1b0] sm:$0xff] }
 0x60f   :  { %3160 = vrot.lane.b32.xlu1 %v3159_v34, %s3892_s3  ;;  %v2993_v42 = vsel %vm2845_vm8, %v2989_v2, %v2992_v31  ;;  %v3029_v50 = vsel %vm2841_vm6, %v3027_v12, %v3028_v11  ;;  %v2840_v45 = vsel %vm2839_vm0, %v2838_v22, %v5486_v18  ;;  %3771 = vmatpush1.bf16.msra.mxu1 %v3770_v60  ;;  %v3339_v34 = vld [vmem:[%s5866_s8 + $0x8] sm:$0xff]  ;;  %v3236_v31 = vld [vmem:[%s5864_s6 + $0x1d0] sm:$0xff]  ;;  %v3362_v11 = vld [vmem:[%s5866_s8 + $0xc0] sm:$0xff] }
 0x610   :  { %2980 = vrot.lane.b32.xlu0 %v2979_v6, %s3892_s3  ;;  %v3030_v47 = vsel %vm2843_vm7, %v3027_v12, %v3029_v50  ;;  %v2842_v23 = vsel %vm2841_vm6, %v2838_v22, %v2840_v45  ;;  %3773 = vmatprep.subr.bf16.mxu1 %v3772_v28  ;;  %v3774_v13 = vpack.c.bf16 %v3216_v38, %v3214_v8  ;;  %v3359_v2 = vld [vmem:[%s5866_s8 + $0xa8] sm:$0xff]  ;;  %v3360_v6 = vld [vmem:[%s5866_s8 + $0xb0] sm:$0xff]  ;;  %v3345_v38 = vld [vmem:[%s5866_s8 + $0x38] sm:$0xff] }
 0x611   :  { %v3031_v51 = vsel %vm2845_vm8, %v3027_v12, %v3030_v47  ;;  %v2844_v18 = vsel %vm2843_vm7, %v2838_v22, %v2842_v23  ;;  %v3776_v35 = vpack.c.bf16 %v3221_v40, %v3219_v36  ;;  %v3778_v4 = vpack.c.bf16 %v3220_v48, %v3218_v10  ;;  %v3235_v55 = vld [vmem:[%s5864_s6 + $0x1c8] sm:$0xff]  ;;  %v3237_v12 = vld [vmem:[%s5864_s6 + $0x1d8] sm:$0xff]  ;;  %v3344_v8 = vld [vmem:[%s5866_s8 + $0x30] sm:$0xff] }
 0x612   :  { %3033 = vst.msk [vmem:[#allocation6 + $0x2] sm:$0x3] %vm80_vm13, %v3031_v51  ;;  %v2846_v9 = vsel %vm2845_vm8, %v2838_v22, %v2844_v18  ;;  %v3780_v49 = vpack.c.bf16 %v3225_v29, %v3223_v52  ;;  %v3782_v37 = vpack.c.bf16 %v3224_v14, %v3222_v5  ;;  %v3800_v7 = vpack.c.bf16 %v3355_v59, %v3354_v1  ;;  %v3234_v22 = vld [vmem:[%s5864_s6 + $0x1c0] sm:$0xff]  ;;  %v3363_v28 = vld [vmem:[%s5866_s8 + $0xc8] sm:$0xff]  ;;  %v3241_v40 = vld [vmem:[%s5864_s6 + $0x1f8] sm:$0xff] }
 0x613   :  { %3083 = vrot.lane.b32.xlu1 %v3082_v61, %s3884_s0  ;;  %2848 = vst.msk [vmem:[#allocation6] sm:$0x3] %vm80_vm13, %v2846_v9  ;;  %3775 = vmatpush1.bf16.msra.mxu1 %v3774_v13  ;;  %v3784_v19 = vpack.c.bf16 %v3229_v56, %v3227_v46  ;;  %v3802_v30 = vpack.c.bf16 %v3339_v34, %v3338_v39  ;;  %v3239_v36 = vld [vmem:[%s5864_s6 + $0x1e8] sm:$0xff]  ;;  %v3238_v45 = vld [vmem:[%s5864_s6 + $0x1e0] sm:$0xff]  ;;  %v3240_v48 = vld [vmem:[%s5864_s6 + $0x1f0] sm:$0xff]  ;;  %vm2955_vm13 = vcmask 779904  }
 0x614   :  { %2900 = vrot.lane.b32.xlu0 %v2899_v62, %s3884_s0  ;;  %3777 = vmatprep.subr.bf16.mxu1 %v3776_v35  ;;  %v3804_v53 = vpack.c.bf16 %v3357_v20, %v3356_v32  ;;  %v3806_v26 = vpack.c.bf16 %v3341_v16, %v3340_v15  ;;  %v3786_v33 = vpack.c.bf16 %v3228_v54, %v3226_v57  ;;  %v3342_v62 = vld [vmem:[%s5866_s8 + $0x20] sm:$0xff]  ;;  %v3347_v13 = vld [vmem:[%s5866_s8 + $0x48] sm:$0xff]  ;;  %v3364_v51 = vld [vmem:[%s5866_s8 + $0xd0] sm:$0xff] }
 0x615   :  { %3801 = vmatprep.subr.bf16.mxu0 %v3800_v7  ;;  %v3808_v61 = vpack.c.bf16 %v3359_v2, %v3358_v0  ;;  %v3788_v58 = vpack.c.bf16 %v3233_v44, %v3231_v17  ;;  %v3810_v21 = vpack.c.bf16 %v3343_v63, %v3342_v62  ;;  %v3790_v25 = vpack.c.bf16 %v3232_v41, %v3230_v3  ;;  %v3346_v23 = vld [vmem:[%s5866_s8 + $0x40] sm:$0xff]  ;;  %v3365_v18 = vld [vmem:[%s5866_s8 + $0xd8] sm:$0xff]  ;;  %v3348_v9 = vld [vmem:[%s5866_s8 + $0x50] sm:$0xff] }
 0x616   :  { %3803 = vmatpush3.bf16.msra.mxu0 %v3802_v30  ;;  %v3812_v60 = vpack.c.bf16 %v3361_v43, %v3360_v6  ;;  %v3794_v50 = vpack.c.bf16 %v3236_v31, %v3234_v22  ;;  %v3816_v47 = vpack.c.bf16 %v3363_v28, %v3362_v11  ;;  %v3796_v10 = vpack.c.bf16 %v3241_v40, %v3239_v36  ;;  %v3367_v5 = vld [vmem:[%s5866_s8 + $0xe8] sm:$0xff]  ;;  %v3350_v56 = vld [vmem:[%s5866_s8 + $0x60] sm:$0xff]  ;;  %v3368_v54 = vld [vmem:[%s5866_s8 + $0xf0] sm:$0xff] }
 0x617   :  { %3173 = vrot.lane.b32.xlu1 %v3172_v27, %s3893_s13  ;;  %3779 = vmatpush1.bf16.msra.mxu1 %v3778_v4  ;;  %v3792_v27 = vpack.c.bf16 %v3237_v12, %v3235_v55  ;;  %v3818_v35 = vpack.c.bf16 %v3347_v13, %v3346_v23  ;;  %v3798_v52 = vpack.c.bf16 %v3240_v48, %v3238_v45  ;;  %v3349_v4 = vld [vmem:[%s5866_s8 + $0x58] sm:$0xff]  ;;  %v3351_v57 = vld [vmem:[%s5866_s8 + $0x68] sm:$0xff]  ;;  %v3246_v63 = vsub.s32 0, %v5448_v24 }
 0x618   :  { %2994 = vrot.lane.b32.xlu0 %v2993_v42, %s3893_s13  ;;  %3781 = vmatprep.subr.bf16.mxu1 %v3780_v49  ;;  %v3814_v42 = vpack.c.bf16 %v3345_v38, %v3344_v8  ;;  %v3820_v29 = vpack.c.bf16 %v3365_v18, %v3364_v51  ;;  %v3366_v49 = vld [vmem:[%s5866_s8 + $0xe0] sm:$0xff]  ;;  %v3822_v14 = vpack.c.bf16 %v3349_v4, %v3348_v9  ;;  %v3369_v1 = vld [vmem:[%s5866_s8 + $0xf8] sm:$0xff]  ;;  %v3250_v41 = vsub.s32 1, %v5448_v24 }
 0x619   :  { %3805 = vmatprep.subr.bf16.mxu0 %v3804_v53  ;;  %v3824_v46 = vpack.c.bf16 %v3367_v5, %v3366_v49  ;;  %v3826_v59 = vpack.c.bf16 %v3351_v57, %v3350_v56  ;;  %v3828_v39 = vpack.c.bf16 %v3369_v1, %v3368_v54  ;;  %v3353_v7 = vld [vmem:[%s5866_s8 + $0x78] sm:$0xff]  ;;  %v3530_v38 = vld [vmem:[%s5867_s9] ss:$0 sm:$0xff] }
 0x61a   :  { %3807 = vmatpush3.bf16.msra.mxu0 %v3806_v26 }
 0x61b   :  { %3783 = vmatpush1.bf16.msra.mxu1 %v3782_v37  ;;  %3809 = vmatprep.subr.bf16.mxu0 %v3808_v61  ;;  %v3352_v37 = vld [vmem:[%s5866_s8 + $0x70] sm:$0xff] }
 0x61c   :  { %3785 = vmatprep.subr.bf16.mxu1 %v3784_v19  ;;  %v3830_v34 = vpack.c.bf16 %v3353_v7, %v3352_v37 }
 0x61e   :  { %3811 = vmatpush3.bf16.msra.mxu0 %v3810_v21 }
 0x61f   :  { %3787 = vmatpush1.bf16.msra.mxu1 %v3786_v33  ;;  %3813 = vmatprep.subr.bf16.mxu0 %v3812_v60 }
 0x620   :  { %3789 = vmatprep.subr.bf16.mxu1 %v3788_v58  ;;  %v3242_v58 = vld [vmem:[%s5865_s7] sm:$0x3]  ;;  %s3455_s7 = sshll.u32 %s3897_s18, 4  ;;  %s3456_s7 = int_to_ptr.vmem [resolvable:$true] %s3455_s7 }
 0x621   :  { %v3247_v6 = vrot.slane %v3242_v58, %v3246_v63  ;;  %v3251_v43 = vrot.slane %v3242_v58, %v3250_v41  ;;  %s3858_s14 = scalar_lea.vmem %s3456_s7, 32  ;;  %p3863_p1 = scmp.lt.s32.totalorder %s3456_s7, %s3456_s7 }
 0x622   :  { %3815 = vmatpush3.bf16.msra.mxu0 %v3814_v42  ;;  %p3859_p0 = scmp.ne.s32.totalorder %s3456_s7, %s3858_s14  ;;  %p3864_p2 = scmp.lt.s32.totalorder %s3858_s14, %s3858_s14 }
 0x623   :  { %3791 = vmatpush1.bf16.msra.mxu1 %v3790_v25  ;;  %3817 = vmatprep.subr.bf16.mxu0 %v3816_v47 }
 0x624   :  { %3793 = vmatprep.subr.bf16.mxu1 %v3792_v27  ;;  %p3865_p3 = por %p3864_p2, %p3863_p1 }
 0x626   :  { %3819 = vmatpush3.bf16.msra.mxu0 %v3818_v35  ;;  %p3866_p4 = pnand %p3865_p3, %p3859_p0 }
 0x627   :  { %3795 = vmatpush1.bf16.msra.mxu1 %v3794_v50  ;;  %3821 = vmatprep.subr.bf16.mxu0 %v3820_v29 }
 0x628   :  { %3797 = vmatprep.subr.bf16.mxu1 %v3796_v10 }
 0x62a   :  { %3823 = vmatpush3.bf16.msra.mxu0 %v3822_v14 }
 0x62b   :  { %3799 = vmatpush1.bf16.msra.mxu1 %v3798_v52  ;;  %3825 = vmatprep.subr.bf16.mxu0 %v3824_v46 }
 0x62e   :  { %3827 = vmatpush3.bf16.msra.mxu0 %v3826_v59 }
 0x62f   :  { %3829 = vmatprep.subr.bf16.mxu0 %v3828_v39 }
 0x632   :  { %3831 = vmatpush3.bf16.msra.mxu0 %v3830_v34 }
 0x671   :  { %v3121_v32 = vpop.permute.xlu1 %3120 }
 0x672   :  { %v2939_v20 = vpop.permute.xlu0 %2938 }
 0x675   :  { %v3044_v19 = vpop.permute.xlu1 %3043 }
 0x676   :  { %3046 = vst.msk [vmem:[#allocation6 + $0x2] sm:$0x3] %vm2861_vm9, %v3044_v19  ;;  %v2859_v30 = vpop.permute.xlu0 %2858 }
 0x677   :  { %2862 = vst.msk [vmem:[#allocation6] sm:$0x3] %vm2861_vm9, %v2859_v30 }
 0x679   :  { %v3071_v53 = vpop.permute.xlu1 %3070 }
 0x67a   :  { %3073 = vst.msk [vmem:[#allocation6 + $0x2] sm:$0x3] %vm2889_vm10, %v3071_v53  ;;  %v2887_v15 = vpop.permute.xlu0 %2886 }
 0x67b   :  { %2890 = vst.msk [vmem:[#allocation6] sm:$0x3] %vm2889_vm10, %v2887_v15 }
 0x67d   :  { %v3134_v16 = vpop.permute.xlu1 %3133 }
 0x67e   :  { %v2953_v0 = vpop.permute.xlu0 %2952 }
 0x681   :  { %v3161_v17 = vpop.permute.xlu1 %3160 }
 0x682   :  { %v2981_v44 = vpop.permute.xlu0 %2980 }
 0x685   :  { %v3084_v2 = vpop.permute.xlu1 %3083 }
 0x686   :  { %3086 = vst.msk [vmem:[#allocation6 + $0x2] sm:$0x3] %vm2903_vm11, %v3084_v2  ;;  %v2901_v26 = vpop.permute.xlu0 %2900 }
 0x687   :  { %3123 = vst.msk [vmem:[#allocation6 + $0x2] sm:$0x3] %vm2941_vm12, %v3121_v32 }
 0x688   :  { %2904 = vst.msk [vmem:[#allocation6] sm:$0x3] %vm2903_vm11, %v2901_v26 }
 0x689   :  { %2942 = vst.msk [vmem:[#allocation6] sm:$0x3] %vm2941_vm12, %v2939_v20  ;;  %v3174_v33 = vpop.permute.xlu1 %3173 }
 0x68a   :  { %3136 = vst.msk [vmem:[#allocation6 + $0x2] sm:$0x3] %vm2955_vm13, %v3134_v16  ;;  %2956 = vst.msk [vmem:[#allocation6] sm:$0x3] %vm2955_vm13, %v2953_v0  ;;  %v2995_v3 = vpop.permute.xlu0 %2994 }
 0x68b   :  { %3163 = vst.msk [vmem:[#allocation6 + $0x2] sm:$0x3] %vm2983_vm14, %v3161_v17  ;;  %2984 = vst.msk [vmem:[#allocation6] sm:$0x3] %vm2983_vm14, %v2981_v44 }
 0x68c   :  { %3176 = vst.msk [vmem:[#allocation6 + $0x2] sm:$0x3] %vm2997_vm15, %v3174_v33  ;;  %2998 = vst.msk [vmem:[#allocation6] sm:$0x3] %vm2997_vm15, %v2995_v3 }
 0x693   :  { %v3529_v61 = vld.sshfl [vmem:[#allocation6] sm:$0x33 pattern:$0x76325410] }
 0x694   :  { %v3262_v62 = vcombine.high %v3529_v61, %v3529_v61 }
 0x696   :  { %3329 = vmatprep.mubr.f32.mxu1 %v3262_v62 }
 0x697   :  { %3330 = vmatmul.mubr.f32.vlgmr.msra.gmra.mrb[32].mxu1 %v3529_v61 }
 0x76a   :  { %v3331_v55 = vpop.f32.mrb[32].mxu1 }
 0x76b   :  { %v3332_v12 = vadd.f32 %v3331_v55, %v3247_v6  ;;  %v3333_v21 = vpop.f32.mrb[33].mxu1 }
 0x76c   :  { %v3334_v25 = vadd.f32 %v3333_v21, %v3251_v43 }
 0x76d   :  { %v3336_v60 = vmax.f32 %v3332_v12, 0.0 }
 0x76e   :  { %v3337_v22 = vmax.f32 %v3334_v25, 0.0 }
 0x770   :  { %3441 = vmatprep.mubr.f32.mxu0 %v3337_v22 }
 0x771   :  { %3442 = vmatmul.mubr.f32.vlgmr.msra.gmra.mrb[32].mxu0 %v3336_v60 }
 0x844   :  { %v3608_v8 = vpop.f32.mrb[32].mxu0 }
 0x845   :  { %v3609_v27 = vpop.f32.mrb[33].mxu0 }
 0x846   :  { %v3610_v31 = vadd.f32 %v3609_v27, %v3608_v8 }
 0x848   :  { %v3444_v24 = vadd.f32 %v3610_v31, %v3530_v38 }
 0x84a   :  { %3448 = vst.msk [vmem:[#allocation7] sm:$0x3] %vm3447_vm1, %v3444_v24 }
 0x84b   :  { %3869 = shalt.err (!%p3866_p4)
}
 0x84c   :  { %s3870_s19 = scalar_lea.hbm %s5868_s10, 32 }
 0x84d   :  { %p3871_p5 = scmp.ne.s32.totalorder %s5868_s10, %s3870_s19  ;;  %p3874_p6 = scmp.lt.u32.totalorder %s3870_s19, %s5868_s10 }
 0x84f   :  { %p3876_p7 = pnand %p3874_p6, %p3871_p5 }
 0x851   :  { %3879 = shalt.err (!%p3876_p7)
}
 0x852   :  { %3458 = dma.vmem_to_hbm [thread:$0]  %s3456_s7, 32, %s5868_s10, [#allocation8]  }
 0x853   :  { %3880 = dma.done.wait [#allocation8], 32  }
 0x854   :  { %3881 = vsyncadd [#allocation8], 4294967264 }
 0x855   :  { %3462 = vsyncpa [#allocation8], 1 }

</bundles_post_ra>
